<compile_context>
chip_gen: v7x
topology: tpu7x:2x2x1
jax: 0.10.0
libtpu: 0.0.40
codegen_flags: <defaults>
</compile_context>

<pallas_src>
import functools

import jax
import jax.numpy as jnp
from jax.experimental import pallas as pl
from jax.experimental.pallas import tpu as pltpu

# ------------------------- config (small synthetic sizes) -------------------
VOCAB = 50
EMB = 32          # emb_dim == hidden_dim (GGNN node state size)
HID = 32          # config.hidden_dim
B = 2             # batch
N = 8             # seq len / number of graph nodes
E = 2             # number of edge types in enc_graph_batch
GGNN_STEPS = 2    # GGNN propagation steps


def _full_spec(shape):
    """BlockSpec covering the whole array (grid=(1,))."""
    nd = len(shape)
    return pl.BlockSpec(tuple(int(s) for s in shape), lambda i, nd=nd: (0,) * nd)


# ------------------------- fused dual-branch GGNN kernel ---------------------
def _ggnn_fused_kernel(emb_ref, adj_ref, nmask_ref,
                       w_all_ref, b_all_ref, w_rzc_ref, u_rz_ref, uc_ref, b_rzc_ref,
                       gproj_ref, w_h_ref,
                       graph_slab_ref, graph_dec_ref, ast_out_ref,
                       *, batch, n_nodes, hid, n_edge, n_steps):
    # TODO(synk): GGNNModel source is unavailable; this is a standard GGNN
    # (Li et al. 2016): masked adjacency message passing + GRU update, with the
    # node_type_mask applied to the final node states.
    bn = batch * n_nodes
    h0 = emb_ref[...].reshape(bn, hid)                      # (B*N, H)
    nmask = nmask_ref[...]                                  # (B*N, 1)
    adj = [adj_ref[e] for e in range(n_edge)]               # list of (B, N, N)

    for br in range(2):                                     # 0 = graph, 1 = AST
        w_all = w_all_ref[br]                               # (H, E*H)
        b_all = b_all_ref[br]                               # (1, E*H)
        w_rzc = w_rzc_ref[br]                               # (H, 3H)
        u_rz = u_rz_ref[br]                                 # (H, 2H)
        uc = uc_ref[br]                                     # (H, H)
        b_rzc = b_rzc_ref[br]                               # (1, 3H)

        h = h0
        for _ in range(n_steps):
            # one concatenated edge-message matmul: (B*N, E*H)
            m_all = jnp.dot(h, w_all, preferred_element_type=jnp.float32) + b_all
            m3 = m_all.reshape(batch, n_nodes, n_edge * hid)
            msg = None
            for e in range(n_edge):
                m_e = m3[:, :, e * hid:(e + 1) * hid]       # (B, N, H)
                term = jnp.einsum('bij,bjh->bih', adj[e], m_e,
                                  preferred_element_type=jnp.float32)
                msg = term if msg is None else msg + term
            msg2 = msg.reshape(bn, hid)

            # GRU update with concatenated gate weights (3 matmuls / step).
            gm = jnp.dot(msg2, w_rzc, preferred_element_type=jnp.float32) + b_rzc
            gh = jnp.dot(h, u_rz, preferred_element_type=jnp.float32)
            rz = jax.nn.sigmoid(gm[:, :2 * hid] + gh)       # one 64-wide EUP push
            r = rz[:, :hid]
            z = rz[:, hid:]
            htil = jnp.tanh(gm[:, 2 * hid:]
                            + jnp.dot(r * h, uc, preferred_element_type=jnp.float32))
            h = (1.0 - z) * h + z * htil

        masked = h * nmask                                  # (B*N, H)
        if br == 0:
            # fused epilogue: graph projection + W_h feature, one 128-lane store
            out2h = jnp.dot(masked, gproj_ref[...], preferred_element_type=jnp.float32)
            feat = jnp.dot(out2h, w_h_ref[...], preferred_element_type=jnp.float32)
            graph_slab_ref[...] = jnp.concatenate([out2h, feat], axis=-1)
            graph_dec_ref[...] = jnp.max(masked.reshape(batch, n_nodes, hid), axis=1)
        else:
            ast_out_ref[...] = masked


def ggnn_fused_forward(emb, adj_masked, node_mask, params):
    g = params["ggnn"]
    kernel = functools.partial(_ggnn_fused_kernel, batch=B, n_nodes=N, hid=HID,
                               n_edge=E, n_steps=GGNN_STEPS)
    ins = (emb, adj_masked, node_mask,
           g["w_all"], g["b_all"], g["w_rzc"], g["u_rz"], g["uc"], g["b_rzc"],
           params["graph_proj_w"], params["w_h"])
    out_shapes = (jax.ShapeDtypeStruct((B * N, 4 * HID), jnp.float32),   # [proj|W_h]
                  jax.ShapeDtypeStruct((B, HID), jnp.float32),           # max-reduce
                  jax.ShapeDtypeStruct((B * N, HID), jnp.float32))       # AST branch
    return pl.pallas_call(
        kernel,
        out_shape=out_shapes,
        grid=(1,),
        in_specs=[_full_spec(a.shape) for a in ins],
        out_specs=[_full_spec(s.shape) for s in out_shapes],
        compiler_params=pltpu.CompilerParams(dimension_semantics=("arbitrary",)),
    )(*ins)


# ---------------------- fused bidirectional LSTM kernel ----------------------
def _bilstm_fused_kernel(lens_ref, x_ref,
                         wih_f_ref, whh_f_ref, b_f_ref,
                         wih_b_ref, whh_b_ref, b_b_ref, w_h_ref,
                         ast_slab_ref, hn_ref, cn_ref,
                         gxf_scr, gxb_scr, outf_scr, outb_scr,
                         hf_scr, cf_scr, hb_scr, cb_scr,
                         *, batch, n_seq, hid):
    x = x_ref[...]                                          # (B*N, H)
    # hoisted input projections for ALL timesteps & batches (one matmul each)
    gxf_scr[...] = jnp.dot(x, wih_f_ref[...], preferred_element_type=jnp.float32) + b_f_ref[...]
    gxb_scr[...] = jnp.dot(x, wih_b_ref[...], preferred_element_type=jnp.float32) + b_b_ref[...]

    hf_scr[...] = jnp.zeros_like(hf_scr)
    cf_scr[...] = jnp.zeros_like(cf_scr)
    hb_scr[...] = jnp.zeros_like(hb_scr)
    cb_scr[...] = jnp.zeros_like(cb_scr)

    lens = lens_ref[...]                                    # (B, 1) int32
    whh_f = whh_f_ref[...]
    whh_b = whh_b_ref[...]

    def cell(g, c):
        s = jax.nn.sigmoid(g)                               # one 128-wide EUP push
        i = s[:, 0:hid]
        f = s[:, hid:2 * hid]
        o = s[:, 3 * hid:4 * hid]
        gg = jnp.tanh(g[:, 2 * hid:3 * hid])
        c_new = f * c + i * gg
        return o * jnp.tanh(c_new), c_new

    # interleave forward (time t) and backward (time n_seq-1-t) directions;
    # fully unrolled (n_seq is small and static).
    for t in range(n_seq):
        tb = n_seq - 1 - t
        gxf_t = jnp.concatenate(
            [gxf_scr[pl.ds(b * n_seq + t, 1), :] for b in range(batch)], axis=0)
        gxb_t = jnp.concatenate(
            [gxb_scr[pl.ds(b * n_seq + tb, 1), :] for b in range(batch)], axis=0)

        hf, cf = hf_scr[...], cf_scr[...]
        hb, cb = hb_scr[...], cb_scr[...]

        gf = gxf_t + jnp.dot(hf, whh_f, preferred_element_type=jnp.float32)
        gb = gxb_t + jnp.dot(hb, whh_b, preferred_element_type=jnp.float32)
        hf_new, cf_new = cell(gf, cf)
        hb_new, cb_new = cell(gb, cb)

        # pack_padded semantics: freeze state & zero outputs past seq length
        valid_f = lens > t                                  # (B, 1)
        valid_b = lens > tb
        hf_scr[...] = jnp.where(valid_f, hf_new, hf)
        cf_scr[...] = jnp.where(valid_f, cf_new, cf)
        hb_scr[...] = jnp.where(valid_b, hb_new, hb)
        cb_scr[...] = jnp.where(valid_b, cb_new, cb)

        hf_out = jnp.where(valid_f, hf_new, jnp.zeros_like(hf_new))
        hb_out = jnp.where(valid_b, hb_new, jnp.zeros_like(hb_new))
        for b in range(batch):
            outf_scr[pl.ds(b * n_seq + t, 1), :] = hf_out[b:b + 1, :]
            outb_scr[pl.ds(b * n_seq + tb, 1), :] = hb_out[b:b + 1, :]

    hn_ref[0] = hf_scr[...]
    hn_ref[1] = hb_scr[...]
    cn_ref[0] = cf_scr[...]
    cn_ref[1] = cb_scr[...]

    # fused epilogue: concat directions + W_h feature, one 128-lane-dense store
    outs = jnp.concatenate([outf_scr[...], outb_scr[...]], axis=-1)   # (B*N, 2H)
    feat = jnp.dot(outs, w_h_ref[...], preferred_element_type=jnp.float32)
    ast_slab_ref[...] = jnp.concatenate([outs, feat], axis=-1)        # (B*N, 4H)


def bilstm_forward(x_flat, seq_lens, lstm_p, w_h):
    kernel = functools.partial(_bilstm_fused_kernel, batch=B, n_seq=N, hid=HID)
    lens = seq_lens.reshape(B, 1).astype(jnp.int32)
    ins = (lens, x_flat,
           lstm_p["wih_f"], lstm_p["whh_f"], lstm_p["b_f"],
           lstm_p["wih_b"], lstm_p["whh_b"], lstm_p["b_b"], w_h)
    out_shapes = (jax.ShapeDtypeStruct((B * N, 4 * HID), jnp.float32),  # [out|W_h]
                  jax.ShapeDtypeStruct((2, B, HID), jnp.float32),       # h_n
                  jax.ShapeDtypeStruct((2, B, HID), jnp.float32))       # c_n
    ast_slab, hn, cn = pl.pallas_call(
        kernel,
        out_shape=out_shapes,
        grid=(1,),
        in_specs=[_full_spec(a.shape) for a in ins],
        out_specs=[_full_spec(s.shape) for s in out_shapes],
        scratch_shapes=[pltpu.VMEM((B * N, 4 * HID), jnp.float32),
                        pltpu.VMEM((B * N, 4 * HID), jnp.float32),
                        pltpu.VMEM((B * N, HID), jnp.float32),
                        pltpu.VMEM((B * N, HID), jnp.float32),
                        pltpu.VMEM((B, HID), jnp.float32),
                        pltpu.VMEM((B, HID), jnp.float32),
                        pltpu.VMEM((B, HID), jnp.float32),
                        pltpu.VMEM((B, HID), jnp.float32)],
        compiler_params=pltpu.CompilerParams(dimension_semantics=("arbitrary",)),
    )(*ins)
    ast_encoder_outputs = ast_slab[:, :2 * HID].reshape(B, N, 2 * HID)
    ast_encoder_feature = ast_slab[:, 2 * HID:]
    return ast_encoder_outputs, ast_encoder_feature, (hn, cn)


# ------------------------------ encoder forward ------------------------------
def encoder_forward(params, input_ids, seq_lens, enc_graph_batch,
                    enc_graph_mask_batch, enc_node_type_mask_batch):
    embedded = jnp.take(params["embedding"], input_ids, axis=0)          # (B, N, EMB)
    # precompute masked adjacency once (edge-major, matches permute(1,0,2,3))
    adj_masked = jnp.transpose(
        (enc_graph_batch * enc_graph_mask_batch).astype(jnp.float32), (1, 0, 2, 3))
    # only column 0 of the node-type mask is used: per-node scalar mask
    node_mask = enc_node_type_mask_batch[:, 0, :, 0].astype(jnp.float32).reshape(B * N, 1)

    # fused graph + AST GGNN (one pallas_call), with graph projection / W_h /
    # max-reduce epilogue fused in.
    graph_slab, graph_dec_in_state, ast_out = ggnn_fused_forward(
        embedded, adj_masked, node_mask, params)
    graph_enc_outputs = graph_slab[:, :2 * HID].reshape(B, N, 2 * HID)
    graph_encoder_feature = graph_slab[:, 2 * HID:]                      # (B*N, 2H)

    # fused bidirectional LSTM (pack_padded semantics) with W_h epilogue.
    ast_encoder_outputs, ast_encoder_feature, ast_dec_in_state = bilstm_forward(
        ast_out, seq_lens, params["lstm"], params["w_h"])

    return (graph_enc_outputs, ast_encoder_outputs, graph_encoder_feature,
            ast_encoder_feature, graph_dec_in_state, ast_dec_in_state)


# ------------------------------ param init -----------------------------------
def _xavier(k, shape):
    fan_in, fan_out = shape[-2], shape[-1]
    std = (2.0 / (fan_in + fan_out)) ** 0.5
    return std * jax.random.normal(k, shape, jnp.float32)


def _ggnn_params(key):
    kk = jax.random.split(key, 11)
    return dict(
        we=_xavier(kk[0], (E, HID, HID)),
        be=0.01 * jax.random.normal(kk[1], (E, 1, HID), jnp.float32),
        wr=_xavier(kk[2], (HID, HID)), ur=_xavier(kk[3], (HID, HID)),
        br=0.01 * jax.random.normal(kk[4], (1, HID), jnp.float32),
        wz=_xavier(kk[5], (HID, HID)), uz=_xavier(kk[6], (HID, HID)),
        bz=0.01 * jax.random.normal(kk[7], (1, HID), jnp.float32),
        wc=_xavier(kk[8], (HID, HID)), uc=_xavier(kk[9], (HID, HID)),
        bc=0.01 * jax.random.normal(kk[10], (1, HID), jnp.float32),
    )


def _pack_ggnn(g):
    # concat edge weights along output dim / GRU gate weights along output dim
    w_all = jnp.concatenate([g["we"][e] for e in range(E)], axis=1)     # (H, E*H)
    b_all = jnp.concatenate([g["be"][e] for e in range(E)], axis=1)     # (1, E*H)
    w_rzc = jnp.concatenate([g["wr"], g["wz"], g["wc"]], axis=1)        # (H, 3H)
    u_rz = jnp.concatenate([g["ur"], g["uz"]], axis=1)                  # (H, 2H)
    b_rzc = jnp.concatenate([g["br"], g["bz"], g["bc"]], axis=1)        # (1, 3H)
    return w_all, b_all, w_rzc, u_rz, g["uc"], b_rzc


def init_params(key):
    ks = jax.random.split(key, 12)
    lstm = dict(
        # NOTE: a real PyTorch checkpoint would need re-packing to (HID, 4*HID)
        # column order with b_ih + b_hh folded.
        wih_f=_xavier(ks[4], (HID, 4 * HID)),
        whh_f=_xavier(ks[5], (HID, 4 * HID)),
        b_f=0.01 * jax.random.normal(ks[6], (1, 4 * HID), jnp.float32),
        wih_b=_xavier(ks[7], (HID, 4 * HID)),
        whh_b=_xavier(ks[8], (HID, 4 * HID)),
        b_b=0.01 * jax.random.normal(ks[9], (1, 4 * HID), jnp.float32),
    )
    pg = _pack_ggnn(_ggnn_params(ks[10]))   # graph branch
    pa = _pack_ggnn(_ggnn_params(ks[11]))   # AST branch
    ggnn = dict(
        w_all=jnp.stack([pg[0], pa[0]]),    # (2, H, E*H)
        b_all=jnp.stack([pg[1], pa[1]]),    # (2, 1, E*H)
        w_rzc=jnp.stack([pg[2], pa[2]]),    # (2, H, 3H)
        u_rz=jnp.stack([pg[3], pa[3]]),     # (2, H, 2H)
        uc=jnp.stack([pg[4], pa[4]]),       # (2, H, H)
        b_rzc=jnp.stack([pg[5], pa[5]]),    # (2, 1, 3H)
    )
    return dict(
        embedding=_xavier(ks[0], (VOCAB, EMB)),
        w_h=_xavier(ks[1], (2 * HID, 2 * HID)),             # W_h (bias=False)
        graph_proj_w=_xavier(ks[2], (HID, 2 * HID)),        # graph_enc_outputs_W_h
        ggnn=ggnn,
        lstm=lstm,
    )


# ----------------------------------- main ------------------------------------
if __name__ == "__main__":
    key = jax.random.PRNGKey(0)
    k_ids, k_adj, k_mask, k_params = jax.random.split(key, 4)
    params = init_params(k_params)

    input_ids = jax.random.randint(k_ids, (B, N), 0, VOCAB)
    seq_lens = jnp.array([N, N - 2], dtype=jnp.int32)
    enc_graph_batch = jax.random.bernoulli(k_adj, 0.4, (B, E, N, N)).astype(jnp.int32)
    enc_graph_mask_batch = jax.random.bernoulli(k_mask, 0.8, (B, E, N, N)).astype(jnp.int32)
    enc_node_type_mask_batch = jnp.ones((B, 1, N, N), jnp.int32)

    outs = jax.jit(encoder_forward)(params, input_ids, seq_lens, enc_graph_batch,
                                    enc_graph_mask_batch, enc_node_type_mask_batch)
    outs = jax.tree_util.tree_map(jax.block_until_ready, outs)

    (graph_enc_outputs, ast_encoder_outputs, graph_encoder_feature,
     ast_encoder_feature, graph_dec_in_state, (h_n, c_n)) = outs
    assert graph_enc_outputs.shape == (B, N, 2 * HID)
    assert ast_encoder_outputs.shape == (B, N, 2 * HID)
    assert graph_encoder_feature.shape == (B * N, 2 * HID)
    assert ast_encoder_feature.shape == (B * N, 2 * HID)
    assert graph_dec_in_state.shape == (B, HID)
    assert h_n.shape == (2, B, HID) and c_n.shape == (2, B, HID)
    print("KERNEL_OK")
</pallas_src>

<mosaic_0001>
module attributes {stable_mosaic.version = 11 : i64} {
  func.func @_ggnn_fused_kernel(%arg0: i32, %arg1: memref<2x8x32xf32, #tpu.memory_space<vmem>>, %arg2: memref<2x2x8x8xf32, #tpu.memory_space<vmem>>, %arg3: memref<16x1xf32, #tpu.memory_space<vmem>>, %arg4: memref<2x32x64xf32, #tpu.memory_space<vmem>>, %arg5: memref<2x1x64xf32, #tpu.memory_space<vmem>>, %arg6: memref<2x32x96xf32, #tpu.memory_space<vmem>>, %arg7: memref<2x32x64xf32, #tpu.memory_space<vmem>>, %arg8: memref<2x32x32xf32, #tpu.memory_space<vmem>>, %arg9: memref<2x1x96xf32, #tpu.memory_space<vmem>>, %arg10: memref<32x64xf32, #tpu.memory_space<vmem>>, %arg11: memref<64x64xf32, #tpu.memory_space<vmem>>, %arg12: memref<16x128xf32, #tpu.memory_space<vmem>>, %arg13: memref<2x32xf32, #tpu.memory_space<vmem>>, %arg14: memref<16x32xf32, #tpu.memory_space<vmem>>) attributes {dimension_semantics = [#tpu.dimension_semantics<arbitrary>], iteration_bounds = array<i64: 1>, scalar_prefetch = 0 : i64, scratch_operands = 0 : i64, tpu.core_type = #tpu.core_type<tc>, window_params = [{pipeline_mode = #tpu.pipeline_mode<synchronous>, transform_indices = @transform_0, window_bounds = array<i64: 2, 8, 32>}, {pipeline_mode = #tpu.pipeline_mode<synchronous>, transform_indices = @transform_1, window_bounds = array<i64: 2, 2, 8, 8>}, {pipeline_mode = #tpu.pipeline_mode<synchronous>, transform_indices = @transform_2, window_bounds = array<i64: 16, 1>}, {pipeline_mode = #tpu.pipeline_mode<synchronous>, transform_indices = @transform_3, window_bounds = array<i64: 2, 32, 64>}, {pipeline_mode = #tpu.pipeline_mode<synchronous>, transform_indices = @transform_4, window_bounds = array<i64: 2, 1, 64>}, {pipeline_mode = #tpu.pipeline_mode<synchronous>, transform_indices = @transform_5, window_bounds = array<i64: 2, 32, 96>}, {pipeline_mode = #tpu.pipeline_mode<synchronous>, transform_indices = @transform_6, window_bounds = array<i64: 2, 32, 64>}, {pipeline_mode = #tpu.pipeline_mode<synchronous>, transform_indices = @transform_7, window_bounds = array<i64: 2, 32, 32>}, {pipeline_mode = #tpu.pipeline_mode<synchronous>, transform_indices = @transform_8, window_bounds = array<i64: 2, 1, 96>}, {pipeline_mode = #tpu.pipeline_mode<synchronous>, transform_indices = @transform_9, window_bounds = array<i64: 32, 64>}, {pipeline_mode = #tpu.pipeline_mode<synchronous>, transform_indices = @transform_10, window_bounds = array<i64: 64, 64>}, {pipeline_mode = #tpu.pipeline_mode<synchronous>, transform_indices = @transform_11, window_bounds = array<i64: 16, 128>}, {pipeline_mode = #tpu.pipeline_mode<synchronous>, transform_indices = @transform_12, window_bounds = array<i64: 2, 32>}, {pipeline_mode = #tpu.pipeline_mode<synchronous>, transform_indices = @transform_13, window_bounds = array<i64: 16, 32>}]} {
    %c0 = arith.constant 0 : index
    %c0_0 = arith.constant 0 : index
    %c0_1 = arith.constant 0 : index
    %0 = vector.load %arg1[%c0, %c0_0, %c0_1] : memref<2x8x32xf32, #tpu.memory_space<vmem>>, vector<2x8x32xf32>
    %1 = vector.shape_cast %0 : vector<2x8x32xf32> to vector<16x32xf32>
    %c0_2 = arith.constant 0 : index
    %c0_3 = arith.constant 0 : index
    %2 = vector.load %arg3[%c0_2, %c0_3] : memref<16x1xf32, #tpu.memory_space<vmem>>, vector<16x1xf32>
    %c0_4 = arith.constant 0 : index
    %c0_5 = arith.constant 0 : index
    %c0_6 = arith.constant 0 : index
    %c0_7 = arith.constant 0 : index
    %3 = vector.load %arg2[%c0_4, %c0_5, %c0_6, %c0_7] : memref<2x2x8x8xf32, #tpu.memory_space<vmem>>, vector<1x2x8x8xf32>
    %4 = vector.shape_cast %3 : vector<1x2x8x8xf32> to vector<2x8x8xf32>
    %c1 = arith.constant 1 : index
    %c0_8 = arith.constant 0 : index
    %c0_9 = arith.constant 0 : index
    %c0_10 = arith.constant 0 : index
    %5 = vector.load %arg2[%c1, %c0_8, %c0_9, %c0_10] : memref<2x2x8x8xf32, #tpu.memory_space<vmem>>, vector<1x2x8x8xf32>
    %6 = vector.shape_cast %5 : vector<1x2x8x8xf32> to vector<2x8x8xf32>
    %c0_11 = arith.constant 0 : index
    %c0_12 = arith.constant 0 : index
    %c0_13 = arith.constant 0 : index
    %7 = vector.load %arg4[%c0_11, %c0_12, %c0_13] : memref<2x32x64xf32, #tpu.memory_space<vmem>>, vector<1x32x64xf32>
    %8 = vector.shape_cast %7 : vector<1x32x64xf32> to vector<32x64xf32>
    %c0_14 = arith.constant 0 : index
    %c0_15 = arith.constant 0 : index
    %c0_16 = arith.constant 0 : index
    %9 = vector.load %arg5[%c0_14, %c0_15, %c0_16] : memref<2x1x64xf32, #tpu.memory_space<vmem>>, vector<1x1x64xf32>
    %10 = vector.shape_cast %9 : vector<1x1x64xf32> to vector<1x64xf32>
    %c0_17 = arith.constant 0 : index
    %c0_18 = arith.constant 0 : index
    %c0_19 = arith.constant 0 : index
    %11 = vector.load %arg6[%c0_17, %c0_18, %c0_19] : memref<2x32x96xf32, #tpu.memory_space<vmem>>, vector<1x32x96xf32>
    %12 = vector.shape_cast %11 : vector<1x32x96xf32> to vector<32x96xf32>
    %c0_20 = arith.constant 0 : index
    %c0_21 = arith.constant 0 : index
    %c0_22 = arith.constant 0 : index
    %13 = vector.load %arg7[%c0_20, %c0_21, %c0_22] : memref<2x32x64xf32, #tpu.memory_space<vmem>>, vector<1x32x64xf32>
    %14 = vector.shape_cast %13 : vector<1x32x64xf32> to vector<32x64xf32>
    %c0_23 = arith.constant 0 : index
    %c0_24 = arith.constant 0 : index
    %c0_25 = arith.constant 0 : index
    %15 = vector.load %arg8[%c0_23, %c0_24, %c0_25] : memref<2x32x32xf32, #tpu.memory_space<vmem>>, vector<1x32x32xf32>
    %16 = vector.shape_cast %15 : vector<1x32x32xf32> to vector<32x32xf32>
    %c0_26 = arith.constant 0 : index
    %c0_27 = arith.constant 0 : index
    %c0_28 = arith.constant 0 : index
    %17 = vector.load %arg9[%c0_26, %c0_27, %c0_28] : memref<2x1x96xf32, #tpu.memory_space<vmem>>, vector<1x1x96xf32>
    %18 = vector.shape_cast %17 : vector<1x1x96xf32> to vector<1x96xf32>
    %cst = arith.constant dense<0.000000e+00> : vector<16x64xf32>
    %19 = tpu.matmul %1, %8, %cst {dimension_numbers = #tpu.dot_dimension_numbers<[1], [0], [0], [1], [0, 0, 1, 1], [], []>} : vector<16x32xf32>, vector<32x64xf32>, vector<16x64xf32> -> vector<16x64xf32>
    %20 = vector.broadcast %10 : vector<1x64xf32> to vector<16x64xf32>
    %21 = arith.addf %19, %20 : vector<16x64xf32>
    %22 = vector.shape_cast %21 : vector<16x64xf32> to vector<2x8x64xf32>
    %23 = vector.extract_strided_slice %22 {offsets = [0, 0, 0], sizes = [2, 8, 32], strides = [1, 1, 1]} : vector<2x8x64xf32> to vector<2x8x32xf32>
    "tpu.trace_start"() <{level = 10 : i32, message = "bij,bjh->bih"}> : () -> ()
    %cst_29 = arith.constant dense<0.000000e+00> : vector<2x8x32xf32>
    %24 = tpu.matmul %4, %23, %cst_29 {dimension_numbers = #tpu.dot_dimension_numbers<[2], [1], [1], [2], [0, 0, 0, 1, 1, 2], [0], [0]>} : vector<2x8x8xf32>, vector<2x8x32xf32>, vector<2x8x32xf32> -> vector<2x8x32xf32>
    "tpu.trace_stop"() : () -> ()
    %25 = vector.extract_strided_slice %22 {offsets = [0, 0, 32], sizes = [2, 8, 32], strides = [1, 1, 1]} : vector<2x8x64xf32> to vector<2x8x32xf32>
    "tpu.trace_start"() <{level = 10 : i32, message = "bij,bjh->bih"}> : () -> ()
    %cst_30 = arith.constant dense<0.000000e+00> : vector<2x8x32xf32>
    %26 = tpu.matmul %6, %25, %cst_30 {dimension_numbers = #tpu.dot_dimension_numbers<[2], [1], [1], [2], [0, 0, 0, 1, 1, 2], [0], [0]>} : vector<2x8x8xf32>, vector<2x8x32xf32>, vector<2x8x32xf32> -> vector<2x8x32xf32>
    "tpu.trace_stop"() : () -> ()
    %27 = arith.addf %24, %26 : vector<2x8x32xf32>
    %28 = vector.shape_cast %27 : vector<2x8x32xf32> to vector<16x32xf32>
    %cst_31 = arith.constant dense<0.000000e+00> : vector<16x96xf32>
    %29 = tpu.matmul %28, %12, %cst_31 {dimension_numbers = #tpu.dot_dimension_numbers<[1], [0], [0], [1], [0, 0, 1, 1], [], []>} : vector<16x32xf32>, vector<32x96xf32>, vector<16x96xf32> -> vector<16x96xf32>
    %30 = vector.broadcast %18 : vector<1x96xf32> to vector<16x96xf32>
    %31 = arith.addf %29, %30 : vector<16x96xf32>
    %cst_32 = arith.constant dense<0.000000e+00> : vector<16x64xf32>
    %32 = tpu.matmul %1, %14, %cst_32 {dimension_numbers = #tpu.dot_dimension_numbers<[1], [0], [0], [1], [0, 0, 1, 1], [], []>} : vector<16x32xf32>, vector<32x64xf32>, vector<16x64xf32> -> vector<16x64xf32>
    %33 = vector.extract_strided_slice %31 {offsets = [0, 0], sizes = [16, 64], strides = [1, 1]} : vector<16x96xf32> to vector<16x64xf32>
    %34 = arith.addf %33, %32 : vector<16x64xf32>
    %35 = arith.negf %34 : vector<16x64xf32>
    %36 = math.exp %35 : vector<16x64xf32>
    %cst_33 = arith.constant 1.000000e+00 : f32
    %37 = vector.broadcast %cst_33 : f32 to vector<16x64xf32>
    %38 = arith.addf %37, %36 : vector<16x64xf32>
    %39 = arith.divf %37, %38 : vector<16x64xf32>
    %40 = vector.extract_strided_slice %39 {offsets = [0, 0], sizes = [16, 32], strides = [1, 1]} : vector<16x64xf32> to vector<16x32xf32>
    %41 = vector.extract_strided_slice %39 {offsets = [0, 32], sizes = [16, 32], strides = [1, 1]} : vector<16x64xf32> to vector<16x32xf32>
    %42 = vector.extract_strided_slice %31 {offsets = [0, 64], sizes = [16, 32], strides = [1, 1]} : vector<16x96xf32> to vector<16x32xf32>
    %43 = arith.mulf %40, %1 : vector<16x32xf32>
    %cst_34 = arith.constant dense<0.000000e+00> : vector<16x32xf32>
    %44 = tpu.matmul %43, %16, %cst_34 {dimension_numbers = #tpu.dot_dimension_numbers<[1], [0], [0], [1], [0, 0, 1, 1], [], []>} : vector<16x32xf32>, vector<32x32xf32>, vector<16x32xf32> -> vector<16x32xf32>
    %45 = arith.addf %42, %44 : vector<16x32xf32>
    %46 = math.tanh %45 : vector<16x32xf32>
    %cst_35 = arith.constant 1.000000e+00 : f32
    %47 = vector.broadcast %cst_35 : f32 to vector<16x32xf32>
    %48 = arith.subf %47, %41 : vector<16x32xf32>
    %49 = arith.mulf %48, %1 : vector<16x32xf32>
    %50 = arith.mulf %41, %46 : vector<16x32xf32>
    %51 = arith.addf %49, %50 : vector<16x32xf32>
    %cst_36 = arith.constant dense<0.000000e+00> : vector<16x64xf32>
    %52 = tpu.matmul %51, %8, %cst_36 {dimension_numbers = #tpu.dot_dimension_numbers<[1], [0], [0], [1], [0, 0, 1, 1], [], []>} : vector<16x32xf32>, vector<32x64xf32>, vector<16x64xf32> -> vector<16x64xf32>
    %53 = vector.broadcast %10 : vector<1x64xf32> to vector<16x64xf32>
    %54 = arith.addf %52, %53 : vector<16x64xf32>
    %55 = vector.shape_cast %54 : vector<16x64xf32> to vector<2x8x64xf32>
    %56 = vector.extract_strided_slice %55 {offsets = [0, 0, 0], sizes = [2, 8, 32], strides = [1, 1, 1]} : vector<2x8x64xf32> to vector<2x8x32xf32>
    "tpu.trace_start"() <{level = 10 : i32, message = "bij,bjh->bih"}> : () -> ()
    %cst_37 = arith.constant dense<0.000000e+00> : vector<2x8x32xf32>
    %57 = tpu.matmul %4, %56, %cst_37 {dimension_numbers = #tpu.dot_dimension_numbers<[2], [1], [1], [2], [0, 0, 0, 1, 1, 2], [0], [0]>} : vector<2x8x8xf32>, vector<2x8x32xf32>, vector<2x8x32xf32> -> vector<2x8x32xf32>
    "tpu.trace_stop"() : () -> ()
    %58 = vector.extract_strided_slice %55 {offsets = [0, 0, 32], sizes = [2, 8, 32], strides = [1, 1, 1]} : vector<2x8x64xf32> to vector<2x8x32xf32>
    "tpu.trace_start"() <{level = 10 : i32, message = "bij,bjh->bih"}> : () -> ()
    %cst_38 = arith.constant dense<0.000000e+00> : vector<2x8x32xf32>
    %59 = tpu.matmul %6, %58, %cst_38 {dimension_numbers = #tpu.dot_dimension_numbers<[2], [1], [1], [2], [0, 0, 0, 1, 1, 2], [0], [0]>} : vector<2x8x8xf32>, vector<2x8x32xf32>, vector<2x8x32xf32> -> vector<2x8x32xf32>
    "tpu.trace_stop"() : () -> ()
    %60 = arith.addf %57, %59 : vector<2x8x32xf32>
    %61 = vector.shape_cast %60 : vector<2x8x32xf32> to vector<16x32xf32>
    %cst_39 = arith.constant dense<0.000000e+00> : vector<16x96xf32>
    %62 = tpu.matmul %61, %12, %cst_39 {dimension_numbers = #tpu.dot_dimension_numbers<[1], [0], [0], [1], [0, 0, 1, 1], [], []>} : vector<16x32xf32>, vector<32x96xf32>, vector<16x96xf32> -> vector<16x96xf32>
    %63 = vector.broadcast %18 : vector<1x96xf32> to vector<16x96xf32>
    %64 = arith.addf %62, %63 : vector<16x96xf32>
    %cst_40 = arith.constant dense<0.000000e+00> : vector<16x64xf32>
    %65 = tpu.matmul %51, %14, %cst_40 {dimension_numbers = #tpu.dot_dimension_numbers<[1], [0], [0], [1], [0, 0, 1, 1], [], []>} : vector<16x32xf32>, vector<32x64xf32>, vector<16x64xf32> -> vector<16x64xf32>
    %66 = vector.extract_strided_slice %64 {offsets = [0, 0], sizes = [16, 64], strides = [1, 1]} : vector<16x96xf32> to vector<16x64xf32>
    %67 = arith.addf %66, %65 : vector<16x64xf32>
    %68 = arith.negf %67 : vector<16x64xf32>
    %69 = math.exp %68 : vector<16x64xf32>
    %cst_41 = arith.constant 1.000000e+00 : f32
    %70 = vector.broadcast %cst_41 : f32 to vector<16x64xf32>
    %71 = arith.addf %70, %69 : vector<16x64xf32>
    %72 = arith.divf %70, %71 : vector<16x64xf32>
    %73 = vector.extract_strided_slice %72 {offsets = [0, 0], sizes = [16, 32], strides = [1, 1]} : vector<16x64xf32> to vector<16x32xf32>
    %74 = vector.extract_strided_slice %72 {offsets = [0, 32], sizes = [16, 32], strides = [1, 1]} : vector<16x64xf32> to vector<16x32xf32>
    %75 = vector.extract_strided_slice %64 {offsets = [0, 64], sizes = [16, 32], strides = [1, 1]} : vector<16x96xf32> to vector<16x32xf32>
    %76 = arith.mulf %73, %51 : vector<16x32xf32>
    %cst_42 = arith.constant dense<0.000000e+00> : vector<16x32xf32>
    %77 = tpu.matmul %76, %16, %cst_42 {dimension_numbers = #tpu.dot_dimension_numbers<[1], [0], [0], [1], [0, 0, 1, 1], [], []>} : vector<16x32xf32>, vector<32x32xf32>, vector<16x32xf32> -> vector<16x32xf32>
    %78 = arith.addf %75, %77 : vector<16x32xf32>
    %79 = math.tanh %78 : vector<16x32xf32>
    %cst_43 = arith.constant 1.000000e+00 : f32
    %80 = vector.broadcast %cst_43 : f32 to vector<16x32xf32>
    %81 = arith.subf %80, %74 : vector<16x32xf32>
    %82 = arith.mulf %81, %51 : vector<16x32xf32>
    %83 = arith.mulf %74, %79 : vector<16x32xf32>
    %84 = arith.addf %82, %83 : vector<16x32xf32>
    %85 = vector.broadcast %2 : vector<16x1xf32> to vector<16x32xf32>
    %86 = arith.mulf %84, %85 : vector<16x32xf32>
    %c0_44 = arith.constant 0 : index
    %c0_45 = arith.constant 0 : index
    %87 = vector.load %arg10[%c0_44, %c0_45] : memref<32x64xf32, #tpu.memory_space<vmem>>, vector<32x64xf32>
    %cst_46 = arith.constant dense<0.000000e+00> : vector<16x64xf32>
    %88 = tpu.matmul %86, %87, %cst_46 {dimension_numbers = #tpu.dot_dimension_numbers<[1], [0], [0], [1], [0, 0, 1, 1], [], []>} : vector<16x32xf32>, vector<32x64xf32>, vector<16x64xf32> -> vector<16x64xf32>
    %c0_47 = arith.constant 0 : index
    %c0_48 = arith.constant 0 : index
    %89 = vector.load %arg11[%c0_47, %c0_48] : memref<64x64xf32, #tpu.memory_space<vmem>>, vector<64x64xf32>
    %cst_49 = arith.constant dense<0.000000e+00> : vector<16x64xf32>
    %90 = tpu.matmul %88, %89, %cst_49 {dimension_numbers = #tpu.dot_dimension_numbers<[1], [0], [0], [1], [0, 0, 1, 1], [], []>} : vector<16x64xf32>, vector<64x64xf32>, vector<16x64xf32> -> vector<16x64xf32>
    %91 = tpu.concatenate %88, %90 in 1 : vector<16x64xf32>, vector<16x64xf32> -> vector<16x128xf32>
    %c0_50 = arith.constant 0 : index
    %c0_51 = arith.constant 0 : index
    %92 = vector.load %arg12[%c0_50, %c0_51] : memref<16x128xf32, #tpu.memory_space<vmem>>, vector<16x128xf32>
    tpu.vector_store %arg12[%c0_50, %c0_51], %91 {strides = array<i32>} : memref<16x128xf32, #tpu.memory_space<vmem>>, vector<16x128xf32>,
    %93 = vector.shape_cast %86 : vector<16x32xf32> to vector<2x8x32xf32>
    %cst_52 = arith.constant dense<0xFF800000> : vector<2x32xf32>
    %94 = vector.multi_reduction <maximumf>, %93, %cst_52 [1] : vector<2x8x32xf32> to vector<2x32xf32>
    %c0_53 = arith.constant 0 : index
    %c0_54 = arith.constant 0 : index
    %95 = vector.load %arg13[%c0_53, %c0_54] : memref<2x32xf32, #tpu.memory_space<vmem>>, vector<2x32xf32>
    tpu.vector_store %arg13[%c0_53, %c0_54], %94 {strides = array<i32>} : memref<2x32xf32, #tpu.memory_space<vmem>>, vector<2x32xf32>,
    %c1_55 = arith.constant 1 : index
    %c0_56 = arith.constant 0 : index
    %c0_57 = arith.constant 0 : index
    %96 = vector.load %arg4[%c1_55, %c0_56, %c0_57] : memref<2x32x64xf32, #tpu.memory_space<vmem>>, vector<1x32x64xf32>
    %97 = vector.shape_cast %96 : vector<1x32x64xf32> to vector<32x64xf32>
    %c1_58 = arith.constant 1 : index
    %c0_59 = arith.constant 0 : index
    %c0_60 = arith.constant 0 : index
    %98 = vector.load %arg5[%c1_58, %c0_59, %c0_60] : memref<2x1x64xf32, #tpu.memory_space<vmem>>, vector<1x1x64xf32>
    %99 = vector.shape_cast %98 : vector<1x1x64xf32> to vector<1x64xf32>
    %c1_61 = arith.constant 1 : index
    %c0_62 = arith.constant 0 : index
    %c0_63 = arith.constant 0 : index
    %100 = vector.load %arg6[%c1_61, %c0_62, %c0_63] : memref<2x32x96xf32, #tpu.memory_space<vmem>>, vector<1x32x96xf32>
    %101 = vector.shape_cast %100 : vector<1x32x96xf32> to vector<32x96xf32>
    %c1_64 = arith.constant 1 : index
    %c0_65 = arith.constant 0 : index
    %c0_66 = arith.constant 0 : index
    %102 = vector.load %arg7[%c1_64, %c0_65, %c0_66] : memref<2x32x64xf32, #tpu.memory_space<vmem>>, vector<1x32x64xf32>
    %103 = vector.shape_cast %102 : vector<1x32x64xf32> to vector<32x64xf32>
    %c1_67 = arith.constant 1 : index
    %c0_68 = arith.constant 0 : index
    %c0_69 = arith.constant 0 : index
    %104 = vector.load %arg8[%c1_67, %c0_68, %c0_69] : memref<2x32x32xf32, #tpu.memory_space<vmem>>, vector<1x32x32xf32>
    %105 = vector.shape_cast %104 : vector<1x32x32xf32> to vector<32x32xf32>
    %c1_70 = arith.constant 1 : index
    %c0_71 = arith.constant 0 : index
    %c0_72 = arith.constant 0 : index
    %106 = vector.load %arg9[%c1_70, %c0_71, %c0_72] : memref<2x1x96xf32, #tpu.memory_space<vmem>>, vector<1x1x96xf32>
    %107 = vector.shape_cast %106 : vector<1x1x96xf32> to vector<1x96xf32>
    %cst_73 = arith.constant dense<0.000000e+00> : vector<16x64xf32>
    %108 = tpu.matmul %1, %97, %cst_73 {dimension_numbers = #tpu.dot_dimension_numbers<[1], [0], [0], [1], [0, 0, 1, 1], [], []>} : vector<16x32xf32>, vector<32x64xf32>, vector<16x64xf32> -> vector<16x64xf32>
    %109 = vector.broadcast %99 : vector<1x64xf32> to vector<16x64xf32>
    %110 = arith.addf %108, %109 : vector<16x64xf32>
    %111 = vector.shape_cast %110 : vector<16x64xf32> to vector<2x8x64xf32>
    %112 = vector.extract_strided_slice %111 {offsets = [0, 0, 0], sizes = [2, 8, 32], strides = [1, 1, 1]} : vector<2x8x64xf32> to vector<2x8x32xf32>
    "tpu.trace_start"() <{level = 10 : i32, message = "bij,bjh->bih"}> : () -> ()
    %cst_74 = arith.constant dense<0.000000e+00> : vector<2x8x32xf32>
    %113 = tpu.matmul %4, %112, %cst_74 {dimension_numbers = #tpu.dot_dimension_numbers<[2], [1], [1], [2], [0, 0, 0, 1, 1, 2], [0], [0]>} : vector<2x8x8xf32>, vector<2x8x32xf32>, vector<2x8x32xf32> -> vector<2x8x32xf32>
    "tpu.trace_stop"() : () -> ()
    %114 = vector.extract_strided_slice %111 {offsets = [0, 0, 32], sizes = [2, 8, 32], strides = [1, 1, 1]} : vector<2x8x64xf32> to vector<2x8x32xf32>
    "tpu.trace_start"() <{level = 10 : i32, message = "bij,bjh->bih"}> : () -> ()
    %cst_75 = arith.constant dense<0.000000e+00> : vector<2x8x32xf32>
    %115 = tpu.matmul %6, %114, %cst_75 {dimension_numbers = #tpu.dot_dimension_numbers<[2], [1], [1], [2], [0, 0, 0, 1, 1, 2], [0], [0]>} : vector<2x8x8xf32>, vector<2x8x32xf32>, vector<2x8x32xf32> -> vector<2x8x32xf32>
    "tpu.trace_stop"() : () -> ()
    %116 = arith.addf %113, %115 : vector<2x8x32xf32>
    %117 = vector.shape_cast %116 : vector<2x8x32xf32> to vector<16x32xf32>
    %cst_76 = arith.constant dense<0.000000e+00> : vector<16x96xf32>
    %118 = tpu.matmul %117, %101, %cst_76 {dimension_numbers = #tpu.dot_dimension_numbers<[1], [0], [0], [1], [0, 0, 1, 1], [], []>} : vector<16x32xf32>, vector<32x96xf32>, vector<16x96xf32> -> vector<16x96xf32>
    %119 = vector.broadcast %107 : vector<1x96xf32> to vector<16x96xf32>
    %120 = arith.addf %118, %119 : vector<16x96xf32>
    %cst_77 = arith.constant dense<0.000000e+00> : vector<16x64xf32>
    %121 = tpu.matmul %1, %103, %cst_77 {dimension_numbers = #tpu.dot_dimension_numbers<[1], [0], [0], [1], [0, 0, 1, 1], [], []>} : vector<16x32xf32>, vector<32x64xf32>, vector<16x64xf32> -> vector<16x64xf32>
    %122 = vector.extract_strided_slice %120 {offsets = [0, 0], sizes = [16, 64], strides = [1, 1]} : vector<16x96xf32> to vector<16x64xf32>
    %123 = arith.addf %122, %121 : vector<16x64xf32>
    %124 = arith.negf %123 : vector<16x64xf32>
    %125 = math.exp %124 : vector<16x64xf32>
    %cst_78 = arith.constant 1.000000e+00 : f32
    %126 = vector.broadcast %cst_78 : f32 to vector<16x64xf32>
    %127 = arith.addf %126, %125 : vector<16x64xf32>
    %128 = arith.divf %126, %127 : vector<16x64xf32>
    %129 = vector.extract_strided_slice %128 {offsets = [0, 0], sizes = [16, 32], strides = [1, 1]} : vector<16x64xf32> to vector<16x32xf32>
    %130 = vector.extract_strided_slice %128 {offsets = [0, 32], sizes = [16, 32], strides = [1, 1]} : vector<16x64xf32> to vector<16x32xf32>
    %131 = vector.extract_strided_slice %120 {offsets = [0, 64], sizes = [16, 32], strides = [1, 1]} : vector<16x96xf32> to vector<16x32xf32>
    %132 = arith.mulf %129, %1 : vector<16x32xf32>
    %cst_79 = arith.constant dense<0.000000e+00> : vector<16x32xf32>
    %133 = tpu.matmul %132, %105, %cst_79 {dimension_numbers = #tpu.dot_dimension_numbers<[1], [0], [0], [1], [0, 0, 1, 1], [], []>} : vector<16x32xf32>, vector<32x32xf32>, vector<16x32xf32> -> vector<16x32xf32>
    %134 = arith.addf %131, %133 : vector<16x32xf32>
    %135 = math.tanh %134 : vector<16x32xf32>
    %cst_80 = arith.constant 1.000000e+00 : f32
    %136 = vector.broadcast %cst_80 : f32 to vector<16x32xf32>
    %137 = arith.subf %136, %130 : vector<16x32xf32>
    %138 = arith.mulf %137, %1 : vector<16x32xf32>
    %139 = arith.mulf %130, %135 : vector<16x32xf32>
    %140 = arith.addf %138, %139 : vector<16x32xf32>
    %cst_81 = arith.constant dense<0.000000e+00> : vector<16x64xf32>
    %141 = tpu.matmul %140, %97, %cst_81 {dimension_numbers = #tpu.dot_dimension_numbers<[1], [0], [0], [1], [0, 0, 1, 1], [], []>} : vector<16x32xf32>, vector<32x64xf32>, vector<16x64xf32> -> vector<16x64xf32>
    %142 = vector.broadcast %99 : vector<1x64xf32> to vector<16x64xf32>
    %143 = arith.addf %141, %142 : vector<16x64xf32>
    %144 = vector.shape_cast %143 : vector<16x64xf32> to vector<2x8x64xf32>
    %145 = vector.extract_strided_slice %144 {offsets = [0, 0, 0], sizes = [2, 8, 32], strides = [1, 1, 1]} : vector<2x8x64xf32> to vector<2x8x32xf32>
    "tpu.trace_start"() <{level = 10 : i32, message = "bij,bjh->bih"}> : () -> ()
    %cst_82 = arith.constant dense<0.000000e+00> : vector<2x8x32xf32>
    %146 = tpu.matmul %4, %145, %cst_82 {dimension_numbers = #tpu.dot_dimension_numbers<[2], [1], [1], [2], [0, 0, 0, 1, 1, 2], [0], [0]>} : vector<2x8x8xf32>, vector<2x8x32xf32>, vector<2x8x32xf32> -> vector<2x8x32xf32>
    "tpu.trace_stop"() : () -> ()
    %147 = vector.extract_strided_slice %144 {offsets = [0, 0, 32], sizes = [2, 8, 32], strides = [1, 1, 1]} : vector<2x8x64xf32> to vector<2x8x32xf32>
    "tpu.trace_start"() <{level = 10 : i32, message = "bij,bjh->bih"}> : () -> ()
    %cst_83 = arith.constant dense<0.000000e+00> : vector<2x8x32xf32>
    %148 = tpu.matmul %6, %147, %cst_83 {dimension_numbers = #tpu.dot_dimension_numbers<[2], [1], [1], [2], [0, 0, 0, 1, 1, 2], [0], [0]>} : vector<2x8x8xf32>, vector<2x8x32xf32>, vector<2x8x32xf32> -> vector<2x8x32xf32>
    "tpu.trace_stop"() : () -> ()
    %149 = arith.addf %146, %148 : vector<2x8x32xf32>
    %150 = vector.shape_cast %149 : vector<2x8x32xf32> to vector<16x32xf32>
    %cst_84 = arith.constant dense<0.000000e+00> : vector<16x96xf32>
    %151 = tpu.matmul %150, %101, %cst_84 {dimension_numbers = #tpu.dot_dimension_numbers<[1], [0], [0], [1], [0, 0, 1, 1], [], []>} : vector<16x32xf32>, vector<32x96xf32>, vector<16x96xf32> -> vector<16x96xf32>
    %152 = vector.broadcast %107 : vector<1x96xf32> to vector<16x96xf32>
    %153 = arith.addf %151, %152 : vector<16x96xf32>
    %cst_85 = arith.constant dense<0.000000e+00> : vector<16x64xf32>
    %154 = tpu.matmul %140, %103, %cst_85 {dimension_numbers = #tpu.dot_dimension_numbers<[1], [0], [0], [1], [0, 0, 1, 1], [], []>} : vector<16x32xf32>, vector<32x64xf32>, vector<16x64xf32> -> vector<16x64xf32>
    %155 = vector.extract_strided_slice %153 {offsets = [0, 0], sizes = [16, 64], strides = [1, 1]} : vector<16x96xf32> to vector<16x64xf32>
    %156 = arith.addf %155, %154 : vector<16x64xf32>
    %157 = arith.negf %156 : vector<16x64xf32>
    %158 = math.exp %157 : vector<16x64xf32>
    %cst_86 = arith.constant 1.000000e+00 : f32
    %159 = vector.broadcast %cst_86 : f32 to vector<16x64xf32>
    %160 = arith.addf %159, %158 : vector<16x64xf32>
    %161 = arith.divf %159, %160 : vector<16x64xf32>
    %162 = vector.extract_strided_slice %161 {offsets = [0, 0], sizes = [16, 32], strides = [1, 1]} : vector<16x64xf32> to vector<16x32xf32>
    %163 = vector.extract_strided_slice %161 {offsets = [0, 32], sizes = [16, 32], strides = [1, 1]} : vector<16x64xf32> to vector<16x32xf32>
    %164 = vector.extract_strided_slice %153 {offsets = [0, 64], sizes = [16, 32], strides = [1, 1]} : vector<16x96xf32> to vector<16x32xf32>
    %165 = arith.mulf %162, %140 : vector<16x32xf32>
    %cst_87 = arith.constant dense<0.000000e+00> : vector<16x32xf32>
    %166 = tpu.matmul %165, %105, %cst_87 {dimension_numbers = #tpu.dot_dimension_numbers<[1], [0], [0], [1], [0, 0, 1, 1], [], []>} : vector<16x32xf32>, vector<32x32xf32>, vector<16x32xf32> -> vector<16x32xf32>
    %167 = arith.addf %164, %166 : vector<16x32xf32>
    %168 = math.tanh %167 : vector<16x32xf32>
    %cst_88 = arith.constant 1.000000e+00 : f32
    %169 = vector.broadcast %cst_88 : f32 to vector<16x32xf32>
    %170 = arith.subf %169, %163 : vector<16x32xf32>
    %171 = arith.mulf %170, %140 : vector<16x32xf32>
    %172 = arith.mulf %163, %168 : vector<16x32xf32>
    %173 = arith.addf %171, %172 : vector<16x32xf32>
    %174 = vector.broadcast %2 : vector<16x1xf32> to vector<16x32xf32>
    %175 = arith.mulf %173, %174 : vector<16x32xf32>
    %c0_89 = arith.constant 0 : index
    %c0_90 = arith.constant 0 : index
    %176 = vector.load %arg14[%c0_89, %c0_90] : memref<16x32xf32, #tpu.memory_space<vmem>>, vector<16x32xf32>
    tpu.vector_store %arg14[%c0_89, %c0_90], %175 {strides = array<i32>} : memref<16x32xf32, #tpu.memory_space<vmem>>, vector<16x32xf32>,
    return
  }
  func.func @transform_0(%arg0: i32) -> (i32, i32, i32) {
    %c0_i32 = arith.constant 0 : i32
    %c0_i32_0 = arith.constant 0 : i32
    %c0_i32_1 = arith.constant 0 : i32
    %c0_i32_2 = arith.constant 0 : i32
    return %c0_i32, %c0_i32_0, %c0_i32_1 : i32, i32, i32
  }
  func.func @transform_1(%arg0: i32) -> (i32, i32, i32, i32) {
    %c0_i32 = arith.constant 0 : i32
    %c0_i32_0 = arith.constant 0 : i32
    %c0_i32_1 = arith.constant 0 : i32
    %c0_i32_2 = arith.constant 0 : i32
    %c0_i32_3 = arith.constant 0 : i32
    return %c0_i32, %c0_i32_0, %c0_i32_1, %c0_i32_2 : i32, i32, i32, i32
  }
  func.func @transform_2(%arg0: i32) -> (i32, i32) {
    %c0_i32 = arith.constant 0 : i32
    %c0_i32_0 = arith.constant 0 : i32
    %c0_i32_1 = arith.constant 0 : i32
    return %c0_i32, %c0_i32_0 : i32, i32
  }
  func.func @transform_3(%arg0: i32) -> (i32, i32, i32) {
    %c0_i32 = arith.constant 0 : i32
    %c0_i32_0 = arith.constant 0 : i32
    %c0_i32_1 = arith.constant 0 : i32
    %c0_i32_2 = arith.constant 0 : i32
    return %c0_i32, %c0_i32_0, %c0_i32_1 : i32, i32, i32
  }
  func.func @transform_4(%arg0: i32) -> (i32, i32, i32) {
    %c0_i32 = arith.constant 0 : i32
    %c0_i32_0 = arith.constant 0 : i32
    %c0_i32_1 = arith.constant 0 : i32
    %c0_i32_2 = arith.constant 0 : i32
    return %c0_i32, %c0_i32_0, %c0_i32_1 : i32, i32, i32
  }
  func.func @transform_5(%arg0: i32) -> (i32, i32, i32) {
    %c0_i32 = arith.constant 0 : i32
    %c0_i32_0 = arith.constant 0 : i32
    %c0_i32_1 = arith.constant 0 : i32
    %c0_i32_2 = arith.constant 0 : i32
    return %c0_i32, %c0_i32_0, %c0_i32_1 : i32, i32, i32
  }
  func.func @transform_6(%arg0: i32) -> (i32, i32, i32) {
    %c0_i32 = arith.constant 0 : i32
    %c0_i32_0 = arith.constant 0 : i32
    %c0_i32_1 = arith.constant 0 : i32
    %c0_i32_2 = arith.constant 0 : i32
    return %c0_i32, %c0_i32_0, %c0_i32_1 : i32, i32, i32
  }
  func.func @transform_7(%arg0: i32) -> (i32, i32, i32) {
    %c0_i32 = arith.constant 0 : i32
    %c0_i32_0 = arith.constant 0 : i32
    %c0_i32_1 = arith.constant 0 : i32
    %c0_i32_2 = arith.constant 0 : i32
    return %c0_i32, %c0_i32_0, %c0_i32_1 : i32, i32, i32
  }
  func.func @transform_8(%arg0: i32) -> (i32, i32, i32) {
    %c0_i32 = arith.constant 0 : i32
    %c0_i32_0 = arith.constant 0 : i32
    %c0_i32_1 = arith.constant 0 : i32
    %c0_i32_2 = arith.constant 0 : i32
    return %c0_i32, %c0_i32_0, %c0_i32_1 : i32, i32, i32
  }
  func.func @transform_9(%arg0: i32) -> (i32, i32) {
    %c0_i32 = arith.constant 0 : i32
    %c0_i32_0 = arith.constant 0 : i32
    %c0_i32_1 = arith.constant 0 : i32
    return %c0_i32, %c0_i32_0 : i32, i32
  }
  func.func @transform_10(%arg0: i32) -> (i32, i32) {
    %c0_i32 = arith.constant 0 : i32
    %c0_i32_0 = arith.constant 0 : i32
    %c0_i32_1 = arith.constant 0 : i32
    return %c0_i32, %c0_i32_0 : i32, i32
  }
  func.func @transform_11(%arg0: i32) -> (i32, i32) {
    %c0_i32 = arith.constant 0 : i32
    %c0_i32_0 = arith.constant 0 : i32
    %c0_i32_1 = arith.constant 0 : i32
    return %c0_i32, %c0_i32_0 : i32, i32
  }
  func.func @transform_12(%arg0: i32) -> (i32, i32) {
    %c0_i32 = arith.constant 0 : i32
    %c0_i32_0 = arith.constant 0 : i32
    %c0_i32_1 = arith.constant 0 : i32
    return %c0_i32, %c0_i32_0 : i32, i32
  }
  func.func @transform_13(%arg0: i32) -> (i32, i32) {
    %c0_i32 = arith.constant 0 : i32
    %c0_i32_0 = arith.constant 0 : i32
    %c0_i32_1 = arith.constant 0 : i32
    return %c0_i32, %c0_i32_0 : i32, i32
  }
}

module attributes {stable_mosaic.version = 11 : i64} {
  func.func @_bilstm_fused_kernel(%arg0: i32, %arg1: memref<2x1xi32, #tpu.memory_space<vmem>>, %arg2: memref<16x32xf32, #tpu.memory_space<vmem>>, %arg3: memref<32x128xf32, #tpu.memory_space<vmem>>, %arg4: memref<32x128xf32, #tpu.memory_space<vmem>>, %arg5: memref<1x128xf32, #tpu.memory_space<vmem>>, %arg6: memref<32x128xf32, #tpu.memory_space<vmem>>, %arg7: memref<32x128xf32, #tpu.memory_space<vmem>>, %arg8: memref<1x128xf32, #tpu.memory_space<vmem>>, %arg9: memref<64x64xf32, #tpu.memory_space<vmem>>, %arg10: memref<16x128xf32, #tpu.memory_space<vmem>>, %arg11: memref<2x2x32xf32, #tpu.memory_space<vmem>>, %arg12: memref<2x2x32xf32, #tpu.memory_space<vmem>>, %arg13: memref<16x128xf32, #tpu.memory_space<vmem>>, %arg14: memref<16x128xf32, #tpu.memory_space<vmem>>, %arg15: memref<16x32xf32, #tpu.memory_space<vmem>>, %arg16: memref<16x32xf32, #tpu.memory_space<vmem>>, %arg17: memref<2x32xf32, #tpu.memory_space<vmem>>, %arg18: memref<2x32xf32, #tpu.memory_space<vmem>>, %arg19: memref<2x32xf32, #tpu.memory_space<vmem>>, %arg20: memref<2x32xf32, #tpu.memory_space<vmem>>) attributes {dimension_semantics = [#tpu.dimension_semantics<arbitrary>], iteration_bounds = array<i64: 1>, scalar_prefetch = 0 : i64, scratch_operands = 8 : i64, tpu.core_type = #tpu.core_type<tc>, window_params = [{pipeline_mode = #tpu.pipeline_mode<synchronous>, transform_indices = @transform_0, window_bounds = array<i64: 2, 1>}, {pipeline_mode = #tpu.pipeline_mode<synchronous>, transform_indices = @transform_1, window_bounds = array<i64: 16, 32>}, {pipeline_mode = #tpu.pipeline_mode<synchronous>, transform_indices = @transform_2, window_bounds = array<i64: 32, 128>}, {pipeline_mode = #tpu.pipeline_mode<synchronous>, transform_indices = @transform_3, window_bounds = array<i64: 32, 128>}, {pipeline_mode = #tpu.pipeline_mode<synchronous>, transform_indices = @transform_4, window_bounds = array<i64: 1, 128>}, {pipeline_mode = #tpu.pipeline_mode<synchronous>, transform_indices = @transform_5, window_bounds = array<i64: 32, 128>}, {pipeline_mode = #tpu.pipeline_mode<synchronous>, transform_indices = @transform_6, window_bounds = array<i64: 32, 128>}, {pipeline_mode = #tpu.pipeline_mode<synchronous>, transform_indices = @transform_7, window_bounds = array<i64: 1, 128>}, {pipeline_mode = #tpu.pipeline_mode<synchronous>, transform_indices = @transform_8, window_bounds = array<i64: 64, 64>}, {pipeline_mode = #tpu.pipeline_mode<synchronous>, transform_indices = @transform_9, window_bounds = array<i64: 16, 128>}, {pipeline_mode = #tpu.pipeline_mode<synchronous>, transform_indices = @transform_10, window_bounds = array<i64: 2, 2, 32>}, {pipeline_mode = #tpu.pipeline_mode<synchronous>, transform_indices = @transform_11, window_bounds = array<i64: 2, 2, 32>}]} {
    %c0 = arith.constant 0 : index
    %c0_0 = arith.constant 0 : index
    %0 = vector.load %arg2[%c0, %c0_0] : memref<16x32xf32, #tpu.memory_space<vmem>>, vector<16x32xf32>
    %c0_1 = arith.constant 0 : index
    %c0_2 = arith.constant 0 : index
    %1 = vector.load %arg3[%c0_1, %c0_2] : memref<32x128xf32, #tpu.memory_space<vmem>>, vector<32x128xf32>
    %cst = arith.constant dense<0.000000e+00> : vector<16x128xf32>
    %2 = tpu.matmul %0, %1, %cst {dimension_numbers = #tpu.dot_dimension_numbers<[1], [0], [0], [1], [0, 0, 1, 1], [], []>} : vector<16x32xf32>, vector<32x128xf32>, vector<16x128xf32> -> vector<16x128xf32>
    %c0_3 = arith.constant 0 : index
    %c0_4 = arith.constant 0 : index
    %3 = vector.load %arg5[%c0_3, %c0_4] : memref<1x128xf32, #tpu.memory_space<vmem>>, vector<1x128xf32>
    %4 = vector.broadcast %3 : vector<1x128xf32> to vector<16x128xf32>
    %5 = arith.addf %2, %4 : vector<16x128xf32>
    %c0_5 = arith.constant 0 : index
    %c0_6 = arith.constant 0 : index
    %6 = vector.load %arg13[%c0_5, %c0_6] : memref<16x128xf32, #tpu.memory_space<vmem>>, vector<16x128xf32>
    tpu.vector_store %arg13[%c0_5, %c0_6], %5 {strides = array<i32>} : memref<16x128xf32, #tpu.memory_space<vmem>>, vector<16x128xf32>,
    %c0_7 = arith.constant 0 : index
    %c0_8 = arith.constant 0 : index
    %7 = vector.load %arg6[%c0_7, %c0_8] : memref<32x128xf32, #tpu.memory_space<vmem>>, vector<32x128xf32>
    %cst_9 = arith.constant dense<0.000000e+00> : vector<16x128xf32>
    %8 = tpu.matmul %0, %7, %cst_9 {dimension_numbers = #tpu.dot_dimension_numbers<[1], [0], [0], [1], [0, 0, 1, 1], [], []>} : vector<16x32xf32>, vector<32x128xf32>, vector<16x128xf32> -> vector<16x128xf32>
    %c0_10 = arith.constant 0 : index
    %c0_11 = arith.constant 0 : index
    %9 = vector.load %arg8[%c0_10, %c0_11] : memref<1x128xf32, #tpu.memory_space<vmem>>, vector<1x128xf32>
    %10 = vector.broadcast %9 : vector<1x128xf32> to vector<16x128xf32>
    %11 = arith.addf %8, %10 : vector<16x128xf32>
    %c0_12 = arith.constant 0 : index
    %c0_13 = arith.constant 0 : index
    %12 = vector.load %arg14[%c0_12, %c0_13] : memref<16x128xf32, #tpu.memory_space<vmem>>, vector<16x128xf32>
    tpu.vector_store %arg14[%c0_12, %c0_13], %11 {strides = array<i32>} : memref<16x128xf32, #tpu.memory_space<vmem>>, vector<16x128xf32>,
    %cst_14 = arith.constant 0.000000e+00 : f32
    %13 = vector.broadcast %cst_14 : f32 to vector<2x32xf32>
    %c0_15 = arith.constant 0 : index
    %c0_16 = arith.constant 0 : index
    %14 = vector.load %arg17[%c0_15, %c0_16] : memref<2x32xf32, #tpu.memory_space<vmem>>, vector<2x32xf32>
    tpu.vector_store %arg17[%c0_15, %c0_16], %13 {strides = array<i32>} : memref<2x32xf32, #tpu.memory_space<vmem>>, vector<2x32xf32>,
    %cst_17 = arith.constant 0.000000e+00 : f32
    %15 = vector.broadcast %cst_17 : f32 to vector<2x32xf32>
    %c0_18 = arith.constant 0 : index
    %c0_19 = arith.constant 0 : index
    %16 = vector.load %arg18[%c0_18, %c0_19] : memref<2x32xf32, #tpu.memory_space<vmem>>, vector<2x32xf32>
    tpu.vector_store %arg18[%c0_18, %c0_19], %15 {strides = array<i32>} : memref<2x32xf32, #tpu.memory_space<vmem>>, vector<2x32xf32>,
    %cst_20 = arith.constant 0.000000e+00 : f32
    %17 = vector.broadcast %cst_20 : f32 to vector<2x32xf32>
    %c0_21 = arith.constant 0 : index
    %c0_22 = arith.constant 0 : index
    %18 = vector.load %arg19[%c0_21, %c0_22] : memref<2x32xf32, #tpu.memory_space<vmem>>, vector<2x32xf32>
    tpu.vector_store %arg19[%c0_21, %c0_22], %17 {strides = array<i32>} : memref<2x32xf32, #tpu.memory_space<vmem>>, vector<2x32xf32>,
    %cst_23 = arith.constant 0.000000e+00 : f32
    %19 = vector.broadcast %cst_23 : f32 to vector<2x32xf32>
    %c0_24 = arith.constant 0 : index
    %c0_25 = arith.constant 0 : index
    %20 = vector.load %arg20[%c0_24, %c0_25] : memref<2x32xf32, #tpu.memory_space<vmem>>, vector<2x32xf32>
    tpu.vector_store %arg20[%c0_24, %c0_25], %19 {strides = array<i32>} : memref<2x32xf32, #tpu.memory_space<vmem>>, vector<2x32xf32>,
    %c0_26 = arith.constant 0 : index
    %c0_27 = arith.constant 0 : index
    %21 = vector.load %arg1[%c0_26, %c0_27] : memref<2x1xi32, #tpu.memory_space<vmem>>, vector<2x1xi32>
    %c0_28 = arith.constant 0 : index
    %c0_29 = arith.constant 0 : index
    %22 = vector.load %arg4[%c0_28, %c0_29] : memref<32x128xf32, #tpu.memory_space<vmem>>, vector<32x128xf32>
    %c0_30 = arith.constant 0 : index
    %c0_31 = arith.constant 0 : index
    %23 = vector.load %arg7[%c0_30, %c0_31] : memref<32x128xf32, #tpu.memory_space<vmem>>, vector<32x128xf32>
    %c0_32 = arith.constant 0 : index
    %c0_33 = arith.constant 0 : index
    %24 = vector.load %arg13[%c0_32, %c0_33] : memref<16x128xf32, #tpu.memory_space<vmem>>, vector<1x128xf32>
    %c8 = arith.constant 8 : index
    %c0_34 = arith.constant 0 : index
    %25 = vector.load %arg13[%c8, %c0_34] : memref<16x128xf32, #tpu.memory_space<vmem>>, vector<1x128xf32>
    %26 = tpu.concatenate %24, %25 in 0 : vector<1x128xf32>, vector<1x128xf32> -> vector<2x128xf32>
    %c7 = arith.constant 7 : index
    %c0_35 = arith.constant 0 : index
    %27 = vector.load %arg14[%c7, %c0_35] : memref<16x128xf32, #tpu.memory_space<vmem>>, vector<1x128xf32>
    %c15 = arith.constant 15 : index
    %c0_36 = arith.constant 0 : index
    %28 = vector.load %arg14[%c15, %c0_36] : memref<16x128xf32, #tpu.memory_space<vmem>>, vector<1x128xf32>
    %29 = tpu.concatenate %27, %28 in 0 : vector<1x128xf32>, vector<1x128xf32> -> vector<2x128xf32>
    %c0_37 = arith.constant 0 : index
    %c0_38 = arith.constant 0 : index
    %30 = vector.load %arg17[%c0_37, %c0_38] : memref<2x32xf32, #tpu.memory_space<vmem>>, vector<2x32xf32>
    %c0_39 = arith.constant 0 : index
    %c0_40 = arith.constant 0 : index
    %31 = vector.load %arg18[%c0_39, %c0_40] : memref<2x32xf32, #tpu.memory_space<vmem>>, vector<2x32xf32>
    %c0_41 = arith.constant 0 : index
    %c0_42 = arith.constant 0 : index
    %32 = vector.load %arg19[%c0_41, %c0_42] : memref<2x32xf32, #tpu.memory_space<vmem>>, vector<2x32xf32>
    %c0_43 = arith.constant 0 : index
    %c0_44 = arith.constant 0 : index
    %33 = vector.load %arg20[%c0_43, %c0_44] : memref<2x32xf32, #tpu.memory_space<vmem>>, vector<2x32xf32>
    %cst_45 = arith.constant dense<0.000000e+00> : vector<2x128xf32>
    %34 = tpu.matmul %30, %22, %cst_45 {dimension_numbers = #tpu.dot_dimension_numbers<[1], [0], [0], [1], [0, 0, 1, 1], [], []>} : vector<2x32xf32>, vector<32x128xf32>, vector<2x128xf32> -> vector<2x128xf32>
    %35 = arith.addf %26, %34 : vector<2x128xf32>
    %cst_46 = arith.constant dense<0.000000e+00> : vector<2x128xf32>
    %36 = tpu.matmul %32, %23, %cst_46 {dimension_numbers = #tpu.dot_dimension_numbers<[1], [0], [0], [1], [0, 0, 1, 1], [], []>} : vector<2x32xf32>, vector<32x128xf32>, vector<2x128xf32> -> vector<2x128xf32>
    %37 = arith.addf %29, %36 : vector<2x128xf32>
    %38 = arith.negf %35 : vector<2x128xf32>
    %39 = math.exp %38 : vector<2x128xf32>
    %cst_47 = arith.constant 1.000000e+00 : f32
    %40 = vector.broadcast %cst_47 : f32 to vector<2x128xf32>
    %41 = arith.addf %40, %39 : vector<2x128xf32>
    %42 = arith.divf %40, %41 : vector<2x128xf32>
    %43 = vector.extract_strided_slice %42 {offsets = [0, 0], sizes = [2, 32], strides = [1, 1]} : vector<2x128xf32> to vector<2x32xf32>
    %44 = vector.extract_strided_slice %42 {offsets = [0, 32], sizes = [2, 32], strides = [1, 1]} : vector<2x128xf32> to vector<2x32xf32>
    %45 = vector.extract_strided_slice %42 {offsets = [0, 96], sizes = [2, 32], strides = [1, 1]} : vector<2x128xf32> to vector<2x32xf32>
    %46 = vector.extract_strided_slice %35 {offsets = [0, 64], sizes = [2, 32], strides = [1, 1]} : vector<2x128xf32> to vector<2x32xf32>
    %47 = math.tanh %46 : vector<2x32xf32>
    %48 = arith.mulf %44, %31 : vector<2x32xf32>
    %49 = arith.mulf %43, %47 : vector<2x32xf32>
    %50 = arith.addf %48, %49 : vector<2x32xf32>
    %51 = math.tanh %50 : vector<2x32xf32>
    %52 = arith.mulf %45, %51 : vector<2x32xf32>
    %53 = arith.negf %37 : vector<2x128xf32>
    %54 = math.exp %53 : vector<2x128xf32>
    %cst_48 = arith.constant 1.000000e+00 : f32
    %55 = vector.broadcast %cst_48 : f32 to vector<2x128xf32>
    %56 = arith.addf %55, %54 : vector<2x128xf32>
    %57 = arith.divf %55, %56 : vector<2x128xf32>
    %58 = vector.extract_strided_slice %57 {offsets = [0, 0], sizes = [2, 32], strides = [1, 1]} : vector<2x128xf32> to vector<2x32xf32>
    %59 = vector.extract_strided_slice %57 {offsets = [0, 32], sizes = [2, 32], strides = [1, 1]} : vector<2x128xf32> to vector<2x32xf32>
    %60 = vector.extract_strided_slice %57 {offsets = [0, 96], sizes = [2, 32], strides = [1, 1]} : vector<2x128xf32> to vector<2x32xf32>
    %61 = vector.extract_strided_slice %37 {offsets = [0, 64], sizes = [2, 32], strides = [1, 1]} : vector<2x128xf32> to vector<2x32xf32>
    %62 = math.tanh %61 : vector<2x32xf32>
    %63 = arith.mulf %59, %33 : vector<2x32xf32>
    %64 = arith.mulf %58, %62 : vector<2x32xf32>
    %65 = arith.addf %63, %64 : vector<2x32xf32>
    %66 = math.tanh %65 : vector<2x32xf32>
    %67 = arith.mulf %60, %66 : vector<2x32xf32>
    %c0_i32 = arith.constant 0 : i32
    %68 = vector.broadcast %c0_i32 : i32 to vector<2x1xi32>
    %69 = arith.cmpi sgt, %21, %68 : vector<2x1xi32>
    %c7_i32 = arith.constant 7 : i32
    %70 = vector.broadcast %c7_i32 : i32 to vector<2x1xi32>
    %71 = arith.cmpi sgt, %21, %70 : vector<2x1xi32>
    %72 = vector.shape_cast %69 : vector<2x1xi1> to vector<2x1xi1>
    %73 = vector.broadcast %72 : vector<2x1xi1> to vector<2x32xi1>
    %74 = arith.select %73, %52, %30 : vector<2x32xi1>, vector<2x32xf32>
    %c0_49 = arith.constant 0 : index
    %c0_50 = arith.constant 0 : index
    %75 = vector.load %arg17[%c0_49, %c0_50] : memref<2x32xf32, #tpu.memory_space<vmem>>, vector<2x32xf32>
    tpu.vector_store %arg17[%c0_49, %c0_50], %74 {strides = array<i32>} : memref<2x32xf32, #tpu.memory_space<vmem>>, vector<2x32xf32>,
    %76 = vector.shape_cast %69 : vector<2x1xi1> to vector<2x1xi1>
    %77 = vector.broadcast %76 : vector<2x1xi1> to vector<2x32xi1>
    %78 = arith.select %77, %50, %31 : vector<2x32xi1>, vector<2x32xf32>
    %c0_51 = arith.constant 0 : index
    %c0_52 = arith.constant 0 : index
    %79 = vector.load %arg18[%c0_51, %c0_52] : memref<2x32xf32, #tpu.memory_space<vmem>>, vector<2x32xf32>
    tpu.vector_store %arg18[%c0_51, %c0_52], %78 {strides = array<i32>} : memref<2x32xf32, #tpu.memory_space<vmem>>, vector<2x32xf32>,
    %80 = vector.shape_cast %71 : vector<2x1xi1> to vector<2x1xi1>
    %81 = vector.broadcast %80 : vector<2x1xi1> to vector<2x32xi1>
    %82 = arith.select %81, %67, %32 : vector<2x32xi1>, vector<2x32xf32>
    %c0_53 = arith.constant 0 : index
    %c0_54 = arith.constant 0 : index
    %83 = vector.load %arg19[%c0_53, %c0_54] : memref<2x32xf32, #tpu.memory_space<vmem>>, vector<2x32xf32>
    tpu.vector_store %arg19[%c0_53, %c0_54], %82 {strides = array<i32>} : memref<2x32xf32, #tpu.memory_space<vmem>>, vector<2x32xf32>,
    %84 = vector.shape_cast %71 : vector<2x1xi1> to vector<2x1xi1>
    %85 = vector.broadcast %84 : vector<2x1xi1> to vector<2x32xi1>
    %86 = arith.select %85, %65, %33 : vector<2x32xi1>, vector<2x32xf32>
    %c0_55 = arith.constant 0 : index
    %c0_56 = arith.constant 0 : index
    %87 = vector.load %arg20[%c0_55, %c0_56] : memref<2x32xf32, #tpu.memory_space<vmem>>, vector<2x32xf32>
    tpu.vector_store %arg20[%c0_55, %c0_56], %86 {strides = array<i32>} : memref<2x32xf32, #tpu.memory_space<vmem>>, vector<2x32xf32>,
    %cst_57 = arith.constant 0.000000e+00 : f32
    %88 = vector.broadcast %cst_57 : f32 to vector<2x32xf32>
    %89 = vector.shape_cast %69 : vector<2x1xi1> to vector<2x1xi1>
    %90 = vector.broadcast %89 : vector<2x1xi1> to vector<2x32xi1>
    %91 = arith.select %90, %52, %88 : vector<2x32xi1>, vector<2x32xf32>
    %cst_58 = arith.constant 0.000000e+00 : f32
    %92 = vector.broadcast %cst_58 : f32 to vector<2x32xf32>
    %93 = vector.shape_cast %71 : vector<2x1xi1> to vector<2x1xi1>
    %94 = vector.broadcast %93 : vector<2x1xi1> to vector<2x32xi1>
    %95 = arith.select %94, %67, %92 : vector<2x32xi1>, vector<2x32xf32>
    %96 = vector.extract_strided_slice %91 {offsets = [0, 0], sizes = [1, 32], strides = [1, 1]} : vector<2x32xf32> to vector<1x32xf32>
    %c0_59 = arith.constant 0 : index
    %c0_60 = arith.constant 0 : index
    %97 = vector.load %arg15[%c0_59, %c0_60] : memref<16x32xf32, #tpu.memory_space<vmem>>, vector<1x32xf32>
    tpu.vector_store %arg15[%c0_59, %c0_60], %96 {strides = array<i32>} : memref<16x32xf32, #tpu.memory_space<vmem>>, vector<1x32xf32>,
    %98 = vector.extract_strided_slice %95 {offsets = [0, 0], sizes = [1, 32], strides = [1, 1]} : vector<2x32xf32> to vector<1x32xf32>
    %c7_61 = arith.constant 7 : index
    %c0_62 = arith.constant 0 : index
    %99 = vector.load %arg16[%c7_61, %c0_62] : memref<16x32xf32, #tpu.memory_space<vmem>>, vector<1x32xf32>
    tpu.vector_store %arg16[%c7_61, %c0_62], %98 {strides = array<i32>} : memref<16x32xf32, #tpu.memory_space<vmem>>, vector<1x32xf32>,
    %100 = vector.extract_strided_slice %91 {offsets = [1, 0], sizes = [1, 32], strides = [1, 1]} : vector<2x32xf32> to vector<1x32xf32>
    %c8_63 = arith.constant 8 : index
    %c0_64 = arith.constant 0 : index
    %101 = vector.load %arg15[%c8_63, %c0_64] : memref<16x32xf32, #tpu.memory_space<vmem>>, vector<1x32xf32>
    tpu.vector_store %arg15[%c8_63, %c0_64], %100 {strides = array<i32>} : memref<16x32xf32, #tpu.memory_space<vmem>>, vector<1x32xf32>,
    %102 = vector.extract_strided_slice %95 {offsets = [1, 0], sizes = [1, 32], strides = [1, 1]} : vector<2x32xf32> to vector<1x32xf32>
    %c15_65 = arith.constant 15 : index
    %c0_66 = arith.constant 0 : index
    %103 = vector.load %arg16[%c15_65, %c0_66] : memref<16x32xf32, #tpu.memory_space<vmem>>, vector<1x32xf32>
    tpu.vector_store %arg16[%c15_65, %c0_66], %102 {strides = array<i32>} : memref<16x32xf32, #tpu.memory_space<vmem>>, vector<1x32xf32>,
    %c1 = arith.constant 1 : index
    %c0_67 = arith.constant 0 : index
    %104 = vector.load %arg13[%c1, %c0_67] : memref<16x128xf32, #tpu.memory_space<vmem>>, vector<1x128xf32>
    %c9 = arith.constant 9 : index
    %c0_68 = arith.constant 0 : index
    %105 = vector.load %arg13[%c9, %c0_68] : memref<16x128xf32, #tpu.memory_space<vmem>>, vector<1x128xf32>
    %106 = tpu.concatenate %104, %105 in 0 : vector<1x128xf32>, vector<1x128xf32> -> vector<2x128xf32>
    %c6 = arith.constant 6 : index
    %c0_69 = arith.constant 0 : index
    %107 = vector.load %arg14[%c6, %c0_69] : memref<16x128xf32, #tpu.memory_space<vmem>>, vector<1x128xf32>
    %c14 = arith.constant 14 : index
    %c0_70 = arith.constant 0 : index
    %108 = vector.load %arg14[%c14, %c0_70] : memref<16x128xf32, #tpu.memory_space<vmem>>, vector<1x128xf32>
    %109 = tpu.concatenate %107, %108 in 0 : vector<1x128xf32>, vector<1x128xf32> -> vector<2x128xf32>
    %c0_71 = arith.constant 0 : index
    %c0_72 = arith.constant 0 : index
    %110 = vector.load %arg17[%c0_71, %c0_72] : memref<2x32xf32, #tpu.memory_space<vmem>>, vector<2x32xf32>
    %c0_73 = arith.constant 0 : index
    %c0_74 = arith.constant 0 : index
    %111 = vector.load %arg18[%c0_73, %c0_74] : memref<2x32xf32, #tpu.memory_space<vmem>>, vector<2x32xf32>
    %c0_75 = arith.constant 0 : index
    %c0_76 = arith.constant 0 : index
    %112 = vector.load %arg19[%c0_75, %c0_76] : memref<2x32xf32, #tpu.memory_space<vmem>>, vector<2x32xf32>
    %c0_77 = arith.constant 0 : index
    %c0_78 = arith.constant 0 : index
    %113 = vector.load %arg20[%c0_77, %c0_78] : memref<2x32xf32, #tpu.memory_space<vmem>>, vector<2x32xf32>
    %cst_79 = arith.constant dense<0.000000e+00> : vector<2x128xf32>
    %114 = tpu.matmul %110, %22, %cst_79 {dimension_numbers = #tpu.dot_dimension_numbers<[1], [0], [0], [1], [0, 0, 1, 1], [], []>} : vector<2x32xf32>, vector<32x128xf32>, vector<2x128xf32> -> vector<2x128xf32>
    %115 = arith.addf %106, %114 : vector<2x128xf32>
    %cst_80 = arith.constant dense<0.000000e+00> : vector<2x128xf32>
    %116 = tpu.matmul %112, %23, %cst_80 {dimension_numbers = #tpu.dot_dimension_numbers<[1], [0], [0], [1], [0, 0, 1, 1], [], []>} : vector<2x32xf32>, vector<32x128xf32>, vector<2x128xf32> -> vector<2x128xf32>
    %117 = arith.addf %109, %116 : vector<2x128xf32>
    %118 = arith.negf %115 : vector<2x128xf32>
    %119 = math.exp %118 : vector<2x128xf32>
    %cst_81 = arith.constant 1.000000e+00 : f32
    %120 = vector.broadcast %cst_81 : f32 to vector<2x128xf32>
    %121 = arith.addf %120, %119 : vector<2x128xf32>
    %122 = arith.divf %120, %121 : vector<2x128xf32>
    %123 = vector.extract_strided_slice %122 {offsets = [0, 0], sizes = [2, 32], strides = [1, 1]} : vector<2x128xf32> to vector<2x32xf32>
    %124 = vector.extract_strided_slice %122 {offsets = [0, 32], sizes = [2, 32], strides = [1, 1]} : vector<2x128xf32> to vector<2x32xf32>
    %125 = vector.extract_strided_slice %122 {offsets = [0, 96], sizes = [2, 32], strides = [1, 1]} : vector<2x128xf32> to vector<2x32xf32>
    %126 = vector.extract_strided_slice %115 {offsets = [0, 64], sizes = [2, 32], strides = [1, 1]} : vector<2x128xf32> to vector<2x32xf32>
    %127 = math.tanh %126 : vector<2x32xf32>
    %128 = arith.mulf %124, %111 : vector<2x32xf32>
    %129 = arith.mulf %123, %127 : vector<2x32xf32>
    %130 = arith.addf %128, %129 : vector<2x32xf32>
    %131 = math.tanh %130 : vector<2x32xf32>
    %132 = arith.mulf %125, %131 : vector<2x32xf32>
    %133 = arith.negf %117 : vector<2x128xf32>
    %134 = math.exp %133 : vector<2x128xf32>
    %cst_82 = arith.constant 1.000000e+00 : f32
    %135 = vector.broadcast %cst_82 : f32 to vector<2x128xf32>
    %136 = arith.addf %135, %134 : vector<2x128xf32>
    %137 = arith.divf %135, %136 : vector<2x128xf32>
    %138 = vector.extract_strided_slice %137 {offsets = [0, 0], sizes = [2, 32], strides = [1, 1]} : vector<2x128xf32> to vector<2x32xf32>
    %139 = vector.extract_strided_slice %137 {offsets = [0, 32], sizes = [2, 32], strides = [1, 1]} : vector<2x128xf32> to vector<2x32xf32>
    %140 = vector.extract_strided_slice %137 {offsets = [0, 96], sizes = [2, 32], strides = [1, 1]} : vector<2x128xf32> to vector<2x32xf32>
    %141 = vector.extract_strided_slice %117 {offsets = [0, 64], sizes = [2, 32], strides = [1, 1]} : vector<2x128xf32> to vector<2x32xf32>
    %142 = math.tanh %141 : vector<2x32xf32>
    %143 = arith.mulf %139, %113 : vector<2x32xf32>
    %144 = arith.mulf %138, %142 : vector<2x32xf32>
    %145 = arith.addf %143, %144 : vector<2x32xf32>
    %146 = math.tanh %145 : vector<2x32xf32>
    %147 = arith.mulf %140, %146 : vector<2x32xf32>
    %c1_i32 = arith.constant 1 : i32
    %148 = vector.broadcast %c1_i32 : i32 to vector<2x1xi32>
    %149 = arith.cmpi sgt, %21, %148 : vector<2x1xi32>
    %c6_i32 = arith.constant 6 : i32
    %150 = vector.broadcast %c6_i32 : i32 to vector<2x1xi32>
    %151 = arith.cmpi sgt, %21, %150 : vector<2x1xi32>
    %152 = vector.shape_cast %149 : vector<2x1xi1> to vector<2x1xi1>
    %153 = vector.broadcast %152 : vector<2x1xi1> to vector<2x32xi1>
    %154 = arith.select %153, %132, %110 : vector<2x32xi1>, vector<2x32xf32>
    %c0_83 = arith.constant 0 : index
    %c0_84 = arith.constant 0 : index
    %155 = vector.load %arg17[%c0_83, %c0_84] : memref<2x32xf32, #tpu.memory_space<vmem>>, vector<2x32xf32>
    tpu.vector_store %arg17[%c0_83, %c0_84], %154 {strides = array<i32>} : memref<2x32xf32, #tpu.memory_space<vmem>>, vector<2x32xf32>,
    %156 = vector.shape_cast %149 : vector<2x1xi1> to vector<2x1xi1>
    %157 = vector.broadcast %156 : vector<2x1xi1> to vector<2x32xi1>
    %158 = arith.select %157, %130, %111 : vector<2x32xi1>, vector<2x32xf32>
    %c0_85 = arith.constant 0 : index
    %c0_86 = arith.constant 0 : index
    %159 = vector.load %arg18[%c0_85, %c0_86] : memref<2x32xf32, #tpu.memory_space<vmem>>, vector<2x32xf32>
    tpu.vector_store %arg18[%c0_85, %c0_86], %158 {strides = array<i32>} : memref<2x32xf32, #tpu.memory_space<vmem>>, vector<2x32xf32>,
    %160 = vector.shape_cast %151 : vector<2x1xi1> to vector<2x1xi1>
    %161 = vector.broadcast %160 : vector<2x1xi1> to vector<2x32xi1>
    %162 = arith.select %161, %147, %112 : vector<2x32xi1>, vector<2x32xf32>
    %c0_87 = arith.constant 0 : index
    %c0_88 = arith.constant 0 : index
    %163 = vector.load %arg19[%c0_87, %c0_88] : memref<2x32xf32, #tpu.memory_space<vmem>>, vector<2x32xf32>
    tpu.vector_store %arg19[%c0_87, %c0_88], %162 {strides = array<i32>} : memref<2x32xf32, #tpu.memory_space<vmem>>, vector<2x32xf32>,
    %164 = vector.shape_cast %151 : vector<2x1xi1> to vector<2x1xi1>
    %165 = vector.broadcast %164 : vector<2x1xi1> to vector<2x32xi1>
    %166 = arith.select %165, %145, %113 : vector<2x32xi1>, vector<2x32xf32>
    %c0_89 = arith.constant 0 : index
    %c0_90 = arith.constant 0 : index
    %167 = vector.load %arg20[%c0_89, %c0_90] : memref<2x32xf32, #tpu.memory_space<vmem>>, vector<2x32xf32>
    tpu.vector_store %arg20[%c0_89, %c0_90], %166 {strides = array<i32>} : memref<2x32xf32, #tpu.memory_space<vmem>>, vector<2x32xf32>,
    %cst_91 = arith.constant 0.000000e+00 : f32
    %168 = vector.broadcast %cst_91 : f32 to vector<2x32xf32>
    %169 = vector.shape_cast %149 : vector<2x1xi1> to vector<2x1xi1>
    %170 = vector.broadcast %169 : vector<2x1xi1> to vector<2x32xi1>
    %171 = arith.select %170, %132, %168 : vector<2x32xi1>, vector<2x32xf32>
    %cst_92 = arith.constant 0.000000e+00 : f32
    %172 = vector.broadcast %cst_92 : f32 to vector<2x32xf32>
    %173 = vector.shape_cast %151 : vector<2x1xi1> to vector<2x1xi1>
    %174 = vector.broadcast %173 : vector<2x1xi1> to vector<2x32xi1>
    %175 = arith.select %174, %147, %172 : vector<2x32xi1>, vector<2x32xf32>
    %176 = vector.extract_strided_slice %171 {offsets = [0, 0], sizes = [1, 32], strides = [1, 1]} : vector<2x32xf32> to vector<1x32xf32>
    %c1_93 = arith.constant 1 : index
    %c0_94 = arith.constant 0 : index
    %177 = vector.load %arg15[%c1_93, %c0_94] : memref<16x32xf32, #tpu.memory_space<vmem>>, vector<1x32xf32>
    tpu.vector_store %arg15[%c1_93, %c0_94], %176 {strides = array<i32>} : memref<16x32xf32, #tpu.memory_space<vmem>>, vector<1x32xf32>,
    %178 = vector.extract_strided_slice %175 {offsets = [0, 0], sizes = [1, 32], strides = [1, 1]} : vector<2x32xf32> to vector<1x32xf32>
    %c6_95 = arith.constant 6 : index
    %c0_96 = arith.constant 0 : index
    %179 = vector.load %arg16[%c6_95, %c0_96] : memref<16x32xf32, #tpu.memory_space<vmem>>, vector<1x32xf32>
    tpu.vector_store %arg16[%c6_95, %c0_96], %178 {strides = array<i32>} : memref<16x32xf32, #tpu.memory_space<vmem>>, vector<1x32xf32>,
    %180 = vector.extract_strided_slice %171 {offsets = [1, 0], sizes = [1, 32], strides = [1, 1]} : vector<2x32xf32> to vector<1x32xf32>
    %c9_97 = arith.constant 9 : index
    %c0_98 = arith.constant 0 : index
    %181 = vector.load %arg15[%c9_97, %c0_98] : memref<16x32xf32, #tpu.memory_space<vmem>>, vector<1x32xf32>
    tpu.vector_store %arg15[%c9_97, %c0_98], %180 {strides = array<i32>} : memref<16x32xf32, #tpu.memory_space<vmem>>, vector<1x32xf32>,
    %182 = vector.extract_strided_slice %175 {offsets = [1, 0], sizes = [1, 32], strides = [1, 1]} : vector<2x32xf32> to vector<1x32xf32>
    %c14_99 = arith.constant 14 : index
    %c0_100 = arith.constant 0 : index
    %183 = vector.load %arg16[%c14_99, %c0_100] : memref<16x32xf32, #tpu.memory_space<vmem>>, vector<1x32xf32>
    tpu.vector_store %arg16[%c14_99, %c0_100], %182 {strides = array<i32>} : memref<16x32xf32, #tpu.memory_space<vmem>>, vector<1x32xf32>,
    %c2 = arith.constant 2 : index
    %c0_101 = arith.constant 0 : index
    %184 = vector.load %arg13[%c2, %c0_101] : memref<16x128xf32, #tpu.memory_space<vmem>>, vector<1x128xf32>
    %c10 = arith.constant 10 : index
    %c0_102 = arith.constant 0 : index
    %185 = vector.load %arg13[%c10, %c0_102] : memref<16x128xf32, #tpu.memory_space<vmem>>, vector<1x128xf32>
    %186 = tpu.concatenate %184, %185 in 0 : vector<1x128xf32>, vector<1x128xf32> -> vector<2x128xf32>
    %c5 = arith.constant 5 : index
    %c0_103 = arith.constant 0 : index
    %187 = vector.load %arg14[%c5, %c0_103] : memref<16x128xf32, #tpu.memory_space<vmem>>, vector<1x128xf32>
    %c13 = arith.constant 13 : index
    %c0_104 = arith.constant 0 : index
    %188 = vector.load %arg14[%c13, %c0_104] : memref<16x128xf32, #tpu.memory_space<vmem>>, vector<1x128xf32>
    %189 = tpu.concatenate %187, %188 in 0 : vector<1x128xf32>, vector<1x128xf32> -> vector<2x128xf32>
    %c0_105 = arith.constant 0 : index
    %c0_106 = arith.constant 0 : index
    %190 = vector.load %arg17[%c0_105, %c0_106] : memref<2x32xf32, #tpu.memory_space<vmem>>, vector<2x32xf32>
    %c0_107 = arith.constant 0 : index
    %c0_108 = arith.constant 0 : index
    %191 = vector.load %arg18[%c0_107, %c0_108] : memref<2x32xf32, #tpu.memory_space<vmem>>, vector<2x32xf32>
    %c0_109 = arith.constant 0 : index
    %c0_110 = arith.constant 0 : index
    %192 = vector.load %arg19[%c0_109, %c0_110] : memref<2x32xf32, #tpu.memory_space<vmem>>, vector<2x32xf32>
    %c0_111 = arith.constant 0 : index
    %c0_112 = arith.constant 0 : index
    %193 = vector.load %arg20[%c0_111, %c0_112] : memref<2x32xf32, #tpu.memory_space<vmem>>, vector<2x32xf32>
    %cst_113 = arith.constant dense<0.000000e+00> : vector<2x128xf32>
    %194 = tpu.matmul %190, %22, %cst_113 {dimension_numbers = #tpu.dot_dimension_numbers<[1], [0], [0], [1], [0, 0, 1, 1], [], []>} : vector<2x32xf32>, vector<32x128xf32>, vector<2x128xf32> -> vector<2x128xf32>
    %195 = arith.addf %186, %194 : vector<2x128xf32>
    %cst_114 = arith.constant dense<0.000000e+00> : vector<2x128xf32>
    %196 = tpu.matmul %192, %23, %cst_114 {dimension_numbers = #tpu.dot_dimension_numbers<[1], [0], [0], [1], [0, 0, 1, 1], [], []>} : vector<2x32xf32>, vector<32x128xf32>, vector<2x128xf32> -> vector<2x128xf32>
    %197 = arith.addf %189, %196 : vector<2x128xf32>
    %198 = arith.negf %195 : vector<2x128xf32>
    %199 = math.exp %198 : vector<2x128xf32>
    %cst_115 = arith.constant 1.000000e+00 : f32
    %200 = vector.broadcast %cst_115 : f32 to vector<2x128xf32>
    %201 = arith.addf %200, %199 : vector<2x128xf32>
    %202 = arith.divf %200, %201 : vector<2x128xf32>
    %203 = vector.extract_strided_slice %202 {offsets = [0, 0], sizes = [2, 32], strides = [1, 1]} : vector<2x128xf32> to vector<2x32xf32>
    %204 = vector.extract_strided_slice %202 {offsets = [0, 32], sizes = [2, 32], strides = [1, 1]} : vector<2x128xf32> to vector<2x32xf32>
    %205 = vector.extract_strided_slice %202 {offsets = [0, 96], sizes = [2, 32], strides = [1, 1]} : vector<2x128xf32> to vector<2x32xf32>
    %206 = vector.extract_strided_slice %195 {offsets = [0, 64], sizes = [2, 32], strides = [1, 1]} : vector<2x128xf32> to vector<2x32xf32>
    %207 = math.tanh %206 : vector<2x32xf32>
    %208 = arith.mulf %204, %191 : vector<2x32xf32>
    %209 = arith.mulf %203, %207 : vector<2x32xf32>
    %210 = arith.addf %208, %209 : vector<2x32xf32>
    %211 = math.tanh %210 : vector<2x32xf32>
    %212 = arith.mulf %205, %211 : vector<2x32xf32>
    %213 = arith.negf %197 : vector<2x128xf32>
    %214 = math.exp %213 : vector<2x128xf32>
    %cst_116 = arith.constant 1.000000e+00 : f32
    %215 = vector.broadcast %cst_116 : f32 to vector<2x128xf32>
    %216 = arith.addf %215, %214 : vector<2x128xf32>
    %217 = arith.divf %215, %216 : vector<2x128xf32>
    %218 = vector.extract_strided_slice %217 {offsets = [0, 0], sizes = [2, 32], strides = [1, 1]} : vector<2x128xf32> to vector<2x32xf32>
    %219 = vector.extract_strided_slice %217 {offsets = [0, 32], sizes = [2, 32], strides = [1, 1]} : vector<2x128xf32> to vector<2x32xf32>
    %220 = vector.extract_strided_slice %217 {offsets = [0, 96], sizes = [2, 32], strides = [1, 1]} : vector<2x128xf32> to vector<2x32xf32>
    %221 = vector.extract_strided_slice %197 {offsets = [0, 64], sizes = [2, 32], strides = [1, 1]} : vector<2x128xf32> to vector<2x32xf32>
    %222 = math.tanh %221 : vector<2x32xf32>
    %223 = arith.mulf %219, %193 : vector<2x32xf32>
    %224 = arith.mulf %218, %222 : vector<2x32xf32>
    %225 = arith.addf %223, %224 : vector<2x32xf32>
    %226 = math.tanh %225 : vector<2x32xf32>
    %227 = arith.mulf %220, %226 : vector<2x32xf32>
    %c2_i32 = arith.constant 2 : i32
    %228 = vector.broadcast %c2_i32 : i32 to vector<2x1xi32>
    %229 = arith.cmpi sgt, %21, %228 : vector<2x1xi32>
    %c5_i32 = arith.constant 5 : i32
    %230 = vector.broadcast %c5_i32 : i32 to vector<2x1xi32>
    %231 = arith.cmpi sgt, %21, %230 : vector<2x1xi32>
    %232 = vector.shape_cast %229 : vector<2x1xi1> to vector<2x1xi1>
    %233 = vector.broadcast %232 : vector<2x1xi1> to vector<2x32xi1>
    %234 = arith.select %233, %212, %190 : vector<2x32xi1>, vector<2x32xf32>
    %c0_117 = arith.constant 0 : index
    %c0_118 = arith.constant 0 : index
    %235 = vector.load %arg17[%c0_117, %c0_118] : memref<2x32xf32, #tpu.memory_space<vmem>>, vector<2x32xf32>
    tpu.vector_store %arg17[%c0_117, %c0_118], %234 {strides = array<i32>} : memref<2x32xf32, #tpu.memory_space<vmem>>, vector<2x32xf32>,
    %236 = vector.shape_cast %229 : vector<2x1xi1> to vector<2x1xi1>
    %237 = vector.broadcast %236 : vector<2x1xi1> to vector<2x32xi1>
    %238 = arith.select %237, %210, %191 : vector<2x32xi1>, vector<2x32xf32>
    %c0_119 = arith.constant 0 : index
    %c0_120 = arith.constant 0 : index
    %239 = vector.load %arg18[%c0_119, %c0_120] : memref<2x32xf32, #tpu.memory_space<vmem>>, vector<2x32xf32>
    tpu.vector_store %arg18[%c0_119, %c0_120], %238 {strides = array<i32>} : memref<2x32xf32, #tpu.memory_space<vmem>>, vector<2x32xf32>,
    %240 = vector.shape_cast %231 : vector<2x1xi1> to vector<2x1xi1>
    %241 = vector.broadcast %240 : vector<2x1xi1> to vector<2x32xi1>
    %242 = arith.select %241, %227, %192 : vector<2x32xi1>, vector<2x32xf32>
    %c0_121 = arith.constant 0 : index
    %c0_122 = arith.constant 0 : index
    %243 = vector.load %arg19[%c0_121, %c0_122] : memref<2x32xf32, #tpu.memory_space<vmem>>, vector<2x32xf32>
    tpu.vector_store %arg19[%c0_121, %c0_122], %242 {strides = array<i32>} : memref<2x32xf32, #tpu.memory_space<vmem>>, vector<2x32xf32>,
    %244 = vector.shape_cast %231 : vector<2x1xi1> to vector<2x1xi1>
    %245 = vector.broadcast %244 : vector<2x1xi1> to vector<2x32xi1>
    %246 = arith.select %245, %225, %193 : vector<2x32xi1>, vector<2x32xf32>
    %c0_123 = arith.constant 0 : index
    %c0_124 = arith.constant 0 : index
    %247 = vector.load %arg20[%c0_123, %c0_124] : memref<2x32xf32, #tpu.memory_space<vmem>>, vector<2x32xf32>
    tpu.vector_store %arg20[%c0_123, %c0_124], %246 {strides = array<i32>} : memref<2x32xf32, #tpu.memory_space<vmem>>, vector<2x32xf32>,
    %cst_125 = arith.constant 0.000000e+00 : f32
    %248 = vector.broadcast %cst_125 : f32 to vector<2x32xf32>
    %249 = vector.shape_cast %229 : vector<2x1xi1> to vector<2x1xi1>
    %250 = vector.broadcast %249 : vector<2x1xi1> to vector<2x32xi1>
    %251 = arith.select %250, %212, %248 : vector<2x32xi1>, vector<2x32xf32>
    %cst_126 = arith.constant 0.000000e+00 : f32
    %252 = vector.broadcast %cst_126 : f32 to vector<2x32xf32>
    %253 = vector.shape_cast %231 : vector<2x1xi1> to vector<2x1xi1>
    %254 = vector.broadcast %253 : vector<2x1xi1> to vector<2x32xi1>
    %255 = arith.select %254, %227, %252 : vector<2x32xi1>, vector<2x32xf32>
    %256 = vector.extract_strided_slice %251 {offsets = [0, 0], sizes = [1, 32], strides = [1, 1]} : vector<2x32xf32> to vector<1x32xf32>
    %c2_127 = arith.constant 2 : index
    %c0_128 = arith.constant 0 : index
    %257 = vector.load %arg15[%c2_127, %c0_128] : memref<16x32xf32, #tpu.memory_space<vmem>>, vector<1x32xf32>
    tpu.vector_store %arg15[%c2_127, %c0_128], %256 {strides = array<i32>} : memref<16x32xf32, #tpu.memory_space<vmem>>, vector<1x32xf32>,
    %258 = vector.extract_strided_slice %255 {offsets = [0, 0], sizes = [1, 32], strides = [1, 1]} : vector<2x32xf32> to vector<1x32xf32>
    %c5_129 = arith.constant 5 : index
    %c0_130 = arith.constant 0 : index
    %259 = vector.load %arg16[%c5_129, %c0_130] : memref<16x32xf32, #tpu.memory_space<vmem>>, vector<1x32xf32>
    tpu.vector_store %arg16[%c5_129, %c0_130], %258 {strides = array<i32>} : memref<16x32xf32, #tpu.memory_space<vmem>>, vector<1x32xf32>,
    %260 = vector.extract_strided_slice %251 {offsets = [1, 0], sizes = [1, 32], strides = [1, 1]} : vector<2x32xf32> to vector<1x32xf32>
    %c10_131 = arith.constant 10 : index
    %c0_132 = arith.constant 0 : index
    %261 = vector.load %arg15[%c10_131, %c0_132] : memref<16x32xf32, #tpu.memory_space<vmem>>, vector<1x32xf32>
    tpu.vector_store %arg15[%c10_131, %c0_132], %260 {strides = array<i32>} : memref<16x32xf32, #tpu.memory_space<vmem>>, vector<1x32xf32>,
    %262 = vector.extract_strided_slice %255 {offsets = [1, 0], sizes = [1, 32], strides = [1, 1]} : vector<2x32xf32> to vector<1x32xf32>
    %c13_133 = arith.constant 13 : index
    %c0_134 = arith.constant 0 : index
    %263 = vector.load %arg16[%c13_133, %c0_134] : memref<16x32xf32, #tpu.memory_space<vmem>>, vector<1x32xf32>
    tpu.vector_store %arg16[%c13_133, %c0_134], %262 {strides = array<i32>} : memref<16x32xf32, #tpu.memory_space<vmem>>, vector<1x32xf32>,
    %c3 = arith.constant 3 : index
    %c0_135 = arith.constant 0 : index
    %264 = vector.load %arg13[%c3, %c0_135] : memref<16x128xf32, #tpu.memory_space<vmem>>, vector<1x128xf32>
    %c11 = arith.constant 11 : index
    %c0_136 = arith.constant 0 : index
    %265 = vector.load %arg13[%c11, %c0_136] : memref<16x128xf32, #tpu.memory_space<vmem>>, vector<1x128xf32>
    %266 = tpu.concatenate %264, %265 in 0 : vector<1x128xf32>, vector<1x128xf32> -> vector<2x128xf32>
    %c4 = arith.constant 4 : index
    %c0_137 = arith.constant 0 : index
    %267 = vector.load %arg14[%c4, %c0_137] : memref<16x128xf32, #tpu.memory_space<vmem>>, vector<1x128xf32>
    %c12 = arith.constant 12 : index
    %c0_138 = arith.constant 0 : index
    %268 = vector.load %arg14[%c12, %c0_138] : memref<16x128xf32, #tpu.memory_space<vmem>>, vector<1x128xf32>
    %269 = tpu.concatenate %267, %268 in 0 : vector<1x128xf32>, vector<1x128xf32> -> vector<2x128xf32>
    %c0_139 = arith.constant 0 : index
    %c0_140 = arith.constant 0 : index
    %270 = vector.load %arg17[%c0_139, %c0_140] : memref<2x32xf32, #tpu.memory_space<vmem>>, vector<2x32xf32>
    %c0_141 = arith.constant 0 : index
    %c0_142 = arith.constant 0 : index
    %271 = vector.load %arg18[%c0_141, %c0_142] : memref<2x32xf32, #tpu.memory_space<vmem>>, vector<2x32xf32>
    %c0_143 = arith.constant 0 : index
    %c0_144 = arith.constant 0 : index
    %272 = vector.load %arg19[%c0_143, %c0_144] : memref<2x32xf32, #tpu.memory_space<vmem>>, vector<2x32xf32>
    %c0_145 = arith.constant 0 : index
    %c0_146 = arith.constant 0 : index
    %273 = vector.load %arg20[%c0_145, %c0_146] : memref<2x32xf32, #tpu.memory_space<vmem>>, vector<2x32xf32>
    %cst_147 = arith.constant dense<0.000000e+00> : vector<2x128xf32>
    %274 = tpu.matmul %270, %22, %cst_147 {dimension_numbers = #tpu.dot_dimension_numbers<[1], [0], [0], [1], [0, 0, 1, 1], [], []>} : vector<2x32xf32>, vector<32x128xf32>, vector<2x128xf32> -> vector<2x128xf32>
    %275 = arith.addf %266, %274 : vector<2x128xf32>
    %cst_148 = arith.constant dense<0.000000e+00> : vector<2x128xf32>
    %276 = tpu.matmul %272, %23, %cst_148 {dimension_numbers = #tpu.dot_dimension_numbers<[1], [0], [0], [1], [0, 0, 1, 1], [], []>} : vector<2x32xf32>, vector<32x128xf32>, vector<2x128xf32> -> vector<2x128xf32>
    %277 = arith.addf %269, %276 : vector<2x128xf32>
    %278 = arith.negf %275 : vector<2x128xf32>
    %279 = math.exp %278 : vector<2x128xf32>
    %cst_149 = arith.constant 1.000000e+00 : f32
    %280 = vector.broadcast %cst_149 : f32 to vector<2x128xf32>
    %281 = arith.addf %280, %279 : vector<2x128xf32>
    %282 = arith.divf %280, %281 : vector<2x128xf32>
    %283 = vector.extract_strided_slice %282 {offsets = [0, 0], sizes = [2, 32], strides = [1, 1]} : vector<2x128xf32> to vector<2x32xf32>
    %284 = vector.extract_strided_slice %282 {offsets = [0, 32], sizes = [2, 32], strides = [1, 1]} : vector<2x128xf32> to vector<2x32xf32>
    %285 = vector.extract_strided_slice %282 {offsets = [0, 96], sizes = [2, 32], strides = [1, 1]} : vector<2x128xf32> to vector<2x32xf32>
    %286 = vector.extract_strided_slice %275 {offsets = [0, 64], sizes = [2, 32], strides = [1, 1]} : vector<2x128xf32> to vector<2x32xf32>
    %287 = math.tanh %286 : vector<2x32xf32>
    %288 = arith.mulf %284, %271 : vector<2x32xf32>
    %289 = arith.mulf %283, %287 : vector<2x32xf32>
    %290 = arith.addf %288, %289 : vector<2x32xf32>
    %291 = math.tanh %290 : vector<2x32xf32>
    %292 = arith.mulf %285, %291 : vector<2x32xf32>
    %293 = arith.negf %277 : vector<2x128xf32>
    %294 = math.exp %293 : vector<2x128xf32>
    %cst_150 = arith.constant 1.000000e+00 : f32
    %295 = vector.broadcast %cst_150 : f32 to vector<2x128xf32>
    %296 = arith.addf %295, %294 : vector<2x128xf32>
    %297 = arith.divf %295, %296 : vector<2x128xf32>
    %298 = vector.extract_strided_slice %297 {offsets = [0, 0], sizes = [2, 32], strides = [1, 1]} : vector<2x128xf32> to vector<2x32xf32>
    %299 = vector.extract_strided_slice %297 {offsets = [0, 32], sizes = [2, 32], strides = [1, 1]} : vector<2x128xf32> to vector<2x32xf32>
    %300 = vector.extract_strided_slice %297 {offsets = [0, 96], sizes = [2, 32], strides = [1, 1]} : vector<2x128xf32> to vector<2x32xf32>
    %301 = vector.extract_strided_slice %277 {offsets = [0, 64], sizes = [2, 32], strides = [1, 1]} : vector<2x128xf32> to vector<2x32xf32>
    %302 = math.tanh %301 : vector<2x32xf32>
    %303 = arith.mulf %299, %273 : vector<2x32xf32>
    %304 = arith.mulf %298, %302 : vector<2x32xf32>
    %305 = arith.addf %303, %304 : vector<2x32xf32>
    %306 = math.tanh %305 : vector<2x32xf32>
    %307 = arith.mulf %300, %306 : vector<2x32xf32>
    %c3_i32 = arith.constant 3 : i32
    %308 = vector.broadcast %c3_i32 : i32 to vector<2x1xi32>
    %309 = arith.cmpi sgt, %21, %308 : vector<2x1xi32>
    %c4_i32 = arith.constant 4 : i32
    %310 = vector.broadcast %c4_i32 : i32 to vector<2x1xi32>
    %311 = arith.cmpi sgt, %21, %310 : vector<2x1xi32>
    %312 = vector.shape_cast %309 : vector<2x1xi1> to vector<2x1xi1>
    %313 = vector.broadcast %312 : vector<2x1xi1> to vector<2x32xi1>
    %314 = arith.select %313, %292, %270 : vector<2x32xi1>, vector<2x32xf32>
    %c0_151 = arith.constant 0 : index
    %c0_152 = arith.constant 0 : index
    %315 = vector.load %arg17[%c0_151, %c0_152] : memref<2x32xf32, #tpu.memory_space<vmem>>, vector<2x32xf32>
    tpu.vector_store %arg17[%c0_151, %c0_152], %314 {strides = array<i32>} : memref<2x32xf32, #tpu.memory_space<vmem>>, vector<2x32xf32>,
    %316 = vector.shape_cast %309 : vector<2x1xi1> to vector<2x1xi1>
    %317 = vector.broadcast %316 : vector<2x1xi1> to vector<2x32xi1>
    %318 = arith.select %317, %290, %271 : vector<2x32xi1>, vector<2x32xf32>
    %c0_153 = arith.constant 0 : index
    %c0_154 = arith.constant 0 : index
    %319 = vector.load %arg18[%c0_153, %c0_154] : memref<2x32xf32, #tpu.memory_space<vmem>>, vector<2x32xf32>
    tpu.vector_store %arg18[%c0_153, %c0_154], %318 {strides = array<i32>} : memref<2x32xf32, #tpu.memory_space<vmem>>, vector<2x32xf32>,
    %320 = vector.shape_cast %311 : vector<2x1xi1> to vector<2x1xi1>
    %321 = vector.broadcast %320 : vector<2x1xi1> to vector<2x32xi1>
    %322 = arith.select %321, %307, %272 : vector<2x32xi1>, vector<2x32xf32>
    %c0_155 = arith.constant 0 : index
    %c0_156 = arith.constant 0 : index
    %323 = vector.load %arg19[%c0_155, %c0_156] : memref<2x32xf32, #tpu.memory_space<vmem>>, vector<2x32xf32>
    tpu.vector_store %arg19[%c0_155, %c0_156], %322 {strides = array<i32>} : memref<2x32xf32, #tpu.memory_space<vmem>>, vector<2x32xf32>,
    %324 = vector.shape_cast %311 : vector<2x1xi1> to vector<2x1xi1>
    %325 = vector.broadcast %324 : vector<2x1xi1> to vector<2x32xi1>
    %326 = arith.select %325, %305, %273 : vector<2x32xi1>, vector<2x32xf32>
    %c0_157 = arith.constant 0 : index
    %c0_158 = arith.constant 0 : index
    %327 = vector.load %arg20[%c0_157, %c0_158] : memref<2x32xf32, #tpu.memory_space<vmem>>, vector<2x32xf32>
    tpu.vector_store %arg20[%c0_157, %c0_158], %326 {strides = array<i32>} : memref<2x32xf32, #tpu.memory_space<vmem>>, vector<2x32xf32>,
    %cst_159 = arith.constant 0.000000e+00 : f32
    %328 = vector.broadcast %cst_159 : f32 to vector<2x32xf32>
    %329 = vector.shape_cast %309 : vector<2x1xi1> to vector<2x1xi1>
    %330 = vector.broadcast %329 : vector<2x1xi1> to vector<2x32xi1>
    %331 = arith.select %330, %292, %328 : vector<2x32xi1>, vector<2x32xf32>
    %cst_160 = arith.constant 0.000000e+00 : f32
    %332 = vector.broadcast %cst_160 : f32 to vector<2x32xf32>
    %333 = vector.shape_cast %311 : vector<2x1xi1> to vector<2x1xi1>
    %334 = vector.broadcast %333 : vector<2x1xi1> to vector<2x32xi1>
    %335 = arith.select %334, %307, %332 : vector<2x32xi1>, vector<2x32xf32>
    %336 = vector.extract_strided_slice %331 {offsets = [0, 0], sizes = [1, 32], strides = [1, 1]} : vector<2x32xf32> to vector<1x32xf32>
    %c3_161 = arith.constant 3 : index
    %c0_162 = arith.constant 0 : index
    %337 = vector.load %arg15[%c3_161, %c0_162] : memref<16x32xf32, #tpu.memory_space<vmem>>, vector<1x32xf32>
    tpu.vector_store %arg15[%c3_161, %c0_162], %336 {strides = array<i32>} : memref<16x32xf32, #tpu.memory_space<vmem>>, vector<1x32xf32>,
    %338 = vector.extract_strided_slice %335 {offsets = [0, 0], sizes = [1, 32], strides = [1, 1]} : vector<2x32xf32> to vector<1x32xf32>
    %c4_163 = arith.constant 4 : index
    %c0_164 = arith.constant 0 : index
    %339 = vector.load %arg16[%c4_163, %c0_164] : memref<16x32xf32, #tpu.memory_space<vmem>>, vector<1x32xf32>
    tpu.vector_store %arg16[%c4_163, %c0_164], %338 {strides = array<i32>} : memref<16x32xf32, #tpu.memory_space<vmem>>, vector<1x32xf32>,
    %340 = vector.extract_strided_slice %331 {offsets = [1, 0], sizes = [1, 32], strides = [1, 1]} : vector<2x32xf32> to vector<1x32xf32>
    %c11_165 = arith.constant 11 : index
    %c0_166 = arith.constant 0 : index
    %341 = vector.load %arg15[%c11_165, %c0_166] : memref<16x32xf32, #tpu.memory_space<vmem>>, vector<1x32xf32>
    tpu.vector_store %arg15[%c11_165, %c0_166], %340 {strides = array<i32>} : memref<16x32xf32, #tpu.memory_space<vmem>>, vector<1x32xf32>,
    %342 = vector.extract_strided_slice %335 {offsets = [1, 0], sizes = [1, 32], strides = [1, 1]} : vector<2x32xf32> to vector<1x32xf32>
    %c12_167 = arith.constant 12 : index
    %c0_168 = arith.constant 0 : index
    %343 = vector.load %arg16[%c12_167, %c0_168] : memref<16x32xf32, #tpu.memory_space<vmem>>, vector<1x32xf32>
    tpu.vector_store %arg16[%c12_167, %c0_168], %342 {strides = array<i32>} : memref<16x32xf32, #tpu.memory_space<vmem>>, vector<1x32xf32>,
    %c4_169 = arith.constant 4 : index
    %c0_170 = arith.constant 0 : index
    %344 = vector.load %arg13[%c4_169, %c0_170] : memref<16x128xf32, #tpu.memory_space<vmem>>, vector<1x128xf32>
    %c12_171 = arith.constant 12 : index
    %c0_172 = arith.constant 0 : index
    %345 = vector.load %arg13[%c12_171, %c0_172] : memref<16x128xf32, #tpu.memory_space<vmem>>, vector<1x128xf32>
    %346 = tpu.concatenate %344, %345 in 0 : vector<1x128xf32>, vector<1x128xf32> -> vector<2x128xf32>
    %c3_173 = arith.constant 3 : index
    %c0_174 = arith.constant 0 : index
    %347 = vector.load %arg14[%c3_173, %c0_174] : memref<16x128xf32, #tpu.memory_space<vmem>>, vector<1x128xf32>
    %c11_175 = arith.constant 11 : index
    %c0_176 = arith.constant 0 : index
    %348 = vector.load %arg14[%c11_175, %c0_176] : memref<16x128xf32, #tpu.memory_space<vmem>>, vector<1x128xf32>
    %349 = tpu.concatenate %347, %348 in 0 : vector<1x128xf32>, vector<1x128xf32> -> vector<2x128xf32>
    %c0_177 = arith.constant 0 : index
    %c0_178 = arith.constant 0 : index
    %350 = vector.load %arg17[%c0_177, %c0_178] : memref<2x32xf32, #tpu.memory_space<vmem>>, vector<2x32xf32>
    %c0_179 = arith.constant 0 : index
    %c0_180 = arith.constant 0 : index
    %351 = vector.load %arg18[%c0_179, %c0_180] : memref<2x32xf32, #tpu.memory_space<vmem>>, vector<2x32xf32>
    %c0_181 = arith.constant 0 : index
    %c0_182 = arith.constant 0 : index
    %352 = vector.load %arg19[%c0_181, %c0_182] : memref<2x32xf32, #tpu.memory_space<vmem>>, vector<2x32xf32>
    %c0_183 = arith.constant 0 : index
    %c0_184 = arith.constant 0 : index
    %353 = vector.load %arg20[%c0_183, %c0_184] : memref<2x32xf32, #tpu.memory_space<vmem>>, vector<2x32xf32>
    %cst_185 = arith.constant dense<0.000000e+00> : vector<2x128xf32>
    %354 = tpu.matmul %350, %22, %cst_185 {dimension_numbers = #tpu.dot_dimension_numbers<[1], [0], [0], [1], [0, 0, 1, 1], [], []>} : vector<2x32xf32>, vector<32x128xf32>, vector<2x128xf32> -> vector<2x128xf32>
    %355 = arith.addf %346, %354 : vector<2x128xf32>
    %cst_186 = arith.constant dense<0.000000e+00> : vector<2x128xf32>
    %356 = tpu.matmul %352, %23, %cst_186 {dimension_numbers = #tpu.dot_dimension_numbers<[1], [0], [0], [1], [0, 0, 1, 1], [], []>} : vector<2x32xf32>, vector<32x128xf32>, vector<2x128xf32> -> vector<2x128xf32>
    %357 = arith.addf %349, %356 : vector<2x128xf32>
    %358 = arith.negf %355 : vector<2x128xf32>
    %359 = math.exp %358 : vector<2x128xf32>
    %cst_187 = arith.constant 1.000000e+00 : f32
    %360 = vector.broadcast %cst_187 : f32 to vector<2x128xf32>
    %361 = arith.addf %360, %359 : vector<2x128xf32>
    %362 = arith.divf %360, %361 : vector<2x128xf32>
    %363 = vector.extract_strided_slice %362 {offsets = [0, 0], sizes = [2, 32], strides = [1, 1]} : vector<2x128xf32> to vector<2x32xf32>
    %364 = vector.extract_strided_slice %362 {offsets = [0, 32], sizes = [2, 32], strides = [1, 1]} : vector<2x128xf32> to vector<2x32xf32>
    %365 = vector.extract_strided_slice %362 {offsets = [0, 96], sizes = [2, 32], strides = [1, 1]} : vector<2x128xf32> to vector<2x32xf32>
    %366 = vector.extract_strided_slice %355 {offsets = [0, 64], sizes = [2, 32], strides = [1, 1]} : vector<2x128xf32> to vector<2x32xf32>
    %367 = math.tanh %366 : vector<2x32xf32>
    %368 = arith.mulf %364, %351 : vector<2x32xf32>
    %369 = arith.mulf %363, %367 : vector<2x32xf32>
    %370 = arith.addf %368, %369 : vector<2x32xf32>
    %371 = math.tanh %370 : vector<2x32xf32>
    %372 = arith.mulf %365, %371 : vector<2x32xf32>
    %373 = arith.negf %357 : vector<2x128xf32>
    %374 = math.exp %373 : vector<2x128xf32>
    %cst_188 = arith.constant 1.000000e+00 : f32
    %375 = vector.broadcast %cst_188 : f32 to vector<2x128xf32>
    %376 = arith.addf %375, %374 : vector<2x128xf32>
    %377 = arith.divf %375, %376 : vector<2x128xf32>
    %378 = vector.extract_strided_slice %377 {offsets = [0, 0], sizes = [2, 32], strides = [1, 1]} : vector<2x128xf32> to vector<2x32xf32>
    %379 = vector.extract_strided_slice %377 {offsets = [0, 32], sizes = [2, 32], strides = [1, 1]} : vector<2x128xf32> to vector<2x32xf32>
    %380 = vector.extract_strided_slice %377 {offsets = [0, 96], sizes = [2, 32], strides = [1, 1]} : vector<2x128xf32> to vector<2x32xf32>
    %381 = vector.extract_strided_slice %357 {offsets = [0, 64], sizes = [2, 32], strides = [1, 1]} : vector<2x128xf32> to vector<2x32xf32>
    %382 = math.tanh %381 : vector<2x32xf32>
    %383 = arith.mulf %379, %353 : vector<2x32xf32>
    %384 = arith.mulf %378, %382 : vector<2x32xf32>
    %385 = arith.addf %383, %384 : vector<2x32xf32>
    %386 = math.tanh %385 : vector<2x32xf32>
    %387 = arith.mulf %380, %386 : vector<2x32xf32>
    %c4_i32_189 = arith.constant 4 : i32
    %388 = vector.broadcast %c4_i32_189 : i32 to vector<2x1xi32>
    %389 = arith.cmpi sgt, %21, %388 : vector<2x1xi32>
    %c3_i32_190 = arith.constant 3 : i32
    %390 = vector.broadcast %c3_i32_190 : i32 to vector<2x1xi32>
    %391 = arith.cmpi sgt, %21, %390 : vector<2x1xi32>
    %392 = vector.shape_cast %389 : vector<2x1xi1> to vector<2x1xi1>
    %393 = vector.broadcast %392 : vector<2x1xi1> to vector<2x32xi1>
    %394 = arith.select %393, %372, %350 : vector<2x32xi1>, vector<2x32xf32>
    %c0_191 = arith.constant 0 : index
    %c0_192 = arith.constant 0 : index
    %395 = vector.load %arg17[%c0_191, %c0_192] : memref<2x32xf32, #tpu.memory_space<vmem>>, vector<2x32xf32>
    tpu.vector_store %arg17[%c0_191, %c0_192], %394 {strides = array<i32>} : memref<2x32xf32, #tpu.memory_space<vmem>>, vector<2x32xf32>,
    %396 = vector.shape_cast %389 : vector<2x1xi1> to vector<2x1xi1>
    %397 = vector.broadcast %396 : vector<2x1xi1> to vector<2x32xi1>
    %398 = arith.select %397, %370, %351 : vector<2x32xi1>, vector<2x32xf32>
    %c0_193 = arith.constant 0 : index
    %c0_194 = arith.constant 0 : index
    %399 = vector.load %arg18[%c0_193, %c0_194] : memref<2x32xf32, #tpu.memory_space<vmem>>, vector<2x32xf32>
    tpu.vector_store %arg18[%c0_193, %c0_194], %398 {strides = array<i32>} : memref<2x32xf32, #tpu.memory_space<vmem>>, vector<2x32xf32>,
    %400 = vector.shape_cast %391 : vector<2x1xi1> to vector<2x1xi1>
    %401 = vector.broadcast %400 : vector<2x1xi1> to vector<2x32xi1>
    %402 = arith.select %401, %387, %352 : vector<2x32xi1>, vector<2x32xf32>
    %c0_195 = arith.constant 0 : index
    %c0_196 = arith.constant 0 : index
    %403 = vector.load %arg19[%c0_195, %c0_196] : memref<2x32xf32, #tpu.memory_space<vmem>>, vector<2x32xf32>
    tpu.vector_store %arg19[%c0_195, %c0_196], %402 {strides = array<i32>} : memref<2x32xf32, #tpu.memory_space<vmem>>, vector<2x32xf32>,
    %404 = vector.shape_cast %391 : vector<2x1xi1> to vector<2x1xi1>
    %405 = vector.broadcast %404 : vector<2x1xi1> to vector<2x32xi1>
    %406 = arith.select %405, %385, %353 : vector<2x32xi1>, vector<2x32xf32>
    %c0_197 = arith.constant 0 : index
    %c0_198 = arith.constant 0 : index
    %407 = vector.load %arg20[%c0_197, %c0_198] : memref<2x32xf32, #tpu.memory_space<vmem>>, vector<2x32xf32>
    tpu.vector_store %arg20[%c0_197, %c0_198], %406 {strides = array<i32>} : memref<2x32xf32, #tpu.memory_space<vmem>>, vector<2x32xf32>,
    %cst_199 = arith.constant 0.000000e+00 : f32
    %408 = vector.broadcast %cst_199 : f32 to vector<2x32xf32>
    %409 = vector.shape_cast %389 : vector<2x1xi1> to vector<2x1xi1>
    %410 = vector.broadcast %409 : vector<2x1xi1> to vector<2x32xi1>
    %411 = arith.select %410, %372, %408 : vector<2x32xi1>, vector<2x32xf32>
    %cst_200 = arith.constant 0.000000e+00 : f32
    %412 = vector.broadcast %cst_200 : f32 to vector<2x32xf32>
    %413 = vector.shape_cast %391 : vector<2x1xi1> to vector<2x1xi1>
    %414 = vector.broadcast %413 : vector<2x1xi1> to vector<2x32xi1>
    %415 = arith.select %414, %387, %412 : vector<2x32xi1>, vector<2x32xf32>
    %416 = vector.extract_strided_slice %411 {offsets = [0, 0], sizes = [1, 32], strides = [1, 1]} : vector<2x32xf32> to vector<1x32xf32>
    %c4_201 = arith.constant 4 : index
    %c0_202 = arith.constant 0 : index
    %417 = vector.load %arg15[%c4_201, %c0_202] : memref<16x32xf32, #tpu.memory_space<vmem>>, vector<1x32xf32>
    tpu.vector_store %arg15[%c4_201, %c0_202], %416 {strides = array<i32>} : memref<16x32xf32, #tpu.memory_space<vmem>>, vector<1x32xf32>,
    %418 = vector.extract_strided_slice %415 {offsets = [0, 0], sizes = [1, 32], strides = [1, 1]} : vector<2x32xf32> to vector<1x32xf32>
    %c3_203 = arith.constant 3 : index
    %c0_204 = arith.constant 0 : index
    %419 = vector.load %arg16[%c3_203, %c0_204] : memref<16x32xf32, #tpu.memory_space<vmem>>, vector<1x32xf32>
    tpu.vector_store %arg16[%c3_203, %c0_204], %418 {strides = array<i32>} : memref<16x32xf32, #tpu.memory_space<vmem>>, vector<1x32xf32>,
    %420 = vector.extract_strided_slice %411 {offsets = [1, 0], sizes = [1, 32], strides = [1, 1]} : vector<2x32xf32> to vector<1x32xf32>
    %c12_205 = arith.constant 12 : index
    %c0_206 = arith.constant 0 : index
    %421 = vector.load %arg15[%c12_205, %c0_206] : memref<16x32xf32, #tpu.memory_space<vmem>>, vector<1x32xf32>
    tpu.vector_store %arg15[%c12_205, %c0_206], %420 {strides = array<i32>} : memref<16x32xf32, #tpu.memory_space<vmem>>, vector<1x32xf32>,
    %422 = vector.extract_strided_slice %415 {offsets = [1, 0], sizes = [1, 32], strides = [1, 1]} : vector<2x32xf32> to vector<1x32xf32>
    %c11_207 = arith.constant 11 : index
    %c0_208 = arith.constant 0 : index
    %423 = vector.load %arg16[%c11_207, %c0_208] : memref<16x32xf32, #tpu.memory_space<vmem>>, vector<1x32xf32>
    tpu.vector_store %arg16[%c11_207, %c0_208], %422 {strides = array<i32>} : memref<16x32xf32, #tpu.memory_space<vmem>>, vector<1x32xf32>,
    %c5_209 = arith.constant 5 : index
    %c0_210 = arith.constant 0 : index
    %424 = vector.load %arg13[%c5_209, %c0_210] : memref<16x128xf32, #tpu.memory_space<vmem>>, vector<1x128xf32>
    %c13_211 = arith.constant 13 : index
    %c0_212 = arith.constant 0 : index
    %425 = vector.load %arg13[%c13_211, %c0_212] : memref<16x128xf32, #tpu.memory_space<vmem>>, vector<1x128xf32>
    %426 = tpu.concatenate %424, %425 in 0 : vector<1x128xf32>, vector<1x128xf32> -> vector<2x128xf32>
    %c2_213 = arith.constant 2 : index
    %c0_214 = arith.constant 0 : index
    %427 = vector.load %arg14[%c2_213, %c0_214] : memref<16x128xf32, #tpu.memory_space<vmem>>, vector<1x128xf32>
    %c10_215 = arith.constant 10 : index
    %c0_216 = arith.constant 0 : index
    %428 = vector.load %arg14[%c10_215, %c0_216] : memref<16x128xf32, #tpu.memory_space<vmem>>, vector<1x128xf32>
    %429 = tpu.concatenate %427, %428 in 0 : vector<1x128xf32>, vector<1x128xf32> -> vector<2x128xf32>
    %c0_217 = arith.constant 0 : index
    %c0_218 = arith.constant 0 : index
    %430 = vector.load %arg17[%c0_217, %c0_218] : memref<2x32xf32, #tpu.memory_space<vmem>>, vector<2x32xf32>
    %c0_219 = arith.constant 0 : index
    %c0_220 = arith.constant 0 : index
    %431 = vector.load %arg18[%c0_219, %c0_220] : memref<2x32xf32, #tpu.memory_space<vmem>>, vector<2x32xf32>
    %c0_221 = arith.constant 0 : index
    %c0_222 = arith.constant 0 : index
    %432 = vector.load %arg19[%c0_221, %c0_222] : memref<2x32xf32, #tpu.memory_space<vmem>>, vector<2x32xf32>
    %c0_223 = arith.constant 0 : index
    %c0_224 = arith.constant 0 : index
    %433 = vector.load %arg20[%c0_223, %c0_224] : memref<2x32xf32, #tpu.memory_space<vmem>>, vector<2x32xf32>
    %cst_225 = arith.constant dense<0.000000e+00> : vector<2x128xf32>
    %434 = tpu.matmul %430, %22, %cst_225 {dimension_numbers = #tpu.dot_dimension_numbers<[1], [0], [0], [1], [0, 0, 1, 1], [], []>} : vector<2x32xf32>, vector<32x128xf32>, vector<2x128xf32> -> vector<2x128xf32>
    %435 = arith.addf %426, %434 : vector<2x128xf32>
    %cst_226 = arith.constant dense<0.000000e+00> : vector<2x128xf32>
    %436 = tpu.matmul %432, %23, %cst_226 {dimension_numbers = #tpu.dot_dimension_numbers<[1], [0], [0], [1], [0, 0, 1, 1], [], []>} : vector<2x32xf32>, vector<32x128xf32>, vector<2x128xf32> -> vector<2x128xf32>
    %437 = arith.addf %429, %436 : vector<2x128xf32>
    %438 = arith.negf %435 : vector<2x128xf32>
    %439 = math.exp %438 : vector<2x128xf32>
    %cst_227 = arith.constant 1.000000e+00 : f32
    %440 = vector.broadcast %cst_227 : f32 to vector<2x128xf32>
    %441 = arith.addf %440, %439 : vector<2x128xf32>
    %442 = arith.divf %440, %441 : vector<2x128xf32>
    %443 = vector.extract_strided_slice %442 {offsets = [0, 0], sizes = [2, 32], strides = [1, 1]} : vector<2x128xf32> to vector<2x32xf32>
    %444 = vector.extract_strided_slice %442 {offsets = [0, 32], sizes = [2, 32], strides = [1, 1]} : vector<2x128xf32> to vector<2x32xf32>
    %445 = vector.extract_strided_slice %442 {offsets = [0, 96], sizes = [2, 32], strides = [1, 1]} : vector<2x128xf32> to vector<2x32xf32>
    %446 = vector.extract_strided_slice %435 {offsets = [0, 64], sizes = [2, 32], strides = [1, 1]} : vector<2x128xf32> to vector<2x32xf32>
    %447 = math.tanh %446 : vector<2x32xf32>
    %448 = arith.mulf %444, %431 : vector<2x32xf32>
    %449 = arith.mulf %443, %447 : vector<2x32xf32>
    %450 = arith.addf %448, %449 : vector<2x32xf32>
    %451 = math.tanh %450 : vector<2x32xf32>
    %452 = arith.mulf %445, %451 : vector<2x32xf32>
    %453 = arith.negf %437 : vector<2x128xf32>
    %454 = math.exp %453 : vector<2x128xf32>
    %cst_228 = arith.constant 1.000000e+00 : f32
    %455 = vector.broadcast %cst_228 : f32 to vector<2x128xf32>
    %456 = arith.addf %455, %454 : vector<2x128xf32>
    %457 = arith.divf %455, %456 : vector<2x128xf32>
    %458 = vector.extract_strided_slice %457 {offsets = [0, 0], sizes = [2, 32], strides = [1, 1]} : vector<2x128xf32> to vector<2x32xf32>
    %459 = vector.extract_strided_slice %457 {offsets = [0, 32], sizes = [2, 32], strides = [1, 1]} : vector<2x128xf32> to vector<2x32xf32>
    %460 = vector.extract_strided_slice %457 {offsets = [0, 96], sizes = [2, 32], strides = [1, 1]} : vector<2x128xf32> to vector<2x32xf32>
    %461 = vector.extract_strided_slice %437 {offsets = [0, 64], sizes = [2, 32], strides = [1, 1]} : vector<2x128xf32> to vector<2x32xf32>
    %462 = math.tanh %461 : vector<2x32xf32>
    %463 = arith.mulf %459, %433 : vector<2x32xf32>
    %464 = arith.mulf %458, %462 : vector<2x32xf32>
    %465 = arith.addf %463, %464 : vector<2x32xf32>
    %466 = math.tanh %465 : vector<2x32xf32>
    %467 = arith.mulf %460, %466 : vector<2x32xf32>
    %c5_i32_229 = arith.constant 5 : i32
    %468 = vector.broadcast %c5_i32_229 : i32 to vector<2x1xi32>
    %469 = arith.cmpi sgt, %21, %468 : vector<2x1xi32>
    %c2_i32_230 = arith.constant 2 : i32
    %470 = vector.broadcast %c2_i32_230 : i32 to vector<2x1xi32>
    %471 = arith.cmpi sgt, %21, %470 : vector<2x1xi32>
    %472 = vector.shape_cast %469 : vector<2x1xi1> to vector<2x1xi1>
    %473 = vector.broadcast %472 : vector<2x1xi1> to vector<2x32xi1>
    %474 = arith.select %473, %452, %430 : vector<2x32xi1>, vector<2x32xf32>
    %c0_231 = arith.constant 0 : index
    %c0_232 = arith.constant 0 : index
    %475 = vector.load %arg17[%c0_231, %c0_232] : memref<2x32xf32, #tpu.memory_space<vmem>>, vector<2x32xf32>
    tpu.vector_store %arg17[%c0_231, %c0_232], %474 {strides = array<i32>} : memref<2x32xf32, #tpu.memory_space<vmem>>, vector<2x32xf32>,
    %476 = vector.shape_cast %469 : vector<2x1xi1> to vector<2x1xi1>
    %477 = vector.broadcast %476 : vector<2x1xi1> to vector<2x32xi1>
    %478 = arith.select %477, %450, %431 : vector<2x32xi1>, vector<2x32xf32>
    %c0_233 = arith.constant 0 : index
    %c0_234 = arith.constant 0 : index
    %479 = vector.load %arg18[%c0_233, %c0_234] : memref<2x32xf32, #tpu.memory_space<vmem>>, vector<2x32xf32>
    tpu.vector_store %arg18[%c0_233, %c0_234], %478 {strides = array<i32>} : memref<2x32xf32, #tpu.memory_space<vmem>>, vector<2x32xf32>,
    %480 = vector.shape_cast %471 : vector<2x1xi1> to vector<2x1xi1>
    %481 = vector.broadcast %480 : vector<2x1xi1> to vector<2x32xi1>
    %482 = arith.select %481, %467, %432 : vector<2x32xi1>, vector<2x32xf32>
    %c0_235 = arith.constant 0 : index
    %c0_236 = arith.constant 0 : index
    %483 = vector.load %arg19[%c0_235, %c0_236] : memref<2x32xf32, #tpu.memory_space<vmem>>, vector<2x32xf32>
    tpu.vector_store %arg19[%c0_235, %c0_236], %482 {strides = array<i32>} : memref<2x32xf32, #tpu.memory_space<vmem>>, vector<2x32xf32>,
    %484 = vector.shape_cast %471 : vector<2x1xi1> to vector<2x1xi1>
    %485 = vector.broadcast %484 : vector<2x1xi1> to vector<2x32xi1>
    %486 = arith.select %485, %465, %433 : vector<2x32xi1>, vector<2x32xf32>
    %c0_237 = arith.constant 0 : index
    %c0_238 = arith.constant 0 : index
    %487 = vector.load %arg20[%c0_237, %c0_238] : memref<2x32xf32, #tpu.memory_space<vmem>>, vector<2x32xf32>
    tpu.vector_store %arg20[%c0_237, %c0_238], %486 {strides = array<i32>} : memref<2x32xf32, #tpu.memory_space<vmem>>, vector<2x32xf32>,
    %cst_239 = arith.constant 0.000000e+00 : f32
    %488 = vector.broadcast %cst_239 : f32 to vector<2x32xf32>
    %489 = vector.shape_cast %469 : vector<2x1xi1> to vector<2x1xi1>
    %490 = vector.broadcast %489 : vector<2x1xi1> to vector<2x32xi1>
    %491 = arith.select %490, %452, %488 : vector<2x32xi1>, vector<2x32xf32>
    %cst_240 = arith.constant 0.000000e+00 : f32
    %492 = vector.broadcast %cst_240 : f32 to vector<2x32xf32>
    %493 = vector.shape_cast %471 : vector<2x1xi1> to vector<2x1xi1>
    %494 = vector.broadcast %493 : vector<2x1xi1> to vector<2x32xi1>
    %495 = arith.select %494, %467, %492 : vector<2x32xi1>, vector<2x32xf32>
    %496 = vector.extract_strided_slice %491 {offsets = [0, 0], sizes = [1, 32], strides = [1, 1]} : vector<2x32xf32> to vector<1x32xf32>
    %c5_241 = arith.constant 5 : index
    %c0_242 = arith.constant 0 : index
    %497 = vector.load %arg15[%c5_241, %c0_242] : memref<16x32xf32, #tpu.memory_space<vmem>>, vector<1x32xf32>
    tpu.vector_store %arg15[%c5_241, %c0_242], %496 {strides = array<i32>} : memref<16x32xf32, #tpu.memory_space<vmem>>, vector<1x32xf32>,
    %498 = vector.extract_strided_slice %495 {offsets = [0, 0], sizes = [1, 32], strides = [1, 1]} : vector<2x32xf32> to vector<1x32xf32>
    %c2_243 = arith.constant 2 : index
    %c0_244 = arith.constant 0 : index
    %499 = vector.load %arg16[%c2_243, %c0_244] : memref<16x32xf32, #tpu.memory_space<vmem>>, vector<1x32xf32>
    tpu.vector_store %arg16[%c2_243, %c0_244], %498 {strides = array<i32>} : memref<16x32xf32, #tpu.memory_space<vmem>>, vector<1x32xf32>,
    %500 = vector.extract_strided_slice %491 {offsets = [1, 0], sizes = [1, 32], strides = [1, 1]} : vector<2x32xf32> to vector<1x32xf32>
    %c13_245 = arith.constant 13 : index
    %c0_246 = arith.constant 0 : index
    %501 = vector.load %arg15[%c13_245, %c0_246] : memref<16x32xf32, #tpu.memory_space<vmem>>, vector<1x32xf32>
    tpu.vector_store %arg15[%c13_245, %c0_246], %500 {strides = array<i32>} : memref<16x32xf32, #tpu.memory_space<vmem>>, vector<1x32xf32>,
    %502 = vector.extract_strided_slice %495 {offsets = [1, 0], sizes = [1, 32], strides = [1, 1]} : vector<2x32xf32> to vector<1x32xf32>
    %c10_247 = arith.constant 10 : index
    %c0_248 = arith.constant 0 : index
    %503 = vector.load %arg16[%c10_247, %c0_248] : memref<16x32xf32, #tpu.memory_space<vmem>>, vector<1x32xf32>
    tpu.vector_store %arg16[%c10_247, %c0_248], %502 {strides = array<i32>} : memref<16x32xf32, #tpu.memory_space<vmem>>, vector<1x32xf32>,
    %c6_249 = arith.constant 6 : index
    %c0_250 = arith.constant 0 : index
    %504 = vector.load %arg13[%c6_249, %c0_250] : memref<16x128xf32, #tpu.memory_space<vmem>>, vector<1x128xf32>
    %c14_251 = arith.constant 14 : index
    %c0_252 = arith.constant 0 : index
    %505 = vector.load %arg13[%c14_251, %c0_252] : memref<16x128xf32, #tpu.memory_space<vmem>>, vector<1x128xf32>
    %506 = tpu.concatenate %504, %505 in 0 : vector<1x128xf32>, vector<1x128xf32> -> vector<2x128xf32>
    %c1_253 = arith.constant 1 : index
    %c0_254 = arith.constant 0 : index
    %507 = vector.load %arg14[%c1_253, %c0_254] : memref<16x128xf32, #tpu.memory_space<vmem>>, vector<1x128xf32>
    %c9_255 = arith.constant 9 : index
    %c0_256 = arith.constant 0 : index
    %508 = vector.load %arg14[%c9_255, %c0_256] : memref<16x128xf32, #tpu.memory_space<vmem>>, vector<1x128xf32>
    %509 = tpu.concatenate %507, %508 in 0 : vector<1x128xf32>, vector<1x128xf32> -> vector<2x128xf32>
    %c0_257 = arith.constant 0 : index
    %c0_258 = arith.constant 0 : index
    %510 = vector.load %arg17[%c0_257, %c0_258] : memref<2x32xf32, #tpu.memory_space<vmem>>, vector<2x32xf32>
    %c0_259 = arith.constant 0 : index
    %c0_260 = arith.constant 0 : index
    %511 = vector.load %arg18[%c0_259, %c0_260] : memref<2x32xf32, #tpu.memory_space<vmem>>, vector<2x32xf32>
    %c0_261 = arith.constant 0 : index
    %c0_262 = arith.constant 0 : index
    %512 = vector.load %arg19[%c0_261, %c0_262] : memref<2x32xf32, #tpu.memory_space<vmem>>, vector<2x32xf32>
    %c0_263 = arith.constant 0 : index
    %c0_264 = arith.constant 0 : index
    %513 = vector.load %arg20[%c0_263, %c0_264] : memref<2x32xf32, #tpu.memory_space<vmem>>, vector<2x32xf32>
    %cst_265 = arith.constant dense<0.000000e+00> : vector<2x128xf32>
    %514 = tpu.matmul %510, %22, %cst_265 {dimension_numbers = #tpu.dot_dimension_numbers<[1], [0], [0], [1], [0, 0, 1, 1], [], []>} : vector<2x32xf32>, vector<32x128xf32>, vector<2x128xf32> -> vector<2x128xf32>
    %515 = arith.addf %506, %514 : vector<2x128xf32>
    %cst_266 = arith.constant dense<0.000000e+00> : vector<2x128xf32>
    %516 = tpu.matmul %512, %23, %cst_266 {dimension_numbers = #tpu.dot_dimension_numbers<[1], [0], [0], [1], [0, 0, 1, 1], [], []>} : vector<2x32xf32>, vector<32x128xf32>, vector<2x128xf32> -> vector<2x128xf32>
    %517 = arith.addf %509, %516 : vector<2x128xf32>
    %518 = arith.negf %515 : vector<2x128xf32>
    %519 = math.exp %518 : vector<2x128xf32>
    %cst_267 = arith.constant 1.000000e+00 : f32
    %520 = vector.broadcast %cst_267 : f32 to vector<2x128xf32>
    %521 = arith.addf %520, %519 : vector<2x128xf32>
    %522 = arith.divf %520, %521 : vector<2x128xf32>
    %523 = vector.extract_strided_slice %522 {offsets = [0, 0], sizes = [2, 32], strides = [1, 1]} : vector<2x128xf32> to vector<2x32xf32>
    %524 = vector.extract_strided_slice %522 {offsets = [0, 32], sizes = [2, 32], strides = [1, 1]} : vector<2x128xf32> to vector<2x32xf32>
    %525 = vector.extract_strided_slice %522 {offsets = [0, 96], sizes = [2, 32], strides = [1, 1]} : vector<2x128xf32> to vector<2x32xf32>
    %526 = vector.extract_strided_slice %515 {offsets = [0, 64], sizes = [2, 32], strides = [1, 1]} : vector<2x128xf32> to vector<2x32xf32>
    %527 = math.tanh %526 : vector<2x32xf32>
    %528 = arith.mulf %524, %511 : vector<2x32xf32>
    %529 = arith.mulf %523, %527 : vector<2x32xf32>
    %530 = arith.addf %528, %529 : vector<2x32xf32>
    %531 = math.tanh %530 : vector<2x32xf32>
    %532 = arith.mulf %525, %531 : vector<2x32xf32>
    %533 = arith.negf %517 : vector<2x128xf32>
    %534 = math.exp %533 : vector<2x128xf32>
    %cst_268 = arith.constant 1.000000e+00 : f32
    %535 = vector.broadcast %cst_268 : f32 to vector<2x128xf32>
    %536 = arith.addf %535, %534 : vector<2x128xf32>
    %537 = arith.divf %535, %536 : vector<2x128xf32>
    %538 = vector.extract_strided_slice %537 {offsets = [0, 0], sizes = [2, 32], strides = [1, 1]} : vector<2x128xf32> to vector<2x32xf32>
    %539 = vector.extract_strided_slice %537 {offsets = [0, 32], sizes = [2, 32], strides = [1, 1]} : vector<2x128xf32> to vector<2x32xf32>
    %540 = vector.extract_strided_slice %537 {offsets = [0, 96], sizes = [2, 32], strides = [1, 1]} : vector<2x128xf32> to vector<2x32xf32>
    %541 = vector.extract_strided_slice %517 {offsets = [0, 64], sizes = [2, 32], strides = [1, 1]} : vector<2x128xf32> to vector<2x32xf32>
    %542 = math.tanh %541 : vector<2x32xf32>
    %543 = arith.mulf %539, %513 : vector<2x32xf32>
    %544 = arith.mulf %538, %542 : vector<2x32xf32>
    %545 = arith.addf %543, %544 : vector<2x32xf32>
    %546 = math.tanh %545 : vector<2x32xf32>
    %547 = arith.mulf %540, %546 : vector<2x32xf32>
    %c6_i32_269 = arith.constant 6 : i32
    %548 = vector.broadcast %c6_i32_269 : i32 to vector<2x1xi32>
    %549 = arith.cmpi sgt, %21, %548 : vector<2x1xi32>
    %c1_i32_270 = arith.constant 1 : i32
    %550 = vector.broadcast %c1_i32_270 : i32 to vector<2x1xi32>
    %551 = arith.cmpi sgt, %21, %550 : vector<2x1xi32>
    %552 = vector.shape_cast %549 : vector<2x1xi1> to vector<2x1xi1>
    %553 = vector.broadcast %552 : vector<2x1xi1> to vector<2x32xi1>
    %554 = arith.select %553, %532, %510 : vector<2x32xi1>, vector<2x32xf32>
    %c0_271 = arith.constant 0 : index
    %c0_272 = arith.constant 0 : index
    %555 = vector.load %arg17[%c0_271, %c0_272] : memref<2x32xf32, #tpu.memory_space<vmem>>, vector<2x32xf32>
    tpu.vector_store %arg17[%c0_271, %c0_272], %554 {strides = array<i32>} : memref<2x32xf32, #tpu.memory_space<vmem>>, vector<2x32xf32>,
    %556 = vector.shape_cast %549 : vector<2x1xi1> to vector<2x1xi1>
    %557 = vector.broadcast %556 : vector<2x1xi1> to vector<2x32xi1>
    %558 = arith.select %557, %530, %511 : vector<2x32xi1>, vector<2x32xf32>
    %c0_273 = arith.constant 0 : index
    %c0_274 = arith.constant 0 : index
    %559 = vector.load %arg18[%c0_273, %c0_274] : memref<2x32xf32, #tpu.memory_space<vmem>>, vector<2x32xf32>
    tpu.vector_store %arg18[%c0_273, %c0_274], %558 {strides = array<i32>} : memref<2x32xf32, #tpu.memory_space<vmem>>, vector<2x32xf32>,
    %560 = vector.shape_cast %551 : vector<2x1xi1> to vector<2x1xi1>
    %561 = vector.broadcast %560 : vector<2x1xi1> to vector<2x32xi1>
    %562 = arith.select %561, %547, %512 : vector<2x32xi1>, vector<2x32xf32>
    %c0_275 = arith.constant 0 : index
    %c0_276 = arith.constant 0 : index
    %563 = vector.load %arg19[%c0_275, %c0_276] : memref<2x32xf32, #tpu.memory_space<vmem>>, vector<2x32xf32>
    tpu.vector_store %arg19[%c0_275, %c0_276], %562 {strides = array<i32>} : memref<2x32xf32, #tpu.memory_space<vmem>>, vector<2x32xf32>,
    %564 = vector.shape_cast %551 : vector<2x1xi1> to vector<2x1xi1>
    %565 = vector.broadcast %564 : vector<2x1xi1> to vector<2x32xi1>
    %566 = arith.select %565, %545, %513 : vector<2x32xi1>, vector<2x32xf32>
    %c0_277 = arith.constant 0 : index
    %c0_278 = arith.constant 0 : index
    %567 = vector.load %arg20[%c0_277, %c0_278] : memref<2x32xf32, #tpu.memory_space<vmem>>, vector<2x32xf32>
    tpu.vector_store %arg20[%c0_277, %c0_278], %566 {strides = array<i32>} : memref<2x32xf32, #tpu.memory_space<vmem>>, vector<2x32xf32>,
    %cst_279 = arith.constant 0.000000e+00 : f32
    %568 = vector.broadcast %cst_279 : f32 to vector<2x32xf32>
    %569 = vector.shape_cast %549 : vector<2x1xi1> to vector<2x1xi1>
    %570 = vector.broadcast %569 : vector<2x1xi1> to vector<2x32xi1>
    %571 = arith.select %570, %532, %568 : vector<2x32xi1>, vector<2x32xf32>
    %cst_280 = arith.constant 0.000000e+00 : f32
    %572 = vector.broadcast %cst_280 : f32 to vector<2x32xf32>
    %573 = vector.shape_cast %551 : vector<2x1xi1> to vector<2x1xi1>
    %574 = vector.broadcast %573 : vector<2x1xi1> to vector<2x32xi1>
    %575 = arith.select %574, %547, %572 : vector<2x32xi1>, vector<2x32xf32>
    %576 = vector.extract_strided_slice %571 {offsets = [0, 0], sizes = [1, 32], strides = [1, 1]} : vector<2x32xf32> to vector<1x32xf32>
    %c6_281 = arith.constant 6 : index
    %c0_282 = arith.constant 0 : index
    %577 = vector.load %arg15[%c6_281, %c0_282] : memref<16x32xf32, #tpu.memory_space<vmem>>, vector<1x32xf32>
    tpu.vector_store %arg15[%c6_281, %c0_282], %576 {strides = array<i32>} : memref<16x32xf32, #tpu.memory_space<vmem>>, vector<1x32xf32>,
    %578 = vector.extract_strided_slice %575 {offsets = [0, 0], sizes = [1, 32], strides = [1, 1]} : vector<2x32xf32> to vector<1x32xf32>
    %c1_283 = arith.constant 1 : index
    %c0_284 = arith.constant 0 : index
    %579 = vector.load %arg16[%c1_283, %c0_284] : memref<16x32xf32, #tpu.memory_space<vmem>>, vector<1x32xf32>
    tpu.vector_store %arg16[%c1_283, %c0_284], %578 {strides = array<i32>} : memref<16x32xf32, #tpu.memory_space<vmem>>, vector<1x32xf32>,
    %580 = vector.extract_strided_slice %571 {offsets = [1, 0], sizes = [1, 32], strides = [1, 1]} : vector<2x32xf32> to vector<1x32xf32>
    %c14_285 = arith.constant 14 : index
    %c0_286 = arith.constant 0 : index
    %581 = vector.load %arg15[%c14_285, %c0_286] : memref<16x32xf32, #tpu.memory_space<vmem>>, vector<1x32xf32>
    tpu.vector_store %arg15[%c14_285, %c0_286], %580 {strides = array<i32>} : memref<16x32xf32, #tpu.memory_space<vmem>>, vector<1x32xf32>,
    %582 = vector.extract_strided_slice %575 {offsets = [1, 0], sizes = [1, 32], strides = [1, 1]} : vector<2x32xf32> to vector<1x32xf32>
    %c9_287 = arith.constant 9 : index
    %c0_288 = arith.constant 0 : index
    %583 = vector.load %arg16[%c9_287, %c0_288] : memref<16x32xf32, #tpu.memory_space<vmem>>, vector<1x32xf32>
    tpu.vector_store %arg16[%c9_287, %c0_288], %582 {strides = array<i32>} : memref<16x32xf32, #tpu.memory_space<vmem>>, vector<1x32xf32>,
    %c7_289 = arith.constant 7 : index
    %c0_290 = arith.constant 0 : index
    %584 = vector.load %arg13[%c7_289, %c0_290] : memref<16x128xf32, #tpu.memory_space<vmem>>, vector<1x128xf32>
    %c15_291 = arith.constant 15 : index
    %c0_292 = arith.constant 0 : index
    %585 = vector.load %arg13[%c15_291, %c0_292] : memref<16x128xf32, #tpu.memory_space<vmem>>, vector<1x128xf32>
    %586 = tpu.concatenate %584, %585 in 0 : vector<1x128xf32>, vector<1x128xf32> -> vector<2x128xf32>
    %c0_293 = arith.constant 0 : index
    %c0_294 = arith.constant 0 : index
    %587 = vector.load %arg14[%c0_293, %c0_294] : memref<16x128xf32, #tpu.memory_space<vmem>>, vector<1x128xf32>
    %c8_295 = arith.constant 8 : index
    %c0_296 = arith.constant 0 : index
    %588 = vector.load %arg14[%c8_295, %c0_296] : memref<16x128xf32, #tpu.memory_space<vmem>>, vector<1x128xf32>
    %589 = tpu.concatenate %587, %588 in 0 : vector<1x128xf32>, vector<1x128xf32> -> vector<2x128xf32>
    %c0_297 = arith.constant 0 : index
    %c0_298 = arith.constant 0 : index
    %590 = vector.load %arg17[%c0_297, %c0_298] : memref<2x32xf32, #tpu.memory_space<vmem>>, vector<2x32xf32>
    %c0_299 = arith.constant 0 : index
    %c0_300 = arith.constant 0 : index
    %591 = vector.load %arg18[%c0_299, %c0_300] : memref<2x32xf32, #tpu.memory_space<vmem>>, vector<2x32xf32>
    %c0_301 = arith.constant 0 : index
    %c0_302 = arith.constant 0 : index
    %592 = vector.load %arg19[%c0_301, %c0_302] : memref<2x32xf32, #tpu.memory_space<vmem>>, vector<2x32xf32>
    %c0_303 = arith.constant 0 : index
    %c0_304 = arith.constant 0 : index
    %593 = vector.load %arg20[%c0_303, %c0_304] : memref<2x32xf32, #tpu.memory_space<vmem>>, vector<2x32xf32>
    %cst_305 = arith.constant dense<0.000000e+00> : vector<2x128xf32>
    %594 = tpu.matmul %590, %22, %cst_305 {dimension_numbers = #tpu.dot_dimension_numbers<[1], [0], [0], [1], [0, 0, 1, 1], [], []>} : vector<2x32xf32>, vector<32x128xf32>, vector<2x128xf32> -> vector<2x128xf32>
    %595 = arith.addf %586, %594 : vector<2x128xf32>
    %cst_306 = arith.constant dense<0.000000e+00> : vector<2x128xf32>
    %596 = tpu.matmul %592, %23, %cst_306 {dimension_numbers = #tpu.dot_dimension_numbers<[1], [0], [0], [1], [0, 0, 1, 1], [], []>} : vector<2x32xf32>, vector<32x128xf32>, vector<2x128xf32> -> vector<2x128xf32>
    %597 = arith.addf %589, %596 : vector<2x128xf32>
    %598 = arith.negf %595 : vector<2x128xf32>
    %599 = math.exp %598 : vector<2x128xf32>
    %cst_307 = arith.constant 1.000000e+00 : f32
    %600 = vector.broadcast %cst_307 : f32 to vector<2x128xf32>
    %601 = arith.addf %600, %599 : vector<2x128xf32>
    %602 = arith.divf %600, %601 : vector<2x128xf32>
    %603 = vector.extract_strided_slice %602 {offsets = [0, 0], sizes = [2, 32], strides = [1, 1]} : vector<2x128xf32> to vector<2x32xf32>
    %604 = vector.extract_strided_slice %602 {offsets = [0, 32], sizes = [2, 32], strides = [1, 1]} : vector<2x128xf32> to vector<2x32xf32>
    %605 = vector.extract_strided_slice %602 {offsets = [0, 96], sizes = [2, 32], strides = [1, 1]} : vector<2x128xf32> to vector<2x32xf32>
    %606 = vector.extract_strided_slice %595 {offsets = [0, 64], sizes = [2, 32], strides = [1, 1]} : vector<2x128xf32> to vector<2x32xf32>
    %607 = math.tanh %606 : vector<2x32xf32>
    %608 = arith.mulf %604, %591 : vector<2x32xf32>
    %609 = arith.mulf %603, %607 : vector<2x32xf32>
    %610 = arith.addf %608, %609 : vector<2x32xf32>
    %611 = math.tanh %610 : vector<2x32xf32>
    %612 = arith.mulf %605, %611 : vector<2x32xf32>
    %613 = arith.negf %597 : vector<2x128xf32>
    %614 = math.exp %613 : vector<2x128xf32>
    %cst_308 = arith.constant 1.000000e+00 : f32
    %615 = vector.broadcast %cst_308 : f32 to vector<2x128xf32>
    %616 = arith.addf %615, %614 : vector<2x128xf32>
    %617 = arith.divf %615, %616 : vector<2x128xf32>
    %618 = vector.extract_strided_slice %617 {offsets = [0, 0], sizes = [2, 32], strides = [1, 1]} : vector<2x128xf32> to vector<2x32xf32>
    %619 = vector.extract_strided_slice %617 {offsets = [0, 32], sizes = [2, 32], strides = [1, 1]} : vector<2x128xf32> to vector<2x32xf32>
    %620 = vector.extract_strided_slice %617 {offsets = [0, 96], sizes = [2, 32], strides = [1, 1]} : vector<2x128xf32> to vector<2x32xf32>
    %621 = vector.extract_strided_slice %597 {offsets = [0, 64], sizes = [2, 32], strides = [1, 1]} : vector<2x128xf32> to vector<2x32xf32>
    %622 = math.tanh %621 : vector<2x32xf32>
    %623 = arith.mulf %619, %593 : vector<2x32xf32>
    %624 = arith.mulf %618, %622 : vector<2x32xf32>
    %625 = arith.addf %623, %624 : vector<2x32xf32>
    %626 = math.tanh %625 : vector<2x32xf32>
    %627 = arith.mulf %620, %626 : vector<2x32xf32>
    %c7_i32_309 = arith.constant 7 : i32
    %628 = vector.broadcast %c7_i32_309 : i32 to vector<2x1xi32>
    %629 = arith.cmpi sgt, %21, %628 : vector<2x1xi32>
    %c0_i32_310 = arith.constant 0 : i32
    %630 = vector.broadcast %c0_i32_310 : i32 to vector<2x1xi32>
    %631 = arith.cmpi sgt, %21, %630 : vector<2x1xi32>
    %632 = vector.shape_cast %629 : vector<2x1xi1> to vector<2x1xi1>
    %633 = vector.broadcast %632 : vector<2x1xi1> to vector<2x32xi1>
    %634 = arith.select %633, %612, %590 : vector<2x32xi1>, vector<2x32xf32>
    %c0_311 = arith.constant 0 : index
    %c0_312 = arith.constant 0 : index
    %635 = vector.load %arg17[%c0_311, %c0_312] : memref<2x32xf32, #tpu.memory_space<vmem>>, vector<2x32xf32>
    tpu.vector_store %arg17[%c0_311, %c0_312], %634 {strides = array<i32>} : memref<2x32xf32, #tpu.memory_space<vmem>>, vector<2x32xf32>,
    %636 = vector.shape_cast %629 : vector<2x1xi1> to vector<2x1xi1>
    %637 = vector.broadcast %636 : vector<2x1xi1> to vector<2x32xi1>
    %638 = arith.select %637, %610, %591 : vector<2x32xi1>, vector<2x32xf32>
    %c0_313 = arith.constant 0 : index
    %c0_314 = arith.constant 0 : index
    %639 = vector.load %arg18[%c0_313, %c0_314] : memref<2x32xf32, #tpu.memory_space<vmem>>, vector<2x32xf32>
    tpu.vector_store %arg18[%c0_313, %c0_314], %638 {strides = array<i32>} : memref<2x32xf32, #tpu.memory_space<vmem>>, vector<2x32xf32>,
    %640 = vector.shape_cast %631 : vector<2x1xi1> to vector<2x1xi1>
    %641 = vector.broadcast %640 : vector<2x1xi1> to vector<2x32xi1>
    %642 = arith.select %641, %627, %592 : vector<2x32xi1>, vector<2x32xf32>
    %c0_315 = arith.constant 0 : index
    %c0_316 = arith.constant 0 : index
    %643 = vector.load %arg19[%c0_315, %c0_316] : memref<2x32xf32, #tpu.memory_space<vmem>>, vector<2x32xf32>
    tpu.vector_store %arg19[%c0_315, %c0_316], %642 {strides = array<i32>} : memref<2x32xf32, #tpu.memory_space<vmem>>, vector<2x32xf32>,
    %644 = vector.shape_cast %631 : vector<2x1xi1> to vector<2x1xi1>
    %645 = vector.broadcast %644 : vector<2x1xi1> to vector<2x32xi1>
    %646 = arith.select %645, %625, %593 : vector<2x32xi1>, vector<2x32xf32>
    %c0_317 = arith.constant 0 : index
    %c0_318 = arith.constant 0 : index
    %647 = vector.load %arg20[%c0_317, %c0_318] : memref<2x32xf32, #tpu.memory_space<vmem>>, vector<2x32xf32>
    tpu.vector_store %arg20[%c0_317, %c0_318], %646 {strides = array<i32>} : memref<2x32xf32, #tpu.memory_space<vmem>>, vector<2x32xf32>,
    %cst_319 = arith.constant 0.000000e+00 : f32
    %648 = vector.broadcast %cst_319 : f32 to vector<2x32xf32>
    %649 = vector.shape_cast %629 : vector<2x1xi1> to vector<2x1xi1>
    %650 = vector.broadcast %649 : vector<2x1xi1> to vector<2x32xi1>
    %651 = arith.select %650, %612, %648 : vector<2x32xi1>, vector<2x32xf32>
    %cst_320 = arith.constant 0.000000e+00 : f32
    %652 = vector.broadcast %cst_320 : f32 to vector<2x32xf32>
    %653 = vector.shape_cast %631 : vector<2x1xi1> to vector<2x1xi1>
    %654 = vector.broadcast %653 : vector<2x1xi1> to vector<2x32xi1>
    %655 = arith.select %654, %627, %652 : vector<2x32xi1>, vector<2x32xf32>
    %656 = vector.extract_strided_slice %651 {offsets = [0, 0], sizes = [1, 32], strides = [1, 1]} : vector<2x32xf32> to vector<1x32xf32>
    %c7_321 = arith.constant 7 : index
    %c0_322 = arith.constant 0 : index
    %657 = vector.load %arg15[%c7_321, %c0_322] : memref<16x32xf32, #tpu.memory_space<vmem>>, vector<1x32xf32>
    tpu.vector_store %arg15[%c7_321, %c0_322], %656 {strides = array<i32>} : memref<16x32xf32, #tpu.memory_space<vmem>>, vector<1x32xf32>,
    %658 = vector.extract_strided_slice %655 {offsets = [0, 0], sizes = [1, 32], strides = [1, 1]} : vector<2x32xf32> to vector<1x32xf32>
    %c0_323 = arith.constant 0 : index
    %c0_324 = arith.constant 0 : index
    %659 = vector.load %arg16[%c0_323, %c0_324] : memref<16x32xf32, #tpu.memory_space<vmem>>, vector<1x32xf32>
    tpu.vector_store %arg16[%c0_323, %c0_324], %658 {strides = array<i32>} : memref<16x32xf32, #tpu.memory_space<vmem>>, vector<1x32xf32>,
    %660 = vector.extract_strided_slice %651 {offsets = [1, 0], sizes = [1, 32], strides = [1, 1]} : vector<2x32xf32> to vector<1x32xf32>
    %c15_325 = arith.constant 15 : index
    %c0_326 = arith.constant 0 : index
    %661 = vector.load %arg15[%c15_325, %c0_326] : memref<16x32xf32, #tpu.memory_space<vmem>>, vector<1x32xf32>
    tpu.vector_store %arg15[%c15_325, %c0_326], %660 {strides = array<i32>} : memref<16x32xf32, #tpu.memory_space<vmem>>, vector<1x32xf32>,
    %662 = vector.extract_strided_slice %655 {offsets = [1, 0], sizes = [1, 32], strides = [1, 1]} : vector<2x32xf32> to vector<1x32xf32>
    %c8_327 = arith.constant 8 : index
    %c0_328 = arith.constant 0 : index
    %663 = vector.load %arg16[%c8_327, %c0_328] : memref<16x32xf32, #tpu.memory_space<vmem>>, vector<1x32xf32>
    tpu.vector_store %arg16[%c8_327, %c0_328], %662 {strides = array<i32>} : memref<16x32xf32, #tpu.memory_space<vmem>>, vector<1x32xf32>,
    %c0_329 = arith.constant 0 : index
    %c0_330 = arith.constant 0 : index
    %664 = vector.load %arg17[%c0_329, %c0_330] : memref<2x32xf32, #tpu.memory_space<vmem>>, vector<2x32xf32>
    %c0_331 = arith.constant 0 : index
    %c0_332 = arith.constant 0 : index
    %c0_333 = arith.constant 0 : index
    %665 = vector.load %arg11[%c0_331, %c0_332, %c0_333] : memref<2x2x32xf32, #tpu.memory_space<vmem>>, vector<1x2x32xf32>
    %666 = vector.shape_cast %665 : vector<1x2x32xf32> to vector<2x32xf32>
    %667 = vector.shape_cast %664 : vector<2x32xf32> to vector<1x2x32xf32>
    tpu.vector_store %arg11[%c0_331, %c0_332, %c0_333], %667 {strides = array<i32>} : memref<2x2x32xf32, #tpu.memory_space<vmem>>, vector<1x2x32xf32>,
    %c0_334 = arith.constant 0 : index
    %c0_335 = arith.constant 0 : index
    %668 = vector.load %arg19[%c0_334, %c0_335] : memref<2x32xf32, #tpu.memory_space<vmem>>, vector<2x32xf32>
    %c1_336 = arith.constant 1 : index
    %c0_337 = arith.constant 0 : index
    %c0_338 = arith.constant 0 : index
    %669 = vector.load %arg11[%c1_336, %c0_337, %c0_338] : memref<2x2x32xf32, #tpu.memory_space<vmem>>, vector<1x2x32xf32>
    %670 = vector.shape_cast %669 : vector<1x2x32xf32> to vector<2x32xf32>
    %671 = vector.shape_cast %668 : vector<2x32xf32> to vector<1x2x32xf32>
    tpu.vector_store %arg11[%c1_336, %c0_337, %c0_338], %671 {strides = array<i32>} : memref<2x2x32xf32, #tpu.memory_space<vmem>>, vector<1x2x32xf32>,
    %c0_339 = arith.constant 0 : index
    %c0_340 = arith.constant 0 : index
    %672 = vector.load %arg18[%c0_339, %c0_340] : memref<2x32xf32, #tpu.memory_space<vmem>>, vector<2x32xf32>
    %c0_341 = arith.constant 0 : index
    %c0_342 = arith.constant 0 : index
    %c0_343 = arith.constant 0 : index
    %673 = vector.load %arg12[%c0_341, %c0_342, %c0_343] : memref<2x2x32xf32, #tpu.memory_space<vmem>>, vector<1x2x32xf32>
    %674 = vector.shape_cast %673 : vector<1x2x32xf32> to vector<2x32xf32>
    %675 = vector.shape_cast %672 : vector<2x32xf32> to vector<1x2x32xf32>
    tpu.vector_store %arg12[%c0_341, %c0_342, %c0_343], %675 {strides = array<i32>} : memref<2x2x32xf32, #tpu.memory_space<vmem>>, vector<1x2x32xf32>,
    %c0_344 = arith.constant 0 : index
    %c0_345 = arith.constant 0 : index
    %676 = vector.load %arg20[%c0_344, %c0_345] : memref<2x32xf32, #tpu.memory_space<vmem>>, vector<2x32xf32>
    %c1_346 = arith.constant 1 : index
    %c0_347 = arith.constant 0 : index
    %c0_348 = arith.constant 0 : index
    %677 = vector.load %arg12[%c1_346, %c0_347, %c0_348] : memref<2x2x32xf32, #tpu.memory_space<vmem>>, vector<1x2x32xf32>
    %678 = vector.shape_cast %677 : vector<1x2x32xf32> to vector<2x32xf32>
    %679 = vector.shape_cast %676 : vector<2x32xf32> to vector<1x2x32xf32>
    tpu.vector_store %arg12[%c1_346, %c0_347, %c0_348], %679 {strides = array<i32>} : memref<2x2x32xf32, #tpu.memory_space<vmem>>, vector<1x2x32xf32>,
    %c0_349 = arith.constant 0 : index
    %c0_350 = arith.constant 0 : index
    %680 = vector.load %arg15[%c0_349, %c0_350] : memref<16x32xf32, #tpu.memory_space<vmem>>, vector<16x32xf32>
    %c0_351 = arith.constant 0 : index
    %c0_352 = arith.constant 0 : index
    %681 = vector.load %arg16[%c0_351, %c0_352] : memref<16x32xf32, #tpu.memory_space<vmem>>, vector<16x32xf32>
    %682 = tpu.concatenate %680, %681 in 1 : vector<16x32xf32>, vector<16x32xf32> -> vector<16x64xf32>
    %c0_353 = arith.constant 0 : index
    %c0_354 = arith.constant 0 : index
    %683 = vector.load %arg9[%c0_353, %c0_354] : memref<64x64xf32, #tpu.memory_space<vmem>>, vector<64x64xf32>
    %cst_355 = arith.constant dense<0.000000e+00> : vector<16x64xf32>
    %684 = tpu.matmul %682, %683, %cst_355 {dimension_numbers = #tpu.dot_dimension_numbers<[1], [0], [0], [1], [0, 0, 1, 1], [], []>} : vector<16x64xf32>, vector<64x64xf32>, vector<16x64xf32> -> vector<16x64xf32>
    %685 = tpu.concatenate %682, %684 in 1 : vector<16x64xf32>, vector<16x64xf32> -> vector<16x128xf32>
    %c0_356 = arith.constant 0 : index
    %c0_357 = arith.constant 0 : index
    %686 = vector.load %arg10[%c0_356, %c0_357] : memref<16x128xf32, #tpu.memory_space<vmem>>, vector<16x128xf32>
    tpu.vector_store %arg10[%c0_356, %c0_357], %685 {strides = array<i32>} : memref<16x128xf32, #tpu.memory_space<vmem>>, vector<16x128xf32>,
    return
  }
  func.func @transform_0(%arg0: i32) -> (i32, i32) {
    %c0_i32 = arith.constant 0 : i32
    %c0_i32_0 = arith.constant 0 : i32
    %c0_i32_1 = arith.constant 0 : i32
    return %c0_i32, %c0_i32_0 : i32, i32
  }
  func.func @transform_1(%arg0: i32) -> (i32, i32) {
    %c0_i32 = arith.constant 0 : i32
    %c0_i32_0 = arith.constant 0 : i32
    %c0_i32_1 = arith.constant 0 : i32
    return %c0_i32, %c0_i32_0 : i32, i32
  }
  func.func @transform_2(%arg0: i32) -> (i32, i32) {
    %c0_i32 = arith.constant 0 : i32
    %c0_i32_0 = arith.constant 0 : i32
    %c0_i32_1 = arith.constant 0 : i32
    return %c0_i32, %c0_i32_0 : i32, i32
  }
  func.func @transform_3(%arg0: i32) -> (i32, i32) {
    %c0_i32 = arith.constant 0 : i32
    %c0_i32_0 = arith.constant 0 : i32
    %c0_i32_1 = arith.constant 0 : i32
    return %c0_i32, %c0_i32_0 : i32, i32
  }
  func.func @transform_4(%arg0: i32) -> (i32, i32) {
    %c0_i32 = arith.constant 0 : i32
    %c0_i32_0 = arith.constant 0 : i32
    %c0_i32_1 = arith.constant 0 : i32
    return %c0_i32, %c0_i32_0 : i32, i32
  }
  func.func @transform_5(%arg0: i32) -> (i32, i32) {
    %c0_i32 = arith.constant 0 : i32
    %c0_i32_0 = arith.constant 0 : i32
    %c0_i32_1 = arith.constant 0 : i32
    return %c0_i32, %c0_i32_0 : i32, i32
  }
  func.func @transform_6(%arg0: i32) -> (i32, i32) {
    %c0_i32 = arith.constant 0 : i32
    %c0_i32_0 = arith.constant 0 : i32
    %c0_i32_1 = arith.constant 0 : i32
    return %c0_i32, %c0_i32_0 : i32, i32
  }
  func.func @transform_7(%arg0: i32) -> (i32, i32) {
    %c0_i32 = arith.constant 0 : i32
    %c0_i32_0 = arith.constant 0 : i32
    %c0_i32_1 = arith.constant 0 : i32
    return %c0_i32, %c0_i32_0 : i32, i32
  }
  func.func @transform_8(%arg0: i32) -> (i32, i32) {
    %c0_i32 = arith.constant 0 : i32
    %c0_i32_0 = arith.constant 0 : i32
    %c0_i32_1 = arith.constant 0 : i32
    return %c0_i32, %c0_i32_0 : i32, i32
  }
  func.func @transform_9(%arg0: i32) -> (i32, i32) {
    %c0_i32 = arith.constant 0 : i32
    %c0_i32_0 = arith.constant 0 : i32
    %c0_i32_1 = arith.constant 0 : i32
    return %c0_i32, %c0_i32_0 : i32, i32
  }
  func.func @transform_10(%arg0: i32) -> (i32, i32, i32) {
    %c0_i32 = arith.constant 0 : i32
    %c0_i32_0 = arith.constant 0 : i32
    %c0_i32_1 = arith.constant 0 : i32
    %c0_i32_2 = arith.constant 0 : i32
    return %c0_i32, %c0_i32_0, %c0_i32_1 : i32, i32, i32
  }
  func.func @transform_11(%arg0: i32) -> (i32, i32, i32) {
    %c0_i32 = arith.constant 0 : i32
    %c0_i32_0 = arith.constant 0 : i32
    %c0_i32_1 = arith.constant 0 : i32
    %c0_i32_2 = arith.constant 0 : i32
    return %c0_i32, %c0_i32_0, %c0_i32_1 : i32, i32, i32
  }
}

</mosaic_0001>

<bundles_post_ra>
// kernel: encoder_forward.2
= control target key start
LH: loop header
LB: loop body
LE: loop exit
PB: predicated region body
PF: predicated region fallthrough
CT: control target
= control target key end

     0   :  { %vm75_vm0 = vcmask 261120   ;;  %s4407_s0 = inlined_call_operand.vmem [shape: f32[2,8,32], index: 0, kind: input, shape index: {}]   ;;  %s4408_s1 = inlined_call_operand.vmem [shape: f32[2,2,8,8], index: 1, kind: input, shape index: {}]   ;;  %s4409_s2 = inlined_call_operand.vmem [shape: f32[16,1], index: 2, kind: input, shape index: {}]   ;;  %s4410_s3 = inlined_call_operand.vmem [shape: f32[2,32,64], index: 3, kind: input, shape index: {}]   ;;  %s4411_s4 = inlined_call_operand.vmem [shape: f32[2,1,64], index: 4, kind: input, shape index: {}]   ;;  %s4412_s5 = inlined_call_operand.vmem [shape: f32[2,32,96], index: 5, kind: input, shape index: {}]   ;;  %s4413_s6 = inlined_call_operand.vmem [shape: f32[2,32,64], index: 6, kind: input, shape index: {}]   ;;  %s4414_s7 = inlined_call_operand.vmem [shape: f32[2,32,32], index: 7, kind: input, shape index: {}]   ;;  %s4415_s8 = inlined_call_operand.vmem [shape: f32[2,1,96], index: 8, kind: input, shape index: {}]   ;;  %s4416_s9 = inlined_call_operand.vmem [shape: f32[32,64], index: 9, kind: input, shape index: {}]   ;;  %s4417_s10 = inlined_call_operand.vmem [shape: f32[64,64], index: 10, kind: input, shape index: {}]   ;;  %s4418_s11 = inlined_call_operand.vmem [shape: f32[16,128], index: 11, kind: output, shape index: {0}]   ;;  %s4419_s12 = inlined_call_operand.hbm [shape: f32[2,32], index: 12, kind: output, shape index: {1}]   ;;  %s4420_s13 = inlined_call_operand.vmem [shape: f32[16,32], index: 13, kind: output, shape index: {2}]  }
   0x1   :  { %v51_v0 = vld [vmem:[%s4410_s3] sm:$0xff]  ;;  %v52_v1 = vld [vmem:[%s4410_s3 + $0x8] sm:$0xff]  ;;  %v53_v2 = vld [vmem:[%s4410_s3 + $0x10] sm:$0xff] }
   0x2   :  { %v3852_v3 = vpack.c.bf16 %v52_v1, %v51_v0  ;;  %v54_v4 = vld [vmem:[%s4410_s3 + $0x18] sm:$0xff]  ;;  %v3860_v5 = vld [vmem:[%s4407_s0] sm:$0xff] }
   0x3   :  { %v3862_v6 = vpack.c.bf16 %v54_v4, %v53_v2  ;;  %3240 = vmatprep.mubr.msk.f32.mxu0 %vm75_vm0, %v3860_v5 }
   0x4   :  { %19 = vsyncpa [#allocation3], 0  ;;  %3519 = vmatprep.subr.bf16.mxu0 %v3852_v3  ;;  %v3873_v7 = vld [vmem:[%s4407_s0 + $0x8] sm:$0xff]  ;;  %v3766_v8 = vmov 0.0   ;;  %vm3767_vm1 = vmmov 0   ;;  %s3768_s0 = smov 96  }
   0x5   :  { %3521 = vmatpush3.bf16.msra.mxu0 %v3852_v3  ;;  %3248 = vmatprep.subr.mxu1 %v3766_v8  ;;  %v3886_v9 = vld [vmem:[%s4411_s4] ss:$0 sm:$0xff]  ;;  %v3895_v14 = vld [vmem:[%s4408_s1 + $0x18] sm:$0xff]  ;;  %vm161_vm2 = vcmask 64512   ;;  %v57_v17 = vld [vmem:[%s4412_s5 + $0x8] sm:$0xff]  ;;  %s3769_s28 = smov 32  }
   0x6   :  { %3523 = vmatprep.subr.bf16.mxu0 %v3862_v6  ;;  %3250 = vmatprep.mubr.msk.f32.mxu1 %vm3767_vm1, %v3766_v8  ;;  %v56_v16 = vld [vmem:[%s4412_s5] sm:$0xff]  ;;  %v61_v19 = vld [vmem:[%s4413_s6 + $0x8] sm:$0xff]  ;;  %v3917_v20 = vld [vmem:[%s4408_s1 + $0x10] sm:$0xff]  ;;  %s3770_s22 = smov 64   ;;  %vm1610_vm3 = vcmask 523520   ;;  %vm1627_vm4 = vcmask 1041409  }
   0x7   :  { %v60_v18 = vld [vmem:[%s4413_s6] sm:$0xff]  ;;  %v3925_v23 = vpack.c.bf16 %v57_v17, %v56_v16  ;;  %v3938_v25 = vld [vmem:[%s4408_s1 + $0x8] sm:$0xff]  ;;  %v58_v26 = vld [vmem:[%s4412_s5 + $0x10] sm:$0xff]  ;;  %vm1516_vm5 = vcmask 523264   ;;  %vm1632_vm6 = vcmask 254976  }
   0x8   :  { %v3922_v21 = vld [vmem:[%s4408_s1] sm:$0xff]  ;;  %v3927_v24 = vpack.c.bf16 %v61_v19, %v60_v18  ;;  %v59_v27 = vld [vmem:[%s4412_s5 + $0x18] sm:$0xff]  ;;  %v62_v29 = vld [vmem:[%s4413_s6 + $0x10] sm:$0xff] }
   0x9   :  { %3525 = vmatpush3.bf16.msra.mxu0 %v3862_v6  ;;  %v3954_v28 = vpack.c.bf16 %v59_v27, %v58_v26  ;;  %v63_v30 = vld [vmem:[%s4413_s6 + $0x18] sm:$0xff]  ;;  %v64_v41 = vld [vmem:[%s4414_s7] sm:$0xff]  ;;  %v65_v42 = vld [vmem:[%s4414_s7 + $0x8] sm:$0xff] }
   0xa   :  { %3243 = vmatprep.subr.mxu0 %v3766_v8  ;;  %v3962_v31 = vpack.c.bf16 %v63_v30, %v62_v29  ;;  %v3985_v43 = vpack.c.bf16 %v65_v42, %v64_v41  ;;  %v66_v44 = vld [vmem:[%s4414_s7 + $0x10] sm:$0xff]  ;;  %v67_v45 = vld [vmem:[%s4414_s7 + $0x18] sm:$0xff]  ;;  %v4003_v47 = vld [vmem:[%s4415_s8] ss:$0 sm:$0xff] }
   0xb   :  { %v3995_v46 = vpack.c.bf16 %v67_v45, %v66_v44 }
   0xc   :  { %3241 = vmatmul.mubr.msk.f32.vlgmr.msra.gmra.mrb[0].mxu0 %vm75_vm0, %v3873_v7 }
   0xd   :  { %3245 = vmatprep.mubr.msk.f32.mxu0 %vm3767_vm1, %v3766_v8 }
  0xdf   :  { %v3242_v10 = vpop.f32.mrb[0].mxu0 }
  0xe0   :  { %v154_v11 = vadd.f32 %v3242_v10, %v3886_v9  ;;  %v148_v12 = vpop.f32.mrb[1].mxu0 }
  0xe1   :  { %v149_v13 = vadd.f32 %v3886_v9, %v148_v12 }
  0xe2   :  { %236 = vrot.lane.b32.xlu0 %v154_v11, %s3768_s0 }
  0xe6   :  { %158 = vrot.lane.b32.xlu0 %v149_v13, %s3768_s0 }
  0xea   :  { %731 = vrot.lane.b32.xlu0 %v3860_v5, %s3769_s28 }
  0xee   :  { %733 = vrot.lane.b32.xlu0 %v3873_v7, %s3769_s28 }
 0x154   :  { %v237_v15 = vpop.permute.xlu0 %236 }
 0x155   :  { %3249 = vmatpush3.msra.mxu1 %v237_v15 }
 0x156   :  { %3251 = vmatmul.mubr.msk.f32.vlgmr.msra.gmra.mrb[0].mxu1 %vm161_vm2, %v3895_v14  ;;  %3253 = vmatprep.subr.mxu1 %v3766_v8 }
 0x157   :  { %3254 = vmatpush3.msra.mxu1 %v149_v13  ;;  %3255 = vmatprep.mubr.msk.f32.mxu1 %vm3767_vm1, %v3766_v8 }
 0x158   :  { %v159_v22 = vpop.permute.xlu0 %158  ;;  %3258 = vmatprep.subr.mxu1 %v3766_v8 }
 0x159   :  { %3244 = vmatpush3.msra.mxu0 %v159_v22 }
 0x15a   :  { %3246 = vmatmul.mubr.msk.f32.vlgmr.msra.gmra.mrb[2].mxu0 %vm161_vm2, %v3917_v20  ;;  %3256 = vmatmul.mubr.msk.f32.vlgmr.msra.gmra.mrb[2].mxu1 %vm161_vm2, %v3922_v21 }
 0x15b   :  { %3259 = vmatpush3.msra.mxu1 %v154_v11  ;;  %3260 = vmatprep.mubr.msk.f32.mxu1 %vm3767_vm1, %v3766_v8 }
 0x15c   :  { %3527 = vmatprep.subr.bf16.mxu0 %v3925_v23  ;;  %3535 = vmatprep.subr.bf16.mxu1 %v3927_v24  ;;  %v4017_v12 = vpop.permute.xlu0 %731 }
 0x15d   :  { %3529 = vmatpush3.bf16.msra.mxu0 %v3925_v23 }
 0x15e   :  { %3261 = vmatmul.mubr.msk.f32.vlgmr.msra.gmra.mrb[0].mxu1 %vm161_vm2, %v3938_v25  ;;  %3531 = vmatprep.subr.bf16.mxu0 %v3954_v28 }
 0x15f   :  { %3537 = vmatpush3.bf16.msra.mxu1 %v3927_v24  ;;  %3282 = vmatprep.mubr.msk.f32.mxu1 %vm75_vm0, %v3860_v5 }
 0x160   :  { %3539 = vmatprep.subr.bf16.mxu1 %v3962_v31  ;;  %v4020_v19 = vpop.permute.xlu0 %733 }
 0x161   :  { %3533 = vmatpush3.bf16.msra.mxu0 %v3954_v28 }
 0x162   :  { %3543 = vmatprep.subr.bf16.mxu0 %v3985_v43 }
 0x163   :  { %3541 = vmatpush3.bf16.msra.mxu1 %v3962_v31 }
 0x164   :  { %3551 = vmatprep.subr.bf16.mxu1 %v3852_v3 }
 0x166   :  { %3283 = vmatmul.mubr.msk.f32.vlgmr.msra.gmra.mrb[4].mxu1 %vm75_vm0, %v3873_v7 }
 0x167   :  { %3553 = vmatpush3.bf16.msra.mxu1 %v3852_v3 }
 0x168   :  { %3555 = vmatprep.subr.bf16.mxu1 %v3862_v6 }
 0x16b   :  { %3557 = vmatpush3.bf16.msra.mxu1 %v3862_v6 }
 0x16c   :  { %3559 = vmatprep.subr.bf16.mxu1 %v3925_v23 }
 0x22d   :  { %v231_v32 = vpop.f32.mrb[2].mxu0  ;;  %v381_v33 = vpop.f32.mrb[2].mxu1 }
 0x22e   :  { %v382_v34 = vadd.f32 %v381_v33, %v231_v32  ;;  %v3247_v35 = vpop.f32.mrb[3].mxu0  ;;  %v3257_v36 = vpop.f32.mrb[3].mxu1 }
 0x230   :  { %3271 = vmatprep.mubr.msk.f32.mxu0 %vm75_vm0, %v382_v34 }
 0x231   :  { %v454_v37 = vpop.f32.mrb[0].mxu1 }
 0x232   :  { %v3262_v38 = vpop.f32.mrb[1].mxu1  ;;  %3272 = vmatmul.mubr.msk.f32.vlgmr.msra.gmra.mrb[4].mxu0 %vm75_vm0, %v454_v37 }
 0x233   :  { %3545 = vmatpush3.bf16.msra.mxu0 %v3985_v43 }
 0x234   :  { %3547 = vmatprep.subr.bf16.mxu0 %v3995_v46 }
 0x237   :  { %3549 = vmatpush3.bf16.msra.mxu0 %v3995_v46 }
 0x238   :  { %3307 = vmatprep.subr.mxu0 %v3766_v8 }
 0x239   :  { %v3284_v39 = vpop.f32.mrb[4].mxu1 }
 0x23a   :  { %v611_v40 = vpop.f32.mrb[5].mxu1 }
 0x305   :  { %v3273_v48 = vpop.f32.mrb[4].mxu0 }
 0x306   :  { %v542_v49 = vadd.f32 %v3273_v48, %v4003_v47  ;;  %v536_v50 = vpop.f32.mrb[5].mxu0 }
 0x307   :  { %v537_v51 = vadd.f32 %v4003_v47, %v536_v50 }
 0x308   :  { %v621_v52 = vadd.f32 %v3284_v39, %v542_v49 }
 0x309   :  { %v620_v53 = vadd.f32 %v611_v40, %v537_v51 }
 0x30a   :  { %v3019_v54 = vmul.f32 -1.442695, %v621_v52 }
 0x30b   :  { %v3018_v55 = vmul.f32 -1.442695, %v620_v53 }
 0x30c   :  { %3694 = vpow2.f32 %v3019_v54 }
 0x30d   :  { %3696 = vpow2.f32 %v3018_v55 }
 0x316   :  { %v3695_v56 = vpop.eup %3694 }
 0x317   :  { %v3697_v57 = vpop.eup %3696  ;;  %v629_v58 = vadd.f32 1.0, %v3695_v56 }
 0x318   :  { %v628_v59 = vadd.f32 1.0, %v3697_v57  ;;  %v3771_v57 = vmov 0  }
 0x319   :  { %3698 = vrcp.f32 %v629_v58  ;;  %3692 = vset.pattern.permute.xlu0 %v3771_v57  ;;  %3693 = vset.pattern.permute.xlu1 %v3771_v57 }
 0x31a   :  { %3700 = vrcp.f32 %v628_v59 }
 0x323   :  { %v3699_v60 = vpop.eup %3698 }
 0x324   :  { %v3701_v61 = vpop.eup %3700  ;;  %v635_v63 = vmul.f32 %v3699_v60, %v3873_v7  ;;  %v730_v17 = vsub.f32 1.0, %v3699_v60 }
 0x325   :  { %v634_v62 = vmul.f32 %v3701_v61, %v3860_v5  ;;  %v729_v13 = vsub.f32 1.0, %v3701_v61 }
 0x326   :  { %v738_v27 = vmul.f32 %v4020_v19, %v730_v17  ;;  %v3041_v17 = vld [vmem:[%s4410_s3 + $0x28] sm:$0xff] }
 0x327   :  { %3293 = vmatprep.mubr.msk.f32.mxu0 %vm75_vm0, %v634_v62  ;;  %v737_v16 = vmul.f32 %v4017_v12, %v729_v13  ;;  %v1422_v13 = vld [vmem:[%s4416_s9 + $0x18] sm:$0xff] }
 0x328   :  { %3294 = vmatmul.mubr.msk.f32.vlgmr.msra.gmra.mrb[6].mxu0 %vm75_vm0, %v635_v63 }
 0x329   :  { %3309 = vmatprep.mubr.msk.f32.mxu0 %vm3767_vm1, %v3766_v8 }
 0x3fb   :  { %v3295_v0 = vpop.f32.mrb[6].mxu0 }
 0x3fc   :  { %v708_v1 = vpop.f32.mrb[7].mxu0 }
 0x3fd   :  { %719 = vrot.lane.b32.xlu1 %v708_v1, %s3770_s22 }
 0x401   :  { %721 = vrot.lane.b32.xlu1 %v3295_v0, %s3770_s22 }
 0x46f   :  { %v720_v2 = vpop.permute.xlu1 %719 }
 0x470   :  { %v725_v3 = vadd.f32 %v720_v2, %v537_v51 }
 0x472   :  { %3702 = vtanh.f32 %v725_v3  ;;  %v1419_v3 = vld [vmem:[%s4416_s9] sm:$0xff] }
 0x473   :  { %v722_v4 = vpop.permute.xlu1 %721 }
 0x474   :  { %v726_v6 = vadd.f32 %v722_v4, %v542_v49  ;;  %v1420_v4 = vld [vmem:[%s4416_s9 + $0x8] sm:$0xff] }
 0x476   :  { %3704 = vtanh.f32 %v726_v6  ;;  %v1421_v6 = vld [vmem:[%s4416_s9 + $0x10] sm:$0xff] }
 0x47c   :  { %v3703_v10 = vpop.eup %3702 }
 0x47d   :  { %741 = vrot.lane.b32.xlu1 %v3703_v10, %s3768_s0 }
 0x480   :  { %v3705_v11 = vpop.eup %3704 }
 0x481   :  { %743 = vrot.lane.b32.xlu1 %v3705_v11, %s3768_s0  ;;  %v3582_v11 = vpack.c.bf16 %v1420_v4, %v1419_v3 }
 0x4ef   :  { %v742_v15 = vpop.permute.xlu1 %741 }
 0x4f0   :  { %v747_v18 = vmul.f32 %v3701_v61, %v742_v15  ;;  %v44_v61 = vld [vmem:[%s4409_s2] sm:$0xff]  ;;  %v3586_v15 = vpack.c.bf16 %v1422_v13, %v1421_v6 }
 0x4f2   :  { %v4022_v22 = vadd.f32 %v747_v18, %v737_v16  ;;  %v3040_v16 = vld [vmem:[%s4410_s3 + $0x20] sm:$0xff] }
 0x4f3   :  { %v744_v26 = vpop.permute.xlu1 %743  ;;  %v4111_v18 = vpack.c.bf16 %v3041_v17, %v3040_v16  ;;  %v3045_v17 = vld [vmem:[%s4412_s5 + $0x20] sm:$0xff] }
 0x4f4   :  { %v748_v29 = vmul.f32 %v3699_v60, %v744_v26  ;;  %753 = vrot.lane.b32.xlu0 %v4022_v22, %s3768_s0  ;;  %v45_v60 = vld [vmem:[%s4409_s2 + $0x8] sm:$0xff] }
 0x4f6   :  { %v4027_v30 = vadd.f32 %v748_v29, %v738_v27 }
 0x4f8   :  { %755 = vrot.lane.b32.xlu1 %v4027_v30, %s3768_s0 }
 0x566   :  { %v4031_v32 = vpop.permute.xlu0 %753 }
 0x567   :  { %3304 = vmatprep.mubr.msk.f32.mxu1 %vm75_vm0, %v4031_v32 }
 0x56a   :  { %v4035_v33 = vpop.permute.xlu1 %755 }
 0x56b   :  { %3305 = vmatmul.mubr.msk.f32.vlgmr.msra.gmra.mrb[6].mxu1 %vm75_vm0, %v4035_v33 }
 0x56c   :  { %3561 = vmatpush3.bf16.msra.mxu1 %v3925_v23 }
 0x56d   :  { %3563 = vmatprep.subr.bf16.mxu1 %v3954_v28 }
 0x570   :  { %3565 = vmatpush3.bf16.msra.mxu1 %v3954_v28 }
 0x571   :  { %3567 = vmatprep.subr.bf16.mxu1 %v3927_v24 }
 0x63e   :  { %v3306_v34 = vpop.f32.mrb[6].mxu1 }
 0x63f   :  { %v833_v35 = vadd.f32 %v3306_v34, %v3886_v9  ;;  %v827_v36 = vpop.f32.mrb[7].mxu1 }
 0x640   :  { %v828_v37 = vadd.f32 %v3886_v9, %v827_v36 }
 0x641   :  { %911 = vrot.lane.b32.xlu1 %v833_v35, %s3768_s0 }
 0x642   :  { %837 = vrot.lane.b32.xlu0 %v828_v37, %s3768_s0 }
 0x6b3   :  { %v912_v39 = vpop.permute.xlu1 %911 }
 0x6b4   :  { %v838_v38 = vpop.permute.xlu0 %837 }
 0x6b5   :  { %3308 = vmatpush3.msra.mxu0 %v838_v38 }
 0x6b6   :  { %3310 = vmatmul.mubr.msk.f32.vlgmr.msra.gmra.mrb[8].mxu0 %vm161_vm2, %v3917_v20  ;;  %3312 = vmatprep.subr.mxu0 %v3766_v8 }
 0x6b7   :  { %3313 = vmatpush3.msra.mxu0 %v912_v39  ;;  %3314 = vmatprep.mubr.msk.f32.mxu0 %vm3767_vm1, %v3766_v8 }
 0x6b8   :  { %3317 = vmatprep.subr.mxu0 %v3766_v8 }
 0x6ba   :  { %3315 = vmatmul.mubr.msk.f32.vlgmr.msra.gmra.mrb[10].mxu0 %vm161_vm2, %v3895_v14 }
 0x6bb   :  { %3318 = vmatpush3.msra.mxu0 %v828_v37  ;;  %3319 = vmatprep.mubr.msk.f32.mxu0 %vm3767_vm1, %v3766_v8 }
 0x6bc   :  { %3322 = vmatprep.subr.mxu0 %v3766_v8 }
 0x6be   :  { %3320 = vmatmul.mubr.msk.f32.vlgmr.msra.gmra.mrb[8].mxu0 %vm161_vm2, %v3922_v21 }
 0x6bf   :  { %3323 = vmatpush3.msra.mxu0 %v833_v35  ;;  %3324 = vmatprep.mubr.msk.f32.mxu0 %vm3767_vm1, %v3766_v8 }
 0x6c0   :  { %3575 = vmatprep.subr.bf16.mxu0 %v3985_v43 }
 0x6c2   :  { %3325 = vmatmul.mubr.msk.f32.vlgmr.msra.gmra.mrb[10].mxu0 %vm161_vm2, %v3938_v25 }
 0x6c3   :  { %3577 = vmatpush3.bf16.msra.mxu0 %v3985_v43 }
 0x6c4   :  { %3579 = vmatprep.subr.bf16.mxu0 %v3995_v46 }
 0x6c7   :  { %3581 = vmatpush3.bf16.msra.mxu0 %v3995_v46 }
 0x791   :  { %v1050_v9 = vpop.f32.mrb[8].mxu0 }
 0x792   :  { %v3321_v23 = vpop.f32.mrb[9].mxu0  ;;  %3335 = vmatprep.mubr.msk.f32.mxu1 %vm75_vm0, %v1050_v9 }
 0x793   :  { %v1508_v23 = vld [vmem:[%s4417_s10] sm:$0xff] }
 0x795   :  { %v1120_v28 = vpop.f32.mrb[10].mxu0 }
 0x796   :  { %v3326_v40 = vpop.f32.mrb[11].mxu0  ;;  %3336 = vmatmul.mubr.msk.f32.vlgmr.msra.gmra.mrb[8].mxu1 %vm75_vm0, %v1120_v28  ;;  %v1509_v28 = vld [vmem:[%s4417_s10 + $0x8] sm:$0xff] }
 0x797   :  { %3569 = vmatpush3.bf16.msra.mxu1 %v3927_v24  ;;  %3346 = vmatprep.mubr.msk.f32.mxu1 %vm75_vm0, %v4031_v32 }
 0x798   :  { %3571 = vmatprep.subr.bf16.mxu1 %v3962_v31 }
 0x79b   :  { %3573 = vmatpush3.bf16.msra.mxu1 %v3962_v31 }
 0x79c   :  { %3583 = vmatprep.subr.bf16.mxu1 %v3582_v11 }
 0x79e   :  { %3347 = vmatmul.mubr.msk.f32.vlgmr.msra.gmra.mrb[10].mxu1 %vm75_vm0, %v4035_v33 }
 0x79f   :  { %3585 = vmatpush3.bf16.msra.mxu1 %v3582_v11 }
 0x7a0   :  { %3587 = vmatprep.subr.bf16.mxu1 %v3586_v15 }
 0x7a3   :  { %3589 = vmatpush3.bf16.msra.mxu1 %v3586_v15 }
 0x7a4   :  { %3607 = vmatprep.subr.bf16.mxu1 %v4111_v18 }
 0x869   :  { %v3337_v41 = vpop.f32.mrb[8].mxu1 }
 0x86a   :  { %v1196_v42 = vpop.f32.mrb[9].mxu1  ;;  %v1202_v43 = vadd.f32 %v3337_v41, %v4003_v47  ;;  %v3590_v41 = vpack.c.bf16 %v1509_v28, %v1508_v23 }
 0x86b   :  { %v1197_v44 = vadd.f32 %v4003_v47, %v1196_v42 }
 0x86c   :  { %3591 = vmatprep.subr.bf16.mxu0 %v3590_v41 }
 0x871   :  { %v3348_v45 = vpop.f32.mrb[10].mxu1 }
 0x872   :  { %v1281_v46 = vadd.f32 %v3348_v45, %v1202_v43  ;;  %v1271_v48 = vpop.f32.mrb[11].mxu1  ;;  %v1513_v45 = vld [vmem:[%s4417_s10 + $0x28] sm:$0xff] }
 0x873   :  { %v1280_v24 = vadd.f32 %v1271_v48, %v1197_v44 }
 0x874   :  { %v3033_v49 = vmul.f32 -1.442695, %v1281_v46 }
 0x875   :  { %v3032_v50 = vmul.f32 -1.442695, %v1280_v24 }
 0x876   :  { %3706 = vpow2.f32 %v3033_v49 }
 0x877   :  { %3708 = vpow2.f32 %v3032_v50 }
 0x880   :  { %v3707_v51 = vpop.eup %3706 }
 0x881   :  { %v3709_v52 = vpop.eup %3708  ;;  %v1289_v31 = vadd.f32 1.0, %v3707_v51 }
 0x882   :  { %v1288_v53 = vadd.f32 1.0, %v3709_v52  ;;  %v1514_v52 = vld [vmem:[%s4417_s10 + $0x30] sm:$0xff] }
 0x883   :  { %3710 = vrcp.f32 %v1289_v31  ;;  %v1515_v31 = vld [vmem:[%s4417_s10 + $0x38] sm:$0xff] }
 0x884   :  { %3712 = vrcp.f32 %v1288_v53 }
 0x88d   :  { %v3711_v54 = vpop.eup %3710 }
 0x88e   :  { %v3713_v55 = vpop.eup %3712  ;;  %v1297_v47 = vmul.f32 %v3711_v54, %v4035_v33  ;;  %v1392_v29 = vsub.f32 1.0, %v3711_v54 }
 0x88f   :  { %v1296_v56 = vmul.f32 %v3713_v55, %v4031_v32  ;;  %v1391_v32 = vsub.f32 1.0, %v3713_v55 }
 0x890   :  { %v1394_v34 = vmul.f32 %v1392_v29, %v4027_v30  ;;  %v1510_v30 = vld [vmem:[%s4417_s10 + $0x10] sm:$0xff]  ;;  %v3046_v29 = vld [vmem:[%s4412_s5 + $0x28] sm:$0xff] }
 0x891   :  { %3357 = vmatprep.mubr.msk.f32.mxu0 %vm75_vm0, %v1296_v56  ;;  %v1393_v37 = vmul.f32 %v1391_v32, %v4022_v22  ;;  %v1511_v22 = vld [vmem:[%s4417_s10 + $0x18] sm:$0xff]  ;;  %v3602_v56 = vpack.c.bf16 %v1515_v31, %v1514_v52  ;;  %v4285_v52 = vld [vmem:[%s4415_s8 + $0x1] ss:$0 sm:$0xff] }
 0x892   :  { %3358 = vmatmul.mubr.msk.f32.vlgmr.msra.gmra.mrb[12].mxu0 %vm75_vm0, %v1297_v47 }
 0x893   :  { %3593 = vmatpush3.bf16.msra.mxu0 %v3590_v41 }
 0x965   :  { %v3359_v58 = vpop.f32.mrb[12].mxu0 }
 0x966   :  { %1383 = vrot.lane.b32.xlu1 %v3359_v58, %s3770_s22  ;;  %v1370_v59 = vpop.f32.mrb[13].mxu0 }
 0x967   :  { %1381 = vrot.lane.b32.xlu0 %v1370_v59, %s3770_s22 }
 0x96a   :  { %1414 = vperm.xlu1 %3693, %v45_v60  }
 0x96b   :  { %1409 = vperm.xlu0 %3692, %v44_v61  }
 0x9d8   :  { %v1384_v62 = vpop.permute.xlu1 %1383 }
 0x9d9   :  { %v1388_v63 = vadd.f32 %v1384_v62, %v1202_v43  ;;  %v1382_v0 = vpop.permute.xlu0 %1381  ;;  %v3594_v43 = vpack.c.bf16 %v1511_v22, %v1510_v30  ;;  %v3051_v30 = vld [vmem:[%s4413_s6 + $0x30] sm:$0xff] }
 0x9da   :  { %v1387_v1 = vadd.f32 %v1382_v0, %v1197_v44  ;;  %v1512_v44 = vld [vmem:[%s4417_s10 + $0x20] sm:$0xff]  ;;  %v3043_v0 = vld [vmem:[%s4410_s3 + $0x38] sm:$0xff] }
 0x9db   :  { %3714 = vtanh.f32 %v1388_v63  ;;  %3595 = vmatprep.subr.bf16.mxu0 %v3594_v43  ;;  %v3598_v50 = vpack.c.bf16 %v1513_v45, %v1512_v44  ;;  %v3042_v63 = vld [vmem:[%s4410_s3 + $0x30] sm:$0xff] }
 0x9dc   :  { %3716 = vtanh.f32 %v1387_v1  ;;  %3597 = vmatpush3.bf16.msra.mxu0 %v3594_v43 }
 0x9dd   :  { %3599 = vmatprep.subr.bf16.mxu0 %v3598_v50 }
 0x9e0   :  { %3601 = vmatpush3.bf16.msra.mxu0 %v3598_v50  ;;  %v3056_v50 = vld [vmem:[%s4414_s7 + $0x38] sm:$0xff] }
 0x9e1   :  { %3603 = vmatprep.subr.bf16.mxu0 %v3602_v56 }
 0x9e4   :  { %3605 = vmatpush3.bf16.msra.mxu0 %v3602_v56 }
 0x9e5   :  { %v3715_v2 = vpop.eup %3714  ;;  %3406 = vmatprep.subr.mxu0 %v3766_v8 }
 0x9e6   :  { %v3717_v10 = vpop.eup %3716  ;;  %1399 = vrot.lane.b32.xlu0 %v3715_v2, %s3768_s0  ;;  %v4159_v2 = vpack.c.bf16 %v3043_v0, %v3042_v63 }
 0x9e7   :  { %1397 = vrot.lane.b32.xlu1 %v3717_v10, %s3768_s0  ;;  %v4186_v10 = vld [vmem:[%s4411_s4 + $0x1] ss:$0 sm:$0xff] }
 0x9e9   :  { %v4115_v27 = vpop.permute.xlu1 %1414 }
 0x9ea   :  { %v4113_v26 = vpop.permute.xlu0 %1409 }
 0xa58   :  { %v1400_v33 = vpop.permute.xlu0 %1399 }
 0xa59   :  { %v1404_v35 = vmul.f32 %v3711_v54, %v1400_v33  ;;  %v1398_v36 = vpop.permute.xlu1 %1397  ;;  %v3049_v33 = vld [vmem:[%s4413_s6 + $0x20] sm:$0xff] }
 0xa5a   :  { %v1403_v38 = vmul.f32 %v3713_v55, %v1398_v36  ;;  %v4206_v36 = vpack.c.bf16 %v3046_v29, %v3045_v17 }
 0xa5b   :  { %v1406_v39 = vadd.f32 %v1404_v35, %v1394_v34  ;;  %v3050_v34 = vld [vmem:[%s4413_s6 + $0x28] sm:$0xff] }
 0xa5c   :  { %v1405_v9 = vadd.f32 %v1403_v38, %v1393_v37  ;;  %v4211_v37 = vpack.c.bf16 %v3050_v34, %v3049_v33  ;;  %v3047_v38 = vld [vmem:[%s4412_s5 + $0x30] sm:$0xff] }
 0xa5d   :  { %v1418_v40 = vmul.f32 %v4115_v27, %v1406_v39  ;;  %v3048_v39 = vld [vmem:[%s4412_s5 + $0x38] sm:$0xff] }
 0xa5e   :  { %v1417_v42 = vmul.f32 %v4113_v26, %v1405_v9  ;;  %v4226_v9 = vpack.c.bf16 %v3048_v39, %v3047_v38 }
 0xa5f   :  { %1427 = vrot.lane.b32.xlu0 %v1418_v40, %s3768_s0  ;;  %v1618_v46 = vsel %vm1610_vm3, %v1418_v40, -inf  ;;  %v3052_v40 = vld [vmem:[%s4413_s6 + $0x38] sm:$0xff] }
 0xa60   :  { %v1619_v48 = vrot.slane %v1618_v46, 4  ;;  %1425 = vrot.lane.b32.xlu1 %v1417_v42, %s3768_s0  ;;  %v1611_v24 = vsel %vm1610_vm3, %v1417_v42, -inf  ;;  %v4248_v41 = vpack.c.bf16 %v3052_v40, %v3051_v30 }
 0xa61   :  { %v1612_v49 = vrot.slane %v1611_v24, 4 }
 0xa62   :  { %v1620_v51 = vmax.f32 %v1618_v46, %v1619_v48  ;;  %v3054_v48 = vld [vmem:[%s4414_s7 + $0x28] sm:$0xff] }
 0xa63   :  { %v1613_v53 = vmax.f32 %v1611_v24, %v1612_v49  ;;  %v3055_v24 = vld [vmem:[%s4414_s7 + $0x30] sm:$0xff] }
 0xa64   :  { %v1621_v54 = vrot.slane %v1620_v51, 2 }
 0xa65   :  { %v1614_v55 = vrot.slane %v1613_v53, 2 }
 0xa66   :  { %v1622_v47 = vmax.f32 %v1620_v51, %v1621_v54  ;;  %v4275_v51 = vpack.c.bf16 %v3056_v50, %v3055_v24 }
 0xa67   :  { %v1615_v57 = vmax.f32 %v1613_v53, %v1614_v55 }
 0xa68   :  { %v1623_v58 = vrot.slane %v1622_v47, 1 }
 0xa69   :  { %v1616_v59 = vrot.slane %v1615_v57, 1 }
 0xa6a   :  { %v1624_v60 = vmax.f32 %v1622_v47, %v1623_v58 }
 0xa6b   :  { %v1617_v61 = vmax.f32 %v1615_v57, %v1616_v59 }
 0xa6d   :  { %v4151_v62 = vsel %vm1627_vm4, %v1624_v60, %v1617_v61 }
 0xad1   :  { %v1428_v3 = vpop.permute.xlu0 %1427 }
 0xad2   :  { %v1426_v1 = vpop.permute.xlu1 %1425 }
 0xad3   :  { %3368 = vmatprep.mubr.msk.f32.mxu1 %vm75_vm0, %v1426_v1 }
 0xad4   :  { %3369 = vmatmul.mubr.msk.f32.vlgmr.msra.gmra.mrb[12].mxu1 %vm75_vm0, %v1428_v3 }
 0xad5   :  { %3609 = vmatpush3.bf16.msra.mxu1 %v4111_v18  ;;  %3398 = vmatprep.mubr.msk.f32.mxu1 %vm75_vm0, %v3860_v5 }
 0xad6   :  { %3611 = vmatprep.subr.bf16.mxu1 %v4159_v2 }
 0xad9   :  { %3613 = vmatpush3.bf16.msra.mxu1 %v4159_v2 }
 0xada   :  { %3401 = vmatprep.subr.mxu1 %v3766_v8 }
 0xadc   :  { %3399 = vmatmul.mubr.msk.f32.vlgmr.msra.gmra.mrb[14].mxu1 %vm75_vm0, %v3873_v7 }
 0xadd   :  { %3403 = vmatprep.mubr.msk.f32.mxu1 %vm3767_vm1, %v3766_v8 }
 0xba7   :  { %v4173_v4 = vpop.f32.mrb[12].mxu1 }
 0xba8   :  { %v4175_v6 = vpop.f32.mrb[13].mxu1 }
 0xba9   :  { %3387 = vmatprep.mubr.msk.f32.mxu0 %vm1516_vm5, %v4175_v6 }
 0xbaa   :  { %3388 = vmatmul.mubr.msk.f32.vlgmr.msra.gmra.mrb[14].mxu0 %vm1516_vm5, %v4173_v4 }
 0xbab   :  { %3408 = vmatprep.mubr.msk.f32.mxu0 %vm3767_vm1, %v3766_v8 }
 0xbaf   :  { %v3400_v11 = vpop.f32.mrb[14].mxu1 }
 0xbb0   :  { %v1736_v13 = vadd.f32 %v3400_v11, %v4186_v10  ;;  %v1730_v15 = vpop.f32.mrb[15].mxu1 }
 0xbb1   :  { %v1731_v16 = vadd.f32 %v4186_v10, %v1730_v15 }
 0xbb2   :  { %1814 = vrot.lane.b32.xlu0 %v1736_v13, %s3768_s0 }
 0xbb3   :  { %1740 = vrot.lane.b32.xlu1 %v1731_v16, %s3768_s0 }
 0xc24   :  { %v1815_v32 = vpop.permute.xlu0 %1814 }
 0xc25   :  { %v1741_v35 = vpop.permute.xlu1 %1740  ;;  %3407 = vmatpush3.msra.mxu0 %v1815_v32 }
 0xc26   :  { %3402 = vmatpush3.msra.mxu1 %v1741_v35  ;;  %3409 = vmatmul.mubr.msk.f32.vlgmr.msra.gmra.mrb[16].mxu0 %vm161_vm2, %v3895_v14 }
 0xc27   :  { %3416 = vmatprep.subr.mxu0 %v3766_v8  ;;  %3404 = vmatmul.mubr.msk.f32.vlgmr.msra.gmra.mrb[16].mxu1 %vm161_vm2, %v3917_v20 }
 0xc28   :  { %3411 = vmatprep.subr.mxu1 %v3766_v8  ;;  %3417 = vmatpush3.msra.mxu0 %v1736_v13 }
 0xc29   :  { %3412 = vmatpush3.msra.mxu1 %v1731_v16  ;;  %3418 = vmatprep.mubr.msk.f32.mxu0 %vm3767_vm1, %v3766_v8 }
 0xc2a   :  { %3413 = vmatprep.mubr.msk.f32.mxu1 %vm3767_vm1, %v3766_v8  ;;  %3615 = vmatprep.subr.bf16.mxu1 %v4206_v36 }
 0xc2b   :  { %3623 = vmatprep.subr.bf16.mxu0 %v4211_v37 }
 0xc2e   :  { %3419 = vmatmul.mubr.msk.f32.vlgmr.msra.gmra.mrb[16].mxu0 %vm161_vm2, %v3938_v25 }
 0xc2f   :  { %3414 = vmatmul.mubr.msk.f32.vlgmr.msra.gmra.mrb[16].mxu1 %vm161_vm2, %v3922_v21  ;;  %3625 = vmatpush3.bf16.msra.mxu0 %v4211_v37 }
 0xc30   :  { %3617 = vmatpush3.bf16.msra.mxu1 %v4206_v36  ;;  %3440 = vmatprep.mubr.msk.f32.mxu0 %vm75_vm0, %v3860_v5 }
 0xc31   :  { %3619 = vmatprep.subr.bf16.mxu1 %v4226_v9  ;;  %3627 = vmatprep.subr.bf16.mxu0 %v4248_v41 }
 0xc33   :  { %3629 = vmatpush3.bf16.msra.mxu0 %v4248_v41 }
 0xc34   :  { %3621 = vmatpush3.bf16.msra.mxu1 %v4226_v9  ;;  %3639 = vmatprep.subr.bf16.mxu0 %v4111_v18 }
 0xc36   :  { %3441 = vmatmul.mubr.msk.f32.vlgmr.msra.gmra.mrb[18].mxu0 %vm75_vm0, %v3873_v7 }
 0xc37   :  { %3641 = vmatpush3.bf16.msra.mxu0 %v4111_v18  ;;  %v3053_v18 = vld [vmem:[%s4414_s7 + $0x20] sm:$0xff]  ;;  %s3772_s7 = smov [#allocation2]  }
 0xc38   :  { %3643 = vmatprep.subr.bf16.mxu0 %v4159_v2  ;;  %v4270_v49 = vpack.c.bf16 %v3054_v48, %v3053_v18  ;;  %s2990_s8 = sshll.u32 %s3772_s7, 4  ;;  %s2991_s8 = int_to_ptr.vmem [resolvable:$true] %s2990_s8 }
 0xc39   :  { %s3742_s24 = scalar_lea.vmem %s2991_s8, 32  ;;  %p3747_p1 = scmp.lt.s32.totalorder %s2991_s8, %s2991_s8 }
 0xc3a   :  { %3631 = vmatprep.subr.bf16.mxu1 %v4270_v49  ;;  %p3743_p0 = scmp.ne.s32.totalorder %s2991_s8, %s3742_s24  ;;  %p3748_p2 = scmp.lt.s32.totalorder %s3742_s24, %s3742_s24 }
 0xc3b   :  { %3645 = vmatpush3.bf16.msra.mxu0 %v4159_v2 }
 0xc3c   :  { %3470 = vmatprep.subr.mxu0 %v3766_v8  ;;  %p3749_p3 = por %p3748_p2, %p3747_p1 }
 0xc3e   :  { %p3750_p4 = pnand %p3749_p3, %p3743_p0 }
 0xc7d   :  { %v4238_v23 = vpop.f32.mrb[14].mxu0 }
 0xc7e   :  { %v4240_v28 = vpop.f32.mrb[15].mxu0 }
 0xd01   :  { %v2023_v22 = vpop.f32.mrb[16].mxu0 }
 0xd02   :  { %v1953_v42 = vpop.f32.mrb[16].mxu1  ;;  %v3420_v43 = vpop.f32.mrb[17].mxu0 }
 0xd03   :  { %v3415_v44 = vpop.f32.mrb[17].mxu1  ;;  %3429 = vmatprep.mubr.msk.f32.mxu1 %vm75_vm0, %v1953_v42 }
 0xd04   :  { %3430 = vmatmul.mubr.msk.f32.vlgmr.msra.gmra.mrb[18].mxu1 %vm75_vm0, %v2023_v22 }
 0xd05   :  { %3633 = vmatpush3.bf16.msra.mxu1 %v4270_v49 }
 0xd06   :  { %3635 = vmatprep.subr.bf16.mxu1 %v4275_v51 }
 0xd09   :  { %v3442_v45 = vpop.f32.mrb[18].mxu0  ;;  %3637 = vmatpush3.bf16.msra.mxu1 %v4275_v51 }
 0xd0a   :  { %v2180_v46 = vpop.f32.mrb[19].mxu0  ;;  %3465 = vmatprep.subr.mxu1 %v3766_v8 }
 0xdd7   :  { %v3431_v31 = vpop.f32.mrb[18].mxu1 }
 0xdd8   :  { %v2111_v53 = vadd.f32 %v3431_v31, %v4285_v52  ;;  %v2105_v54 = vpop.f32.mrb[19].mxu1 }
 0xdd9   :  { %v2106_v55 = vadd.f32 %v4285_v52, %v2105_v54 }
 0xdda   :  { %v2190_v56 = vadd.f32 %v3442_v45, %v2111_v53 }
 0xddb   :  { %v2189_v47 = vadd.f32 %v2180_v46, %v2106_v55 }
 0xddc   :  { %v3071_v57 = vmul.f32 -1.442695, %v2190_v56 }
 0xddd   :  { %v3070_v58 = vmul.f32 -1.442695, %v2189_v47 }
 0xdde   :  { %3718 = vpow2.f32 %v3071_v57 }
 0xddf   :  { %3720 = vpow2.f32 %v3070_v58 }
 0xde8   :  { %v3719_v59 = vpop.eup %3718 }
 0xde9   :  { %v3721_v60 = vpop.eup %3720  ;;  %v2198_v61 = vadd.f32 1.0, %v3719_v59 }
 0xdea   :  { %v2197_v63 = vadd.f32 1.0, %v3721_v60 }
 0xdeb   :  { %3722 = vrcp.f32 %v2198_v61 }
 0xdec   :  { %3724 = vrcp.f32 %v2197_v63 }
 0xdf5   :  { %v3723_v0 = vpop.eup %3722 }
 0xdf6   :  { %v3725_v1 = vpop.eup %3724  ;;  %v2204_v3 = vmul.f32 %v3723_v0, %v3873_v7  ;;  %v2299_v32 = vsub.f32 1.0, %v3723_v0 }
 0xdf7   :  { %v2203_v2 = vmul.f32 %v3725_v1, %v3860_v5  ;;  %v2298_v33 = vsub.f32 1.0, %v3725_v1 }
 0xdf8   :  { %v2301_v35 = vmul.f32 %v2299_v32, %v4020_v19 }
 0xdf9   :  { %3451 = vmatprep.mubr.msk.f32.mxu1 %vm75_vm0, %v2203_v2  ;;  %v2300_v30 = vmul.f32 %v2298_v33, %v4017_v12 }
 0xdfa   :  { %3452 = vmatmul.mubr.msk.f32.vlgmr.msra.gmra.mrb[20].mxu1 %vm75_vm0, %v2204_v3 }
 0xdfb   :  { %3467 = vmatprep.mubr.msk.f32.mxu1 %vm3767_vm1, %v3766_v8 }
 0xecd   :  { %v3453_v11 = vpop.f32.mrb[20].mxu1 }
 0xece   :  { %2290 = vrot.lane.b32.xlu0 %v3453_v11, %s3770_s22  ;;  %v2277_v13 = vpop.f32.mrb[21].mxu1 }
 0xecf   :  { %2288 = vrot.lane.b32.xlu1 %v2277_v13, %s3770_s22 }
 0xf40   :  { %v2291_v15 = vpop.permute.xlu0 %2290 }
 0xf41   :  { %v2295_v16 = vadd.f32 %v2291_v15, %v2111_v53  ;;  %v2289_v17 = vpop.permute.xlu1 %2288 }
 0xf42   :  { %v2294_v29 = vadd.f32 %v2289_v17, %v2106_v55 }
 0xf43   :  { %3726 = vtanh.f32 %v2295_v16 }
 0xf44   :  { %3728 = vtanh.f32 %v2294_v29 }
 0xf4d   :  { %v3727_v5 = vpop.eup %3726 }
 0xf4e   :  { %v3729_v7 = vpop.eup %3728  ;;  %2306 = vrot.lane.b32.xlu0 %v3727_v5, %s3768_s0 }
 0xf4f   :  { %2304 = vrot.lane.b32.xlu1 %v3729_v7, %s3768_s0 }
 0xfc0   :  { %v2307_v34 = vpop.permute.xlu0 %2306 }
 0xfc1   :  { %v2311_v38 = vmul.f32 %v3723_v0, %v2307_v34  ;;  %v2305_v39 = vpop.permute.xlu1 %2304 }
 0xfc2   :  { %v2310_v40 = vmul.f32 %v3725_v1, %v2305_v39 }
 0xfc3   :  { %v4301_v22 = vadd.f32 %v2311_v38, %v2301_v35 }
 0xfc4   :  { %v4303_v42 = vadd.f32 %v2310_v40, %v2300_v30 }
 0xfc5   :  { %2318 = vrot.lane.b32.xlu0 %v4301_v22, %s3768_s0 }
 0xfc6   :  { %2316 = vrot.lane.b32.xlu1 %v4303_v42, %s3768_s0 }
0x1037   :  { %v4311_v44 = vpop.permute.xlu0 %2318 }
0x1038   :  { %v4309_v43 = vpop.permute.xlu1 %2316 }
0x1039   :  { %3462 = vmatprep.mubr.msk.f32.mxu0 %vm75_vm0, %v4309_v43 }
0x103a   :  { %3463 = vmatmul.mubr.msk.f32.vlgmr.msra.gmra.mrb[20].mxu0 %vm75_vm0, %v4311_v44 }
0x103b   :  { %3472 = vmatprep.mubr.msk.f32.mxu0 %vm3767_vm1, %v3766_v8 }
0x110d   :  { %v3464_v12 = vpop.f32.mrb[20].mxu0 }
0x110e   :  { %v2396_v19 = vadd.f32 %v3464_v12, %v4186_v10  ;;  %v2390_v45 = vpop.f32.mrb[21].mxu0 }
0x110f   :  { %v2391_v46 = vadd.f32 %v4186_v10, %v2390_v45 }
0x1110   :  { %2474 = vrot.lane.b32.xlu0 %v2396_v19, %s3768_s0 }
0x1111   :  { %2400 = vrot.lane.b32.xlu1 %v2391_v46, %s3768_s0 }
0x1182   :  { %v2475_v18 = vpop.permute.xlu0 %2474 }
0x1183   :  { %3471 = vmatpush3.msra.mxu0 %v2475_v18  ;;  %v2401_v48 = vpop.permute.xlu1 %2400 }
0x1184   :  { %3466 = vmatpush3.msra.mxu1 %v2401_v48  ;;  %3473 = vmatmul.mubr.msk.f32.vlgmr.msra.gmra.mrb[22].mxu0 %vm161_vm2, %v3895_v14 }
0x1185   :  { %3480 = vmatprep.subr.mxu0 %v3766_v8  ;;  %3468 = vmatmul.mubr.msk.f32.vlgmr.msra.gmra.mrb[22].mxu1 %vm161_vm2, %v3917_v20 }
0x1186   :  { %3475 = vmatprep.subr.mxu1 %v3766_v8  ;;  %3481 = vmatpush3.msra.mxu0 %v2396_v19 }
0x1187   :  { %3476 = vmatpush3.msra.mxu1 %v2391_v46  ;;  %3482 = vmatprep.mubr.msk.f32.mxu0 %vm3767_vm1, %v3766_v8 }
0x1188   :  { %3655 = vmatprep.subr.bf16.mxu0 %v4211_v37  ;;  %3477 = vmatprep.mubr.msk.f32.mxu1 %vm3767_vm1, %v3766_v8 }
0x1189   :  { %3647 = vmatprep.subr.bf16.mxu1 %v4206_v36 }
0x118c   :  { %3483 = vmatmul.mubr.msk.f32.vlgmr.msra.gmra.mrb[22].mxu0 %vm161_vm2, %v3938_v25 }
0x118d   :  { %3657 = vmatpush3.bf16.msra.mxu0 %v4211_v37  ;;  %3478 = vmatmul.mubr.msk.f32.vlgmr.msra.gmra.mrb[22].mxu1 %vm161_vm2, %v3922_v21 }
0x118e   :  { %3504 = vmatprep.mubr.msk.f32.mxu0 %vm75_vm0, %v4309_v43  ;;  %3659 = vmatprep.subr.bf16.mxu0 %v4248_v41 }
0x118f   :  { %3649 = vmatpush3.bf16.msra.mxu1 %v4206_v36 }
0x1190   :  { %3651 = vmatprep.subr.bf16.mxu1 %v4226_v9 }
0x1191   :  { %3661 = vmatpush3.bf16.msra.mxu0 %v4248_v41 }
0x1193   :  { %3653 = vmatpush3.bf16.msra.mxu1 %v4226_v9 }
0x1194   :  { %3505 = vmatmul.mubr.msk.f32.vlgmr.msra.gmra.mrb[24].mxu0 %vm75_vm0, %v4311_v44  ;;  %3663 = vmatprep.subr.bf16.mxu1 %v4270_v49 }
0x125f   :  { %v2683_v8 = vpop.f32.mrb[22].mxu0 }
0x1260   :  { %v2613_v14 = vpop.f32.mrb[22].mxu1  ;;  %v3484_v20 = vpop.f32.mrb[23].mxu0 }
0x1261   :  { %v3479_v21 = vpop.f32.mrb[23].mxu1  ;;  %3493 = vmatprep.mubr.msk.f32.mxu1 %vm75_vm0, %v2613_v14 }
0x1262   :  { %3494 = vmatmul.mubr.msk.f32.vlgmr.msra.gmra.mrb[24].mxu1 %vm75_vm0, %v2683_v8 }
0x1263   :  { %3665 = vmatpush3.bf16.msra.mxu1 %v4270_v49 }
0x1264   :  { %3667 = vmatprep.subr.bf16.mxu1 %v4275_v51 }
0x1267   :  { %v3506_v25 = vpop.f32.mrb[24].mxu0  ;;  %3669 = vmatpush3.bf16.msra.mxu1 %v4275_v51 }
0x1268   :  { %v2834_v10 = vpop.f32.mrb[25].mxu0 }
0x1335   :  { %v3495_v36 = vpop.f32.mrb[24].mxu1 }
0x1336   :  { %v2765_v37 = vadd.f32 %v3495_v36, %v4285_v52  ;;  %v2759_v9 = vpop.f32.mrb[25].mxu1 }
0x1337   :  { %v2760_v41 = vadd.f32 %v4285_v52, %v2759_v9 }
0x1338   :  { %v2844_v24 = vadd.f32 %v3506_v25, %v2765_v37 }
0x1339   :  { %v2843_v50 = vadd.f32 %v2834_v10, %v2760_v41 }
0x133a   :  { %v3085_v31 = vmul.f32 -1.442695, %v2844_v24 }
0x133b   :  { %v3084_v53 = vmul.f32 -1.442695, %v2843_v50 }
0x133c   :  { %3730 = vpow2.f32 %v3085_v31 }
0x133d   :  { %3732 = vpow2.f32 %v3084_v53 }
0x1346   :  { %v3731_v54 = vpop.eup %3730 }
0x1347   :  { %v3733_v49 = vpop.eup %3732  ;;  %v2852_v55 = vadd.f32 1.0, %v3731_v54 }
0x1348   :  { %v2851_v56 = vadd.f32 1.0, %v3733_v49 }
0x1349   :  { %3734 = vrcp.f32 %v2852_v55 }
0x134a   :  { %3736 = vrcp.f32 %v2851_v56 }
0x1353   :  { %v3735_v51 = vpop.eup %3734 }
0x1354   :  { %v3737_v47 = vpop.eup %3736  ;;  %v2860_v58 = vmul.f32 %v3735_v51, %v4311_v44  ;;  %v2955_v3 = vsub.f32 1.0, %v3735_v51 }
0x1355   :  { %v2859_v57 = vmul.f32 %v3737_v47, %v4309_v43  ;;  %v2954_v11 = vsub.f32 1.0, %v3737_v47 }
0x1356   :  { %v2957_v15 = vmul.f32 %v2955_v3, %v4301_v22 }
0x1357   :  { %3515 = vmatprep.mubr.msk.f32.mxu1 %vm75_vm0, %v2859_v57  ;;  %v2956_v29 = vmul.f32 %v2954_v11, %v4303_v42 }
0x1358   :  { %3516 = vmatmul.mubr.msk.f32.vlgmr.msra.gmra.mrb[26].mxu1 %vm75_vm0, %v2860_v58 }
0x142b   :  { %v3517_v52 = vpop.f32.mrb[26].mxu1 }
0x142c   :  { %2946 = vrot.lane.b32.xlu0 %v3517_v52, %s3770_s22  ;;  %v2933_v59 = vpop.f32.mrb[27].mxu1 }
0x142d   :  { %2944 = vrot.lane.b32.xlu1 %v2933_v59, %s3770_s22 }
0x149e   :  { %v2947_v60 = vpop.permute.xlu0 %2946 }
0x149f   :  { %v2951_v61 = vadd.f32 %v2947_v60, %v2765_v37  ;;  %v2945_v63 = vpop.permute.xlu1 %2944 }
0x14a0   :  { %v2950_v0 = vadd.f32 %v2945_v63, %v2760_v41 }
0x14a1   :  { %3738 = vtanh.f32 %v2951_v61 }
0x14a2   :  { %3740 = vtanh.f32 %v2950_v0 }
0x14ab   :  { %v3739_v1 = vpop.eup %3738 }
0x14ac   :  { %v3741_v2 = vpop.eup %3740  ;;  %2962 = vrot.lane.b32.xlu0 %v3739_v1, %s3768_s0 }
0x14ad   :  { %2960 = vrot.lane.b32.xlu1 %v3741_v2, %s3768_s0 }
0x14b0   :  { %1602 = vrot.lane.b32.xlu0 %v4238_v23, %s3770_s22 }
0x14b1   :  { %1600 = vrot.lane.b32.xlu1 %v4240_v28, %s3770_s22 }
0x14b5   :  { %1629 = vrot.lane.b32.xlu1 %v4151_v62, %s3768_s0 }
0x151e   :  { %v2963_v13 = vpop.permute.xlu0 %2962 }
0x151f   :  { %v2967_v16 = vmul.f32 %v3735_v51, %v2963_v13  ;;  %v2961_v17 = vpop.permute.xlu1 %2960 }
0x1520   :  { %v2966_v5 = vmul.f32 %v3737_v47, %v2961_v17 }
0x1521   :  { %v2969_v7 = vadd.f32 %v2967_v16, %v2957_v15 }
0x1522   :  { %v2968_v32 = vadd.f32 %v2966_v5, %v2956_v29  ;;  %v1603_v33 = vpop.permute.xlu0 %1602 }
0x1523   :  { %v1607_v23 = vsel %vm1516_vm5, %v4173_v4, %v1603_v33  ;;  %v1601_v28 = vpop.permute.xlu1 %1600  ;;  %v2971_v34 = vmul.f32 %v2969_v7, %v4115_v27 }
0x1524   :  { %1609 = vst [vmem:[%s4418_s11 + $0x8] sm:$0xff] %v1607_v23  ;;  %v1606_v62 = vsel %vm1516_vm5, %v4175_v6, %v1601_v28  ;;  %v2970_v35 = vmul.f32 %v2968_v32, %v4113_v26 }
0x1525   :  { %1608 = vst [vmem:[%s4418_s11] sm:$0xff] %v1606_v62  ;;  %2976 = vrot.lane.b32.xlu1 %v2971_v34, %s3768_s0 }
0x1526   :  { %2974 = vrot.lane.b32.xlu0 %v2970_v35, %s3768_s0 }
0x1527   :  { %v1630_v27 = vpop.permute.xlu1 %1629 }
0x1528   :  { %1633 = vst.msk [vmem:[#allocation2] sm:$0x3] %vm1632_vm6, %v1630_v27 }
0x1529   :  { %3753 = shalt.err (!%p3750_p4)
}
0x152a   :  { %s3754_s27 = scalar_lea.hbm %s4419_s12, 32 }
0x152b   :  { %p3755_p5 = scmp.ne.s32.totalorder %s4419_s12, %s3754_s27  ;;  %p3758_p6 = scmp.lt.u32.totalorder %s3754_s27, %s4419_s12 }
0x152d   :  { %p3760_p7 = pnand %p3758_p6, %p3755_p5 }
0x152f   :  { %3763 = shalt.err (!%p3760_p7)
}
0x1530   :  { %2993 = dma.vmem_to_hbm [thread:$0]  %s2991_s8, 32, %s4419_s12, [#allocation3]  }
0x1597   :  { %v2977_v26 = vpop.permute.xlu1 %2976 }
0x1598   :  { %2981 = vst.msk [vmem:[%s4420_s13 + $0x8] sm:$0xff] %vm75_vm0, %v2977_v26  ;;  %v2975_v4 = vpop.permute.xlu0 %2974 }
0x1599   :  { %2980 = vst.msk [vmem:[%s4420_s13] sm:$0xff] %vm75_vm0, %v2975_v4 }
0x159a   :  { %3764 = dma.done.wait [#allocation3], 32  }
0x159b   :  { %3765 = vsyncadd [#allocation3], 4294967264 }
0x159c   :  { %3003 = vsyncpa [#allocation3], 1 }

// kernel: encoder_forward.3
= control target key start
LH: loop header
LB: loop body
LE: loop exit
PB: predicated region body
PF: predicated region fallthrough
CT: control target
= control target key end

     0   :  { %17 = vsyncpa [#allocation11], 0  ;;  %vm50_vm0 = vcmask 261120   ;;  %v3236_v6 = vmov 0.0|0.0   ;;  %vm222_vm1 = vcmask 254976   ;;  %vm3237_vm2 = vmmov 0   ;;  %s4034_s0 = inlined_call_operand.vmem [shape: s32[2,1], index: 0, kind: input, shape index: {}]   ;;  %s4035_s1 = inlined_call_operand.vmem [shape: f32[16,32], index: 1, kind: input, shape index: {}]   ;;  %s4036_s2 = inlined_call_operand.vmem [shape: f32[32,128], index: 2, kind: input, shape index: {}]   ;;  %s4037_s3 = inlined_call_operand.vmem [shape: f32[32,128], index: 3, kind: input, shape index: {}]   ;;  %s4038_s4 = inlined_call_operand.vmem [shape: f32[1,128], index: 4, kind: input, shape index: {}]   ;;  %s4039_s5 = inlined_call_operand.vmem [shape: f32[32,128], index: 5, kind: input, shape index: {}]   ;;  %s4040_s6 = inlined_call_operand.vmem [shape: f32[32,128], index: 6, kind: input, shape index: {}]   ;;  %s4041_s7 = inlined_call_operand.vmem [shape: f32[1,128], index: 7, kind: input, shape index: {}]   ;;  %s4042_s8 = inlined_call_operand.vmem [shape: f32[64,64], index: 8, kind: input, shape index: {}]   ;;  %s4043_s9 = inlined_call_operand.vmem [shape: f32[16,128], index: 9, kind: output, shape index: {0}]   ;;  %s4044_s10 = inlined_call_operand.hbm [shape: f32[2,2,32], index: 10, kind: output, shape index: {1}]   ;;  %s4045_s11 = inlined_call_operand.hbm [shape: f32[2,2,32], index: 11, kind: output, shape index: {2}]  }
   0x1   :  { %v39_v0 = vld [vmem:[%s4036_s2] sm:$0xff]  ;;  %v40_v1 = vld [vmem:[%s4036_s2 + $0x8] sm:$0xff]  ;;  %v41_v2 = vld [vmem:[%s4036_s2 + $0x10] sm:$0xff]  ;;  %2936 = vmatprep.subr.bf16.mxu0 %v3236_v6  ;;  %v3238_v10 = vmov 0.0  }
   0x2   :  { %v2920_v3 = vpack.c.bf16 %v40_v1, %v39_v0  ;;  %v42_v4 = vld [vmem:[%s4036_s2 + $0x18] sm:$0xff]  ;;  %v37_v5 = vld [vmem:[%s4035_s1] sm:$0xff]  ;;  %v135_v9 = vld [vmem:[%s4039_s5 + $0x8] sm:$0xff]  ;;  %2733 = vmatprep.mubr.msk.f32.mxu0 %vm3237_vm2, %v3238_v10  ;;  %223 = vst.msk [vmem:[#allocation6] sm:$0x3] %vm222_vm1, %v3238_v10 }
   0x3   :  { %v2924_v7 = vpack.c.bf16 %v42_v4, %v41_v2  ;;  %2711 = vmatprep.mubr.msk.f32.mxu1 %vm50_vm0, %v37_v5  ;;  %v134_v8 = vld [vmem:[%s4039_s5] sm:$0xff]  ;;  %224 = vst.msk [vmem:[#allocation7] sm:$0x3] %vm222_vm1, %v3238_v10  ;;  %225 = vst.msk [vmem:[#allocation8] sm:$0x3] %vm222_vm1, %v3238_v10  ;;  %v229_v12 = vld [vmem:[%s4037_s3 + $0x8] sm:$0xff] }
   0x4   :  { %226 = vst.msk [vmem:[#allocation9] sm:$0x3] %vm222_vm1, %v3238_v10  ;;  %2921 = vmatprep.subr.bf16.mxu1 %v2920_v3  ;;  %v228_v11 = vld [vmem:[%s4037_s3] sm:$0xff]  ;;  %v230_v14 = vld [vmem:[%s4037_s3 + $0x10] sm:$0xff]  ;;  %v231_v15 = vld [vmem:[%s4037_s3 + $0x18] sm:$0xff]  ;;  %v2928_v16 = vpack.c.bf16 %v135_v9, %v134_v8 }
   0x5   :  { %2923 = vmatpush3.bf16.msra.mxu1 %v2920_v3  ;;  %v3345_v13 = vpack.c.bf16 %v229_v12, %v228_v11  ;;  %v136_v17 = vld [vmem:[%s4039_s5 + $0x10] sm:$0xff]  ;;  %v137_v18 = vld [vmem:[%s4039_s5 + $0x18] sm:$0xff]  ;;  %v3360_v19 = vpack.c.bf16 %v231_v15, %v230_v14 }
   0x6   :  { %2925 = vmatprep.subr.bf16.mxu1 %v2924_v7 }
   0x7   :  { %2938 = vmatpush3.bf16.msra.mxu0 %v3345_v13 }
   0x8   :  { %18 = vsyncpa [#allocation13], 0  ;;  %2939 = vmatprep.subr.bf16.mxu0 %v3236_v6  ;;  %v38_v20 = vld [vmem:[%s4035_s1 + $0x8] sm:$0xff]  ;;  %v2932_v21 = vpack.c.bf16 %v137_v18, %v136_v17  ;;  %s3239_s5 = smov 32   ;;  %v232_v24 = vld [vmem:[%s4040_s6] sm:$0xff]  ;;  %v3240_v31 = vmov 0  }
   0x9   :  { %2927 = vmatpush3.bf16.msra.mxu1 %v2924_v7  ;;  %v3367_v23 = vld [vmem:[#allocation6] sm:$0x3]  ;;  %v233_v25 = vld [vmem:[%s4040_s6 + $0x8] sm:$0xff]  ;;  %v234_v27 = vld [vmem:[%s4040_s6 + $0x10] sm:$0xff]  ;;  %3058 = vset.pattern.permute.xlu0 %v3240_v31  ;;  %vm241_vm3 = vcmask 1040384   ;;  %s3244_s30 = smov [#allocation12]  }
   0xa   :  { %2929 = vmatprep.subr.bf16.mxu1 %v2928_v16  ;;  %v3385_v26 = vpack.c.bf16 %v233_v25, %v232_v24  ;;  %v235_v28 = vld [vmem:[%s4040_s6 + $0x18] sm:$0xff]  ;;  %v3404_v30 = vld [vmem:[#allocation8] sm:$0x3]  ;;  %3059 = vset.pattern.permute.xlu1 %v3240_v31  ;;  %v2561_v32 = vld [vmem:[%s4038_s4] ss:$0 sm:$0xff]  ;;  %s3241_s4 = smov 64  }
   0xb   :  { %v252_v22 = vld [vmem:[#allocation9] sm:$0x3]  ;;  %2941 = vmatpush3.bf16.msra.mxu0 %v3360_v19  ;;  %v3398_v29 = vpack.c.bf16 %v235_v28, %v234_v27  ;;  %v2564_v39 = vld [vmem:[%s4041_s7] ss:$0 sm:$0xff]  ;;  %v250_v59 = vld [vmem:[#allocation7] sm:$0x3] }
   0xc   :  { %437 = vrot.lane.b32.xlu1 %v252_v22, %s3239_s5  ;;  %2712 = vmatmul.mubr.msk.f32.vlgmr.msra.gmra.mrb[0].mxu1 %vm50_vm0, %v38_v20  ;;  %v3429_v58 = vld [vmem:[%s4034_s0] sm:$0x3]  ;;  %s3242_s0 = smov 96   ;;  %s2544_s6 = sshll.u32 %s3244_s30, 4  ;;  %s2545_s6 = int_to_ptr.vmem [resolvable:$true] %s2544_s6 }
   0xd   :  { %2948 = vmatprep.subr.bf16.mxu0 %v3236_v6  ;;  %2931 = vmatpush3.bf16.msra.mxu1 %v2928_v16  ;;  %vm458_vm4 = vcmp.gt.s32.totalorder %v3429_v58, 7  ;;  %vm457_vm5 = vcmp.gt.s32.totalorder %v3429_v58, 0  ;;  %vm736_vm8 = vcmp.gt.s32.totalorder %v3429_v58, 6  ;;  %vm735_vm9 = vcmp.gt.s32.totalorder %v3429_v58, 1 }
   0xe   :  { %2722 = vmatprep.mubr.msk.f32.mxu1 %vm50_vm0, %v37_v5  ;;  %2933 = vmatprep.subr.bf16.mxu1 %v2932_v21  ;;  %v479_v60 = vsel %vm458_vm4, 1, %v3240_v31  ;;  %v459_v61 = vsel %vm457_vm5, 1, %v3240_v31  ;;  %vm1012_vm12 = vcmp.gt.s32.totalorder %v3429_v58, 5  ;;  %vm1011_vm13 = vcmp.gt.s32.totalorder %v3429_v58, 2 }
   0xf   :  { %2734 = vmatmul.mubr.msk.f32.vlgmr.msra.gmra.mrb[0].mxu0 %vm50_vm0, %v3367_v23  ;;  %vm1288_vm4 = vcmp.gt.s32.totalorder %v3429_v58, 4  ;;  %vm1287_vm5 = vcmp.gt.s32.totalorder %v3429_v58, 3 }
  0x10   :  { %2950 = vmatpush3.bf16.msra.mxu0 %v3345_v13  ;;  %2755 = vmatprep.mubr.msk.f32.mxu0 %vm3237_vm2, %v3238_v10 }
  0x11   :  { %2951 = vmatprep.subr.bf16.mxu0 %v3236_v6  ;;  %2935 = vmatpush3.bf16.msra.mxu1 %v2932_v21 }
  0x12   :  { %2942 = vmatprep.subr.bf16.mxu1 %v3236_v6 }
  0x14   :  { %2953 = vmatpush3.bf16.msra.mxu0 %v3360_v19  ;;  %2723 = vmatmul.mubr.msk.f32.vlgmr.msra.gmra.mrb[2].mxu1 %vm50_vm0, %v38_v20 }
  0x15   :  { %2960 = vmatprep.subr.bf16.mxu0 %v3236_v6  ;;  %2944 = vmatpush3.bf16.msra.mxu1 %v3385_v26 }
  0x16   :  { %2744 = vmatprep.mubr.msk.f32.mxu1 %vm3237_vm2, %v3238_v10  ;;  %2945 = vmatprep.subr.bf16.mxu1 %v3236_v6 }
  0x19   :  { %2947 = vmatpush3.bf16.msra.mxu1 %v3398_v29 }
  0x1a   :  { %2954 = vmatprep.subr.bf16.mxu1 %v3236_v6 }
  0x1c   :  { %2745 = vmatmul.mubr.msk.f32.vlgmr.msra.gmra.mrb[4].mxu1 %vm50_vm0, %v3404_v30 }
  0x1d   :  { %2956 = vmatpush3.bf16.msra.mxu1 %v3385_v26  ;;  %2766 = vmatprep.mubr.msk.f32.mxu1 %vm3237_vm2, %v3238_v10 }
  0x1e   :  { %2957 = vmatprep.subr.bf16.mxu1 %v3236_v6 }
  0x21   :  { %2959 = vmatpush3.bf16.msra.mxu1 %v3398_v29 }
  0x22   :  { %2966 = vmatprep.subr.bf16.mxu1 %v3236_v6 }
  0x7e   :  { %v438_v12 = vpop.permute.xlu1 %437 }
  0xdf   :  { %v2713_v33 = vpop.f32.mrb[0].mxu1 }
  0xe0   :  { %v129_v34 = vadd.f32 %v2713_v33, %v2561_v32  ;;  %v123_v35 = vpop.f32.mrb[1].mxu1 }
  0xe1   :  { %v124_v36 = vadd.f32 %v2561_v32, %v123_v35 }
  0xe2   :  { %v322_v37 = vpop.f32.mrb[0].mxu0  ;;  %133 = vst [vmem:[#allocation2 + $0x8] sm:$0xff] %v129_v34 }
  0xe3   :  { %v2735_v38 = vpop.f32.mrb[1].mxu0  ;;  %132 = vst [vmem:[#allocation2] sm:$0xff] %v124_v36 }
  0xe7   :  { %v2724_v40 = vpop.f32.mrb[2].mxu1 }
  0xe8   :  { %v217_v41 = vadd.f32 %v2724_v40, %v2564_v39  ;;  %v211_v42 = vpop.f32.mrb[3].mxu1 }
  0xe9   :  { %v212_v43 = vadd.f32 %v2564_v39, %v211_v42  ;;  %v237_v44 = vld [vmem:[#allocation2 + $0x8] sm:$0x1] }
  0xea   :  { %221 = vst [vmem:[#allocation3 + $0x8] sm:$0xff] %v217_v41  ;;  %v239_v46 = vrot.slane %v237_v44, 7  ;;  %v236_v48 = vld [vmem:[#allocation2] sm:$0x1] }
  0xeb   :  { %220 = vst [vmem:[#allocation3] sm:$0xff] %v212_v43 }
  0xec   :  { %v242_v52 = vsel %vm241_vm3, %v236_v48, %v239_v46 }
  0xed   :  { %v326_v55 = vadd.f32 %v322_v37, %v242_v52 }
  0xef   :  { %v396_v45 = vpop.f32.mrb[4].mxu1  ;;  %v2569_v63 = vmul.f32 -1.442695, %v326_v55 }
  0xf0   :  { %v2746_v47 = vpop.f32.mrb[5].mxu1 }
  0xf1   :  { %v244_v49 = vld [vmem:[#allocation3 + $0xf] sm:$0x1]  ;;  %v757_v47 = vsel %vm736_vm8, 1, %v3240_v31  ;;  %v522_v48 = vld [vmem:[#allocation3 + $0xe] sm:$0x1] }
  0xf2   :  { %v243_v50 = vld [vmem:[#allocation3 + $0x7] sm:$0x1]  ;;  %v246_v51 = vrot.slane %v244_v49, 7  ;;  %v524_v49 = vrot.slane %v522_v48, 7 }
  0xf4   :  { %v248_v53 = vsel %vm241_vm3, %v243_v50, %v246_v51  ;;  %v521_v50 = vld [vmem:[#allocation3 + $0x6] sm:$0x1]  ;;  %v516_v51 = vld [vmem:[#allocation2 + $0x9] sm:$0x1] }
  0xf5   :  { %v400_v54 = vadd.f32 %v396_v45, %v248_v53  ;;  %v526_v52 = vsel %vm241_vm3, %v521_v50, %v524_v49 }
  0xf7   :  { %3060 = vtanh.f32 %v400_v54  ;;  %v2570_v62 = vmul.f32 -1.442695, %v400_v54 }
  0xf8   :  { %3062 = vtanh.f32 %v326_v55 }
  0xf9   :  { %3064 = vpow2.f32 %v2570_v62 }
  0xfa   :  { %3066 = vpow2.f32 %v2569_v63 }
 0x101   :  { %v3061_v56 = vpop.eup %3060 }
 0x102   :  { %442 = vrot.lane.b32.xlu0 %v3061_v56, %s3241_s4  ;;  %v3063_v57 = vpop.eup %3062  ;;  %v518_v56 = vrot.slane %v516_v51, 7 }
 0x103   :  { %v3065_v0 = vpop.eup %3064 }
 0x104   :  { %v432_v1 = vadd.f32 1.0, %v3065_v0  ;;  %v3067_v2 = vpop.eup %3066 }
 0x105   :  { %v404_v3 = vadd.f32 1.0, %v3067_v2 }
 0x106   :  { %414 = vrot.lane.b32.xlu0 %v3063_v57, %s3241_s4  ;;  %3068 = vrcp.f32 %v432_v1  ;;  %v515_v57 = vld [vmem:[#allocation2 + $0x1] sm:$0x1] }
 0x107   :  { %3070 = vrcp.f32 %v404_v3 }
 0x10a   :  { %409 = vrot.lane.b32.xlu0 %v250_v59, %s3239_s5  ;;  %v520_v59 = vsel %vm241_vm3, %v515_v57, %v518_v56  ;;  %v798_v56 = vld [vmem:[#allocation3 + $0xd] sm:$0x1] }
 0x10b   :  { %v800_v57 = vrot.slane %v798_v56, 7 }
 0x10e   :  { %481 = vperm.xlu0 %3058, %v479_v60  }
 0x110   :  { %v3069_v4 = vpop.eup %3068 }
 0x111   :  { %v3071_v8 = vpop.eup %3070  ;;  %v440_v14 = vmul.f32 %v3069_v4, %v438_v12 }
 0x112   :  { %461 = vperm.xlu0 %3058, %v459_v61  }
 0x116   :  { %464 = vrot.lane.b32.xlu0 %v3367_v23, %s3242_s0 }
 0x174   :  { %v443_v5 = vpop.permute.xlu0 %442 }
 0x175   :  { %v445_v7 = vmul.f32 %v3069_v4, %v443_v5 }
 0x177   :  { %447 = vrot.lane.b32.xlu1 %v445_v7, %s3239_s5 }
 0x178   :  { %v415_v9 = vpop.permute.xlu0 %414 }
 0x179   :  { %v417_v11 = vmul.f32 %v3071_v8, %v415_v9 }
 0x17b   :  { %419 = vrot.lane.b32.xlu1 %v417_v11, %s3239_s5 }
 0x17c   :  { %v410_v17 = vpop.permute.xlu0 %409 }
 0x17d   :  { %v412_v20 = vmul.f32 %v3071_v8, %v410_v17 }
 0x18d   :  { %v3445_v24 = vpop.permute.xlu0 %481 }
 0x18e   :  { %vm483_vm6 = vcmp.eq.s32.totalorder %v3445_v24, 1 }
 0x191   :  { %v3450_v28 = vpop.permute.xlu0 %461 }
 0x192   :  { %vm463_vm7 = vcmp.eq.s32.totalorder %v3450_v28, 1 }
 0x195   :  { %v465_v34 = vpop.permute.xlu0 %464 }
 0x1e9   :  { %v448_v15 = vpop.permute.xlu1 %447 }
 0x1ea   :  { %v450_v16 = vadd.f32 %v448_v15, %v440_v14 }
 0x1ec   :  { %3072 = vtanh.f32 %v450_v16  ;;  %v493_v36 = vsel %vm483_vm6, %v450_v16, %v438_v12 }
 0x1ed   :  { %v420_v18 = vpop.permute.xlu1 %419 }
 0x1ee   :  { %v422_v21 = vadd.f32 %v420_v18, %v412_v20 }
 0x1f0   :  { %3074 = vtanh.f32 %v422_v21  ;;  %v473_v38 = vsel %vm463_vm7, %v422_v21, %v410_v17 }
 0x1f6   :  { %v3073_v22 = vpop.eup %3072 }
 0x1f7   :  { %453 = vrot.lane.b32.xlu1 %v3073_v22, %s3241_s4 }
 0x1fa   :  { %v3075_v23 = vpop.eup %3074 }
 0x1fb   :  { %484 = vrot.lane.b32.xlu1 %v3404_v30, %s3242_s0 }
 0x1ff   :  { %425 = vrot.lane.b32.xlu1 %v3075_v23, %s3241_s4 }
 0x269   :  { %v454_v25 = vpop.permute.xlu1 %453 }
 0x26a   :  { %v3447_v27 = vmul.f32 %v3069_v4, %v454_v25 }
 0x26d   :  { %v485_v32 = vpop.permute.xlu1 %484 }
 0x26e   :  { %v487_v33 = vsel %vm483_vm6, %v3447_v27, %v485_v32 }
 0x26f   :  { %489 = vrot.lane.b32.xlu1 %v487_v33, %s3239_s5  ;;  %v737_v33 = vsel %vm735_vm9, 1, %v3240_v31 }
 0x271   :  { %v426_v30 = vpop.permute.xlu1 %425 }
 0x272   :  { %v3456_v35 = vmul.f32 %v3071_v8, %v426_v30 }
 0x273   :  { %495 = vrot.lane.b32.xlu1 %v493_v36, %s3242_s0 }
 0x274   :  { %v467_v37 = vsel %vm463_vm7, %v3456_v35, %v465_v34 }
 0x275   :  { %469 = vrot.lane.b32.xlu0 %v467_v37, %s3239_s5 }
 0x277   :  { %475 = vrot.lane.b32.xlu1 %v473_v38, %s3242_s0 }
 0x2e1   :  { %v490_v39 = vpop.permute.xlu1 %489 }
 0x2e2   :  { %492 = vst.msk [vmem:[#allocation8] sm:$0x3] %vm222_vm1, %v490_v39 }
 0x2e5   :  { %v496_v40 = vpop.permute.xlu1 %495 }
 0x2e6   :  { %498 = vst.msk [vmem:[#allocation9] sm:$0x3] %vm222_vm1, %v496_v40 }
 0x2e7   :  { %v470_v41 = vpop.permute.xlu0 %469 }
 0x2e8   :  { %472 = vst.msk [vmem:[#allocation6] sm:$0x3] %vm222_vm1, %v470_v41 }
 0x2e9   :  { %v476_v42 = vpop.permute.xlu1 %475  ;;  %v529_v43 = vld [vmem:[#allocation8] sm:$0x3] }
 0x2ea   :  { %478 = vst.msk [vmem:[#allocation7] sm:$0x3] %vm222_vm1, %v476_v42  ;;  %2767 = vmatmul.mubr.msk.f32.vlgmr.msra.gmra.mrb[6].mxu1 %vm50_vm0, %v529_v43 }
 0x2eb   :  { %2968 = vmatpush3.bf16.msra.mxu1 %v3385_v26  ;;  %2788 = vmatprep.mubr.msk.f32.mxu1 %vm3237_vm2, %v3238_v10 }
 0x2ec   :  { %2969 = vmatprep.subr.bf16.mxu1 %v3236_v6 }
 0x2ed   :  { %v530_v44 = vld [vmem:[#allocation9] sm:$0x3] }
 0x2ee   :  { %715 = vrot.lane.b32.xlu1 %v530_v44, %s3239_s5 }
 0x2ef   :  { %v3479_v45 = vld [vmem:[#allocation6] sm:$0x3]  ;;  %2971 = vmatpush3.bf16.msra.mxu1 %v3398_v29 }
 0x2f0   :  { %2756 = vmatmul.mubr.msk.f32.vlgmr.msra.gmra.mrb[2].mxu0 %vm50_vm0, %v3479_v45  ;;  %2978 = vmatprep.subr.bf16.mxu1 %v3236_v6 }
 0x2f1   :  { %v528_v46 = vld [vmem:[#allocation7] sm:$0x3]  ;;  %2962 = vmatpush3.bf16.msra.mxu0 %v3345_v13  ;;  %2777 = vmatprep.mubr.msk.f32.mxu0 %vm3237_vm2, %v3238_v10 }
 0x2f2   :  { %687 = vrot.lane.b32.xlu1 %v528_v46, %s3239_s5  ;;  %2963 = vmatprep.subr.bf16.mxu0 %v3236_v6 }
 0x2f5   :  { %2965 = vmatpush3.bf16.msra.mxu0 %v3360_v19 }
 0x2f6   :  { %759 = vperm.xlu1 %3059, %v757_v47   ;;  %2972 = vmatprep.subr.bf16.mxu0 %v3236_v6 }
 0x2fa   :  { %762 = vrot.lane.b32.xlu1 %v529_v43, %s3242_s0 }
 0x360   :  { %v716_v16 = vpop.permute.xlu1 %715 }
 0x364   :  { %v688_v21 = vpop.permute.xlu1 %687 }
 0x375   :  { %v3507_v34 = vpop.permute.xlu1 %759 }
 0x376   :  { %vm761_vm10 = vcmp.eq.s32.totalorder %v3507_v34, 1 }
 0x379   :  { %v763_v38 = vpop.permute.xlu1 %762 }
 0x3bd   :  { %v674_v53 = vpop.f32.mrb[6].mxu1 }
 0x3be   :  { %v678_v54 = vadd.f32 %v674_v53, %v526_v52  ;;  %v2768_v55 = vpop.f32.mrb[7].mxu1 }
 0x3c0   :  { %3076 = vtanh.f32 %v678_v54  ;;  %v2574_v1 = vmul.f32 -1.442695, %v678_v54  ;;  %v1033_v54 = vsel %vm1012_vm12, 1, %v3240_v31 }
 0x3c3   :  { %v600_v60 = vpop.f32.mrb[2].mxu0 }
 0x3c4   :  { %v604_v61 = vadd.f32 %v600_v60, %v520_v59  ;;  %v2757_v62 = vpop.f32.mrb[3].mxu0  ;;  %v797_v59 = vld [vmem:[#allocation3 + $0x5] sm:$0x1] }
 0x3c5   :  { %v802_v60 = vsel %vm241_vm3, %v797_v59, %v800_v57 }
 0x3c6   :  { %3078 = vtanh.f32 %v604_v61  ;;  %v2573_v2 = vmul.f32 -1.442695, %v604_v61 }
 0x3c7   :  { %3080 = vpow2.f32 %v2574_v1 }
 0x3c8   :  { %3082 = vpow2.f32 %v2573_v2 }
 0x3ca   :  { %v3077_v63 = vpop.eup %3076 }
 0x3cb   :  { %720 = vrot.lane.b32.xlu0 %v3077_v63, %s3241_s4 }
 0x3d0   :  { %v3079_v0 = vpop.eup %3078 }
 0x3d1   :  { %692 = vrot.lane.b32.xlu0 %v3079_v0, %s3241_s4  ;;  %v3081_v3 = vpop.eup %3080  ;;  %v792_v0 = vld [vmem:[#allocation2 + $0xa] sm:$0x1] }
 0x3d2   :  { %v710_v4 = vadd.f32 1.0, %v3081_v3  ;;  %v3083_v5 = vpop.eup %3082  ;;  %v794_v2 = vrot.slane %v792_v0, 7  ;;  %v791_v3 = vld [vmem:[#allocation2 + $0x2] sm:$0x1] }
 0x3d3   :  { %v682_v7 = vadd.f32 1.0, %v3083_v5 }
 0x3d4   :  { %3084 = vrcp.f32 %v710_v4  ;;  %v796_v4 = vsel %vm241_vm3, %v791_v3, %v794_v2  ;;  %v1309_v3 = vsel %vm1288_vm4, 1, %v3240_v31 }
 0x3d5   :  { %3086 = vrcp.f32 %v682_v7 }
 0x3de   :  { %v3085_v8 = vpop.eup %3084 }
 0x3df   :  { %v3087_v12 = vpop.eup %3086  ;;  %v718_v17 = vmul.f32 %v3085_v8, %v716_v16 }
 0x3e0   :  { %v690_v22 = vmul.f32 %v3087_v12, %v688_v21 }
 0x43d   :  { %v721_v9 = vpop.permute.xlu0 %720 }
 0x43e   :  { %v723_v11 = vmul.f32 %v3085_v8, %v721_v9 }
 0x440   :  { %725 = vrot.lane.b32.xlu0 %v723_v11, %s3239_s5 }
 0x443   :  { %v693_v14 = vpop.permute.xlu0 %692 }
 0x444   :  { %v695_v15 = vmul.f32 %v3087_v12, %v693_v14 }
 0x446   :  { %697 = vrot.lane.b32.xlu0 %v695_v15, %s3239_s5 }
 0x4b2   :  { %v726_v18 = vpop.permute.xlu0 %725 }
 0x4b3   :  { %v728_v20 = vadd.f32 %v726_v18, %v718_v17 }
 0x4b5   :  { %3088 = vtanh.f32 %v728_v20  ;;  %v771_v40 = vsel %vm761_vm10, %v728_v20, %v716_v16 }
 0x4b8   :  { %v698_v23 = vpop.permute.xlu0 %697 }
 0x4b9   :  { %v700_v25 = vadd.f32 %v698_v23, %v690_v22 }
 0x4bb   :  { %3090 = vtanh.f32 %v700_v25 }
 0x4bf   :  { %v3089_v32 = vpop.eup %3088 }
 0x4c0   :  { %731 = vrot.lane.b32.xlu0 %v3089_v32, %s3241_s4 }
 0x4c4   :  { %739 = vperm.xlu0 %3058, %v737_v33  }
 0x4c5   :  { %v3091_v30 = vpop.eup %3090 }
 0x4c6   :  { %703 = vrot.lane.b32.xlu1 %v3091_v30, %s3241_s4 }
 0x4c8   :  { %742 = vrot.lane.b32.xlu0 %v3479_v45, %s3242_s0 }
 0x532   :  { %v732_v36 = vpop.permute.xlu0 %731 }
 0x533   :  { %v3509_v37 = vmul.f32 %v3085_v8, %v732_v36 }
 0x535   :  { %v765_v39 = vsel %vm761_vm10, %v3509_v37, %v763_v38 }
 0x536   :  { %767 = vrot.lane.b32.xlu1 %v765_v39, %s3239_s5  ;;  %v1013_v39 = vsel %vm1011_vm13, 1, %v3240_v31 }
 0x538   :  { %v704_v41 = vpop.permute.xlu1 %703 }
 0x539   :  { %v3524_v44 = vmul.f32 %v3087_v12, %v704_v41 }
 0x53a   :  { %773 = vrot.lane.b32.xlu1 %v771_v40, %s3242_s0 }
 0x543   :  { %v3519_v42 = vpop.permute.xlu0 %739 }
 0x544   :  { %vm741_vm11 = vcmp.eq.s32.totalorder %v3519_v42, 1  ;;  %v2424_v42 = vld [vmem:[%s4042_s8 + $0x8] sm:$0xff] }
 0x545   :  { %v751_v43 = vsel %vm741_vm11, %v700_v25, %v688_v21  ;;  %v777_v34 = vsel %vm741_vm11, %v3524_v44, 0.0 }
 0x546   :  { %753 = vrot.lane.b32.xlu1 %v751_v43, %s3242_s0 }
 0x547   :  { %v743_v45 = vpop.permute.xlu0 %742 }
 0x548   :  { %v745_v46 = vsel %vm741_vm11, %v3524_v44, %v743_v45  ;;  %v2425_v44 = vld [vmem:[%s4042_s8 + $0x10] sm:$0xff] }
 0x549   :  { %747 = vrot.lane.b32.xlu0 %v745_v46, %s3239_s5 }
 0x5a8   :  { %v768_v47 = vpop.permute.xlu1 %767 }
 0x5a9   :  { %770 = vst.msk [vmem:[#allocation8] sm:$0x3] %vm222_vm1, %v768_v47 }
 0x5ac   :  { %v774_v48 = vpop.permute.xlu1 %773 }
 0x5ad   :  { %776 = vst.msk [vmem:[#allocation9] sm:$0x3] %vm222_vm1, %v774_v48 }
 0x5b0   :  { %v805_v49 = vld [vmem:[#allocation8] sm:$0x3] }
 0x5b1   :  { %2789 = vmatmul.mubr.msk.f32.vlgmr.msra.gmra.mrb[8].mxu1 %vm50_vm0, %v805_v49 }
 0x5b2   :  { %2980 = vmatpush3.bf16.msra.mxu1 %v3385_v26  ;;  %2810 = vmatprep.mubr.msk.f32.mxu1 %vm3237_vm2, %v3238_v10 }
 0x5b3   :  { %2981 = vmatprep.subr.bf16.mxu1 %v3236_v6 }
 0x5b4   :  { %v806_v50 = vld [vmem:[#allocation9] sm:$0x3] }
 0x5b5   :  { %991 = vrot.lane.b32.xlu1 %v806_v50, %s3239_s5 }
 0x5b6   :  { %2983 = vmatpush3.bf16.msra.mxu1 %v3398_v29 }
 0x5b7   :  { %2990 = vmatprep.subr.bf16.mxu1 %v3236_v6 }
 0x5b8   :  { %v754_v51 = vpop.permute.xlu1 %753 }
 0x5b9   :  { %756 = vst.msk [vmem:[#allocation7] sm:$0x3] %vm222_vm1, %v754_v51 }
 0x5bb   :  { %v748_v52 = vpop.permute.xlu0 %747 }
 0x5bc   :  { %750 = vst.msk [vmem:[#allocation6] sm:$0x3] %vm222_vm1, %v748_v52 }
 0x5c0   :  { %v804_v53 = vld [vmem:[#allocation7] sm:$0x3] }
 0x5c1   :  { %963 = vrot.lane.b32.xlu1 %v804_v53, %s3239_s5 }
 0x5c3   :  { %v803_v55 = vld [vmem:[#allocation6] sm:$0x3] }
 0x5c4   :  { %2778 = vmatmul.mubr.msk.f32.vlgmr.msra.gmra.mrb[4].mxu0 %vm50_vm0, %v803_v55 }
 0x5c5   :  { %1035 = vperm.xlu1 %3059, %v1033_v54   ;;  %2974 = vmatpush3.bf16.msra.mxu0 %v3345_v13 }
 0x5c6   :  { %2975 = vmatprep.subr.bf16.mxu0 %v3236_v6  ;;  %2799 = vmatprep.mubr.msk.f32.mxu0 %vm3237_vm2, %v3238_v10 }
 0x5c9   :  { %1038 = vrot.lane.b32.xlu1 %v805_v49, %s3242_s0  ;;  %2977 = vmatpush3.bf16.msra.mxu0 %v3360_v19 }
 0x5ca   :  { %2984 = vmatprep.subr.bf16.mxu0 %v3236_v6 }
 0x627   :  { %v992_v32 = vpop.permute.xlu1 %991 }
 0x633   :  { %v964_v40 = vpop.permute.xlu1 %963 }
 0x644   :  { %v3565_v47 = vpop.permute.xlu1 %1035 }
 0x645   :  { %vm1037_vm14 = vcmp.eq.s32.totalorder %v3565_v47, 1 }
 0x648   :  { %v1039_v50 = vpop.permute.xlu1 %1038 }
 0x684   :  { %v950_v61 = vpop.f32.mrb[8].mxu1 }
 0x685   :  { %v954_v62 = vadd.f32 %v950_v61, %v802_v60  ;;  %v2790_v63 = vpop.f32.mrb[9].mxu1 }
 0x687   :  { %3092 = vtanh.f32 %v954_v62  ;;  %v2578_v11 = vmul.f32 -1.442695, %v954_v62 }
 0x691   :  { %v3093_v1 = vpop.eup %3092 }
 0x692   :  { %996 = vrot.lane.b32.xlu0 %v3093_v1, %s3241_s4 }
 0x697   :  { %v876_v5 = vpop.f32.mrb[4].mxu0 }
 0x698   :  { %v880_v7 = vadd.f32 %v876_v5, %v796_v4  ;;  %v2779_v8 = vpop.f32.mrb[5].mxu0  ;;  %v1074_v5 = vld [vmem:[#allocation3 + $0xc] sm:$0x1] }
 0x699   :  { %v1073_v8 = vld [vmem:[#allocation3 + $0x4] sm:$0x1] }
 0x69a   :  { %3094 = vtanh.f32 %v880_v7  ;;  %v2577_v15 = vmul.f32 -1.442695, %v880_v7  ;;  %v1076_v7 = vrot.slane %v1074_v5, 7 }
 0x69b   :  { %3096 = vpow2.f32 %v2578_v11 }
 0x6a4   :  { %v3095_v9 = vpop.eup %3094 }
 0x6a5   :  { %968 = vrot.lane.b32.xlu0 %v3095_v9, %s3241_s4  ;;  %v3097_v12 = vpop.eup %3096  ;;  %v1078_v9 = vsel %vm241_vm3, %v1073_v8, %v1076_v7 }
 0x6a6   :  { %v986_v14 = vadd.f32 1.0, %v3097_v12 }
 0x6a8   :  { %3098 = vrcp.f32 %v986_v14 }
 0x6a9   :  { %3100 = vpow2.f32 %v2577_v15  ;;  %v1068_v15 = vld [vmem:[#allocation2 + $0xb] sm:$0x1] }
 0x6b2   :  { %v3099_v16 = vpop.eup %3098 }
 0x6b3   :  { %v3101_v20 = vpop.eup %3100  ;;  %v994_v33 = vmul.f32 %v3099_v16, %v992_v32 }
 0x6b4   :  { %v958_v21 = vadd.f32 1.0, %v3101_v20 }
 0x6b6   :  { %3102 = vrcp.f32 %v958_v21 }
 0x6c0   :  { %v3103_v22 = vpop.eup %3102 }
 0x6c1   :  { %v966_v41 = vmul.f32 %v3103_v22, %v964_v40 }
 0x704   :  { %v997_v17 = vpop.permute.xlu0 %996 }
 0x705   :  { %v999_v18 = vmul.f32 %v3099_v16, %v997_v17  ;;  %v1070_v17 = vrot.slane %v1068_v15, 7 }
 0x707   :  { %1001 = vrot.lane.b32.xlu0 %v999_v18, %s3239_s5  ;;  %v1067_v18 = vld [vmem:[#allocation2 + $0x3] sm:$0x1] }
 0x708   :  { %v1072_v20 = vsel %vm241_vm3, %v1067_v18, %v1070_v17 }
 0x717   :  { %v969_v23 = vpop.permute.xlu0 %968 }
 0x718   :  { %v971_v25 = vmul.f32 %v3103_v22, %v969_v23 }
 0x71a   :  { %973 = vrot.lane.b32.xlu0 %v971_v25, %s3239_s5 }
 0x779   :  { %v1002_v30 = vpop.permute.xlu0 %1001 }
 0x77a   :  { %v1004_v36 = vadd.f32 %v1002_v30, %v994_v33 }
 0x77c   :  { %3104 = vtanh.f32 %v1004_v36  ;;  %v1047_v52 = vsel %vm1037_vm14, %v1004_v36, %v992_v32 }
 0x786   :  { %v3105_v38 = vpop.eup %3104 }
 0x787   :  { %1007 = vrot.lane.b32.xlu0 %v3105_v38, %s3241_s4 }
 0x78b   :  { %1015 = vperm.xlu0 %3058, %v1013_v39  }
 0x78c   :  { %v974_v43 = vpop.permute.xlu0 %973 }
 0x78d   :  { %v976_v45 = vadd.f32 %v974_v43, %v966_v41 }
 0x78f   :  { %3106 = vtanh.f32 %v976_v45  ;;  %1018 = vrot.lane.b32.xlu0 %v803_v55, %s3242_s0 }
 0x799   :  { %v3107_v46 = vpop.eup %3106 }
 0x79a   :  { %979 = vrot.lane.b32.xlu1 %v3107_v46, %s3241_s4 }
 0x7f9   :  { %v1008_v48 = vpop.permute.xlu0 %1007 }
 0x7fa   :  { %v3567_v49 = vmul.f32 %v3099_v16, %v1008_v48 }
 0x7fc   :  { %v1041_v51 = vsel %vm1037_vm14, %v3567_v49, %v1039_v50 }
 0x7fd   :  { %1043 = vrot.lane.b32.xlu1 %v1041_v51, %s3239_s5 }
 0x801   :  { %1049 = vrot.lane.b32.xlu1 %v1047_v52, %s3242_s0 }
 0x80a   :  { %v3577_v53 = vpop.permute.xlu0 %1015 }
 0x80b   :  { %vm1017_vm15 = vcmp.eq.s32.totalorder %v3577_v53, 1 }
 0x80c   :  { %v980_v54 = vpop.permute.xlu1 %979  ;;  %v1027_v55 = vsel %vm1017_vm15, %v976_v45, %v964_v40 }
 0x80d   :  { %v3582_v56 = vmul.f32 %v3103_v22, %v980_v54  ;;  %1029 = vrot.lane.b32.xlu1 %v1027_v55, %s3242_s0 }
 0x80e   :  { %v1019_v57 = vpop.permute.xlu0 %1018 }
 0x80f   :  { %v1021_v59 = vsel %vm1017_vm15, %v3582_v56, %v1019_v57  ;;  %v1289_v57 = vsel %vm1287_vm5, 1, %v3240_v31 }
 0x810   :  { %1023 = vrot.lane.b32.xlu0 %v1021_v59, %s3239_s5 }
 0x86f   :  { %v1044_v60 = vpop.permute.xlu1 %1043 }
 0x870   :  { %1046 = vst.msk [vmem:[#allocation8] sm:$0x3] %vm222_vm1, %v1044_v60 }
 0x873   :  { %v1050_v61 = vpop.permute.xlu1 %1049 }
 0x874   :  { %1052 = vst.msk [vmem:[#allocation9] sm:$0x3] %vm222_vm1, %v1050_v61 }
 0x877   :  { %v1081_v62 = vld [vmem:[#allocation8] sm:$0x3] }
 0x878   :  { %2811 = vmatmul.mubr.msk.f32.vlgmr.msra.gmra.mrb[10].mxu1 %vm50_vm0, %v1081_v62 }
 0x879   :  { %2992 = vmatpush3.bf16.msra.mxu1 %v3385_v26  ;;  %2832 = vmatprep.mubr.msk.f32.mxu1 %vm3237_vm2, %v3238_v10 }
 0x87a   :  { %2993 = vmatprep.subr.bf16.mxu1 %v3236_v6 }
 0x87b   :  { %v1082_v63 = vld [vmem:[#allocation9] sm:$0x3] }
 0x87c   :  { %1267 = vrot.lane.b32.xlu1 %v1082_v63, %s3239_s5 }
 0x87d   :  { %2995 = vmatpush3.bf16.msra.mxu1 %v3398_v29 }
 0x87e   :  { %3002 = vmatprep.subr.bf16.mxu1 %v3236_v6 }
 0x87f   :  { %v1030_v0 = vpop.permute.xlu1 %1029 }
 0x880   :  { %1032 = vst.msk [vmem:[#allocation7] sm:$0x3] %vm222_vm1, %v1030_v0 }
 0x882   :  { %v1024_v1 = vpop.permute.xlu0 %1023 }
 0x883   :  { %1026 = vst.msk [vmem:[#allocation6] sm:$0x3] %vm222_vm1, %v1024_v1 }
 0x887   :  { %v1080_v2 = vld [vmem:[#allocation7] sm:$0x3] }
 0x888   :  { %1239 = vrot.lane.b32.xlu1 %v1080_v2, %s3239_s5 }
 0x88a   :  { %v1079_v4 = vld [vmem:[#allocation6] sm:$0x3] }
 0x88b   :  { %2800 = vmatmul.mubr.msk.f32.vlgmr.msra.gmra.mrb[6].mxu0 %vm50_vm0, %v1079_v4 }
 0x88c   :  { %1311 = vperm.xlu1 %3059, %v1309_v3   ;;  %2986 = vmatpush3.bf16.msra.mxu0 %v3345_v13 }
 0x88d   :  { %2987 = vmatprep.subr.bf16.mxu0 %v3236_v6  ;;  %2821 = vmatprep.mubr.msk.f32.mxu0 %vm3237_vm2, %v3238_v10 }
 0x890   :  { %1314 = vrot.lane.b32.xlu1 %v1081_v62, %s3242_s0  ;;  %2989 = vmatpush3.bf16.msra.mxu0 %v3360_v19 }
 0x891   :  { %2996 = vmatprep.subr.bf16.mxu0 %v3236_v6 }
 0x8ee   :  { %v1268_v50 = vpop.permute.xlu1 %1267 }
 0x8fa   :  { %v1240_v59 = vpop.permute.xlu1 %1239 }
 0x90b   :  { %v3623_v0 = vpop.permute.xlu1 %1311 }
 0x90c   :  { %vm1313_vm8 = vcmp.eq.s32.totalorder %v3623_v0, 1 }
 0x90f   :  { %v1315_v2 = vpop.permute.xlu1 %1314 }
 0x94b   :  { %v1226_v11 = vpop.f32.mrb[10].mxu1 }
 0x94c   :  { %v1230_v12 = vadd.f32 %v1226_v11, %v1078_v9  ;;  %v2812_v14 = vpop.f32.mrb[11].mxu1 }
 0x94e   :  { %3108 = vtanh.f32 %v1230_v12  ;;  %v2582_v32 = vmul.f32 -1.442695, %v1230_v12 }
 0x958   :  { %v3109_v16 = vpop.eup %3108 }
 0x959   :  { %1272 = vrot.lane.b32.xlu0 %v3109_v16, %s3241_s4 }
 0x95e   :  { %v1152_v21 = vpop.f32.mrb[6].mxu0 }
 0x95f   :  { %v1156_v22 = vadd.f32 %v1152_v21, %v1072_v20  ;;  %v2801_v23 = vpop.f32.mrb[7].mxu0 }
 0x961   :  { %3110 = vtanh.f32 %v1156_v22  ;;  %v2581_v36 = vmul.f32 -1.442695, %v1156_v22  ;;  %v1350_v22 = vld [vmem:[#allocation3 + $0xb] sm:$0x1] }
 0x962   :  { %3112 = vpow2.f32 %v2582_v32  ;;  %v1352_v23 = vrot.slane %v1350_v22, 7 }
 0x96b   :  { %v3111_v25 = vpop.eup %3110 }
 0x96c   :  { %1244 = vrot.lane.b32.xlu0 %v3111_v25, %s3241_s4  ;;  %v3113_v33 = vpop.eup %3112  ;;  %v1349_v25 = vld [vmem:[#allocation3 + $0x3] sm:$0x1] }
 0x96d   :  { %v1262_v30 = vadd.f32 1.0, %v3113_v33  ;;  %v1354_v32 = vsel %vm241_vm3, %v1349_v25, %v1352_v23 }
 0x96f   :  { %3114 = vrcp.f32 %v1262_v30 }
 0x970   :  { %3116 = vpow2.f32 %v2581_v36 }
 0x979   :  { %v3115_v38 = vpop.eup %3114 }
 0x97a   :  { %v3117_v41 = vpop.eup %3116  ;;  %v1270_v51 = vmul.f32 %v3115_v38, %v1268_v50 }
 0x97b   :  { %v1234_v43 = vadd.f32 1.0, %v3117_v41  ;;  %v1343_v41 = vld [vmem:[#allocation2 + $0x4] sm:$0x1] }
 0x97d   :  { %3118 = vrcp.f32 %v1234_v43 }
 0x987   :  { %v3119_v45 = vpop.eup %3118 }
 0x988   :  { %v1242_v60 = vmul.f32 %v3119_v45, %v1240_v59 }
 0x9cb   :  { %v1273_v39 = vpop.permute.xlu0 %1272 }
 0x9cc   :  { %v1275_v40 = vmul.f32 %v3115_v38, %v1273_v39 }
 0x9ce   :  { %1277 = vrot.lane.b32.xlu0 %v1275_v40, %s3239_s5 }
 0x9de   :  { %v1245_v46 = vpop.permute.xlu0 %1244 }
 0x9df   :  { %v1247_v48 = vmul.f32 %v3119_v45, %v1245_v46 }
 0x9e1   :  { %1249 = vrot.lane.b32.xlu0 %v1247_v48, %s3239_s5 }
 0xa40   :  { %v1278_v52 = vpop.permute.xlu0 %1277 }
 0xa41   :  { %v1280_v54 = vadd.f32 %v1278_v52, %v1270_v51 }
 0xa43   :  { %3120 = vtanh.f32 %v1280_v54  ;;  %v1323_v3 = vsel %vm1313_vm8, %v1280_v54, %v1268_v50 }
 0xa4d   :  { %v3121_v55 = vpop.eup %3120 }
 0xa4e   :  { %1283 = vrot.lane.b32.xlu0 %v3121_v55, %s3241_s4 }
 0xa52   :  { %1291 = vperm.xlu0 %3058, %v1289_v57  }
 0xa53   :  { %v1250_v61 = vpop.permute.xlu0 %1249 }
 0xa54   :  { %v1252_v62 = vadd.f32 %v1250_v61, %v1242_v60 }
 0xa56   :  { %3122 = vtanh.f32 %v1252_v62  ;;  %1294 = vrot.lane.b32.xlu0 %v1079_v4, %s3242_s0 }
 0xa60   :  { %v3123_v63 = vpop.eup %3122 }
 0xa61   :  { %1255 = vrot.lane.b32.xlu1 %v3123_v63, %s3241_s4 }
 0xac0   :  { %v1284_v1 = vpop.permute.xlu0 %1283 }
 0xac1   :  { %v3625_v58 = vmul.f32 %v3115_v38, %v1284_v1  ;;  %v1344_v38 = vld [vmem:[#allocation2 + $0xc] sm:$0x1] }
 0xac2   :  { %v1346_v40 = vrot.slane %v1344_v38, 7 }
 0xac3   :  { %v1317_v31 = vsel %vm1313_vm8, %v3625_v58, %v1315_v2 }
 0xac4   :  { %1319 = vrot.lane.b32.xlu1 %v1317_v31, %s3239_s5  ;;  %v1348_v43 = vsel %vm241_vm3, %v1343_v41, %v1346_v40 }
 0xac8   :  { %1325 = vrot.lane.b32.xlu1 %v1323_v3, %s3242_s0 }
 0xad1   :  { %v3635_v4 = vpop.permute.xlu0 %1291 }
 0xad2   :  { %vm1293_vm9 = vcmp.eq.s32.totalorder %v3635_v4, 1  ;;  %v2426_v4 = vld [vmem:[%s4042_s8 + $0x18] sm:$0xff] }
 0xad3   :  { %v1256_v5 = vpop.permute.xlu1 %1255  ;;  %v1303_v7 = vsel %vm1293_vm9, %v1252_v62, %v1240_v59 }
 0xad4   :  { %v3640_v8 = vmul.f32 %v3119_v45, %v1256_v5  ;;  %1305 = vrot.lane.b32.xlu1 %v1303_v7, %s3242_s0 }
 0xad5   :  { %v1295_v9 = vpop.permute.xlu0 %1294 }
 0xad6   :  { %v1297_v11 = vsel %vm1293_vm9, %v3640_v8, %v1295_v9 }
 0xad7   :  { %1299 = vrot.lane.b32.xlu0 %v1297_v11, %s3239_s5 }
 0xb36   :  { %v1320_v12 = vpop.permute.xlu1 %1319 }
 0xb37   :  { %1322 = vst.msk [vmem:[#allocation8] sm:$0x3] %vm222_vm1, %v1320_v12 }
 0xb3a   :  { %v1326_v14 = vpop.permute.xlu1 %1325 }
 0xb3b   :  { %1328 = vst.msk [vmem:[#allocation9] sm:$0x3] %vm222_vm1, %v1326_v14 }
 0xb3e   :  { %v1357_v15 = vld [vmem:[#allocation8] sm:$0x3] }
 0xb3f   :  { %2833 = vmatmul.mubr.msk.f32.vlgmr.msra.gmra.mrb[12].mxu1 %vm50_vm0, %v1357_v15 }
 0xb40   :  { %3004 = vmatpush3.bf16.msra.mxu1 %v3385_v26  ;;  %2854 = vmatprep.mubr.msk.f32.mxu1 %vm3237_vm2, %v3238_v10 }
 0xb41   :  { %3005 = vmatprep.subr.bf16.mxu1 %v3236_v6 }
 0xb42   :  { %v1358_v16 = vld [vmem:[#allocation9] sm:$0x3] }
 0xb43   :  { %1543 = vrot.lane.b32.xlu1 %v1358_v16, %s3239_s5 }
 0xb44   :  { %3007 = vmatpush3.bf16.msra.mxu1 %v3398_v29 }
 0xb45   :  { %3014 = vmatprep.subr.bf16.mxu1 %v3236_v6 }
 0xb46   :  { %v1306_v17 = vpop.permute.xlu1 %1305 }
 0xb47   :  { %1308 = vst.msk [vmem:[#allocation7] sm:$0x3] %vm222_vm1, %v1306_v17 }
 0xb49   :  { %v1300_v18 = vpop.permute.xlu0 %1299 }
 0xb4a   :  { %1302 = vst.msk [vmem:[#allocation6] sm:$0x3] %vm222_vm1, %v1300_v18 }
 0xb4e   :  { %v1356_v20 = vld [vmem:[#allocation7] sm:$0x3] }
 0xb4f   :  { %1515 = vrot.lane.b32.xlu1 %v1356_v20, %s3239_s5 }
 0xb51   :  { %v1355_v21 = vld [vmem:[#allocation6] sm:$0x3] }
 0xb52   :  { %2822 = vmatmul.mubr.msk.f32.vlgmr.msra.gmra.mrb[8].mxu0 %vm50_vm0, %v1355_v21 }
 0xb53   :  { %2998 = vmatpush3.bf16.msra.mxu0 %v3345_v13  ;;  %2843 = vmatprep.mubr.msk.f32.mxu0 %vm3237_vm2, %v3238_v10 }
 0xb54   :  { %2999 = vmatprep.subr.bf16.mxu0 %v3236_v6 }
 0xb57   :  { %3001 = vmatpush3.bf16.msra.mxu0 %v3360_v19 }
 0xb58   :  { %3008 = vmatprep.subr.bf16.mxu0 %v3236_v6 }
 0xbb5   :  { %v1544_v31 = vpop.permute.xlu1 %1543 }
 0xbc1   :  { %v1516_v11 = vpop.permute.xlu1 %1515 }
 0xc12   :  { %v1502_v33 = vpop.f32.mrb[12].mxu1 }
 0xc13   :  { %v1506_v30 = vadd.f32 %v1502_v33, %v1354_v32  ;;  %v2834_v36 = vpop.f32.mrb[13].mxu1 }
 0xc15   :  { %3124 = vtanh.f32 %v1506_v30  ;;  %v2586_v51 = vmul.f32 -1.442695, %v1506_v30 }
 0xc1f   :  { %v3125_v39 = vpop.eup %3124 }
 0xc20   :  { %1548 = vrot.lane.b32.xlu0 %v3125_v39, %s3241_s4 }
 0xc25   :  { %v1428_v45 = vpop.f32.mrb[8].mxu0 }
 0xc26   :  { %v1432_v46 = vadd.f32 %v1428_v45, %v1348_v43  ;;  %v2823_v48 = vpop.f32.mrb[9].mxu0 }
 0xc27   :  { %v1614_v48 = vld [vmem:[#allocation3 + $0xa] sm:$0x1] }
 0xc28   :  { %3126 = vtanh.f32 %v1432_v46  ;;  %v2585_v55 = vmul.f32 -1.442695, %v1432_v46 }
 0xc29   :  { %3128 = vpow2.f32 %v2586_v51  ;;  %v1613_v51 = vld [vmem:[#allocation3 + $0x2] sm:$0x1] }
 0xc32   :  { %v3127_v50 = vpop.eup %3126 }
 0xc33   :  { %1520 = vrot.lane.b32.xlu0 %v3127_v50, %s3241_s4  ;;  %v3129_v52 = vpop.eup %3128  ;;  %v1616_v50 = vrot.slane %v1614_v48, 7 }
 0xc34   :  { %v1538_v54 = vadd.f32 1.0, %v3129_v52 }
 0xc35   :  { %v1618_v52 = vsel %vm241_vm3, %v1613_v51, %v1616_v50 }
 0xc36   :  { %3130 = vrcp.f32 %v1538_v54 }
 0xc37   :  { %3132 = vpow2.f32 %v2585_v55 }
 0xc40   :  { %v3131_v57 = vpop.eup %3130 }
 0xc41   :  { %v3133_v61 = vpop.eup %3132  ;;  %v1546_v3 = vmul.f32 %v3131_v57, %v1544_v31 }
 0xc42   :  { %v1510_v62 = vadd.f32 1.0, %v3133_v61 }
 0xc44   :  { %3134 = vrcp.f32 %v1510_v62  ;;  %v1607_v62 = vld [vmem:[#allocation2 + $0x5] sm:$0x1] }
 0xc4e   :  { %v3135_v63 = vpop.eup %3134 }
 0xc4f   :  { %v1518_v12 = vmul.f32 %v3135_v63, %v1516_v11 }
 0xc92   :  { %v1549_v59 = vpop.permute.xlu0 %1548 }
 0xc93   :  { %v1551_v60 = vmul.f32 %v3131_v57, %v1549_v59  ;;  %v1608_v59 = vld [vmem:[#allocation2 + $0xd] sm:$0x1] }
 0xc94   :  { %v1610_v61 = vrot.slane %v1608_v59, 7 }
 0xc95   :  { %1553 = vrot.lane.b32.xlu0 %v1551_v60, %s3239_s5 }
 0xca5   :  { %v1521_v1 = vpop.permute.xlu0 %1520 }
 0xca6   :  { %v1523_v2 = vmul.f32 %v3135_v63, %v1521_v1 }
 0xca8   :  { %1525 = vrot.lane.b32.xlu0 %v1523_v2, %s3239_s5 }
 0xcac   :  { %1578 = vrot.lane.b32.xlu0 %v1357_v15, %s3242_s0 }
 0xcb0   :  { %1563 = vrot.lane.b32.xlu0 %v1355_v21, %s3242_s0 }
 0xd07   :  { %v1554_v5 = vpop.permute.xlu0 %1553 }
 0xd08   :  { %v1556_v7 = vadd.f32 %v1554_v5, %v1546_v3 }
 0xd0a   :  { %3136 = vtanh.f32 %v1556_v7  ;;  %v1587_v22 = vsel %vm1293_vm9, %v1556_v7, %v1544_v31 }
 0xd14   :  { %v3137_v9 = vpop.eup %3136 }
 0xd15   :  { %1559 = vrot.lane.b32.xlu1 %v3137_v9, %s3241_s4 }
 0xd1a   :  { %v1526_v14 = vpop.permute.xlu0 %1525 }
 0xd1b   :  { %v1528_v16 = vadd.f32 %v1526_v14, %v1518_v12 }
 0xd1d   :  { %3138 = vtanh.f32 %v1528_v16  ;;  %v1572_v23 = vsel %vm1313_vm8, %v1528_v16, %v1516_v11 }
 0xd1e   :  { %v1579_v20 = vpop.permute.xlu0 %1578 }
 0xd22   :  { %v1564_v33 = vpop.permute.xlu0 %1563 }
 0xd27   :  { %v3139_v17 = vpop.eup %3138 }
 0xd28   :  { %1531 = vrot.lane.b32.xlu1 %v3139_v17, %s3241_s4 }
 0xd87   :  { %v1560_v18 = vpop.permute.xlu1 %1559 }
 0xd88   :  { %v3677_v15 = vmul.f32 %v3131_v57, %v1560_v18 }
 0xd8a   :  { %v1581_v21 = vsel %vm1293_vm9, %v3677_v15, %v1579_v20 }
 0xd8b   :  { %1583 = vrot.lane.b32.xlu1 %v1581_v21, %s3239_s5 }
 0xd8f   :  { %1589 = vrot.lane.b32.xlu1 %v1587_v22, %s3242_s0 }
 0xd93   :  { %1574 = vrot.lane.b32.xlu1 %v1572_v23, %s3242_s0 }
 0xd9a   :  { %v1532_v25 = vpop.permute.xlu1 %1531 }
 0xd9b   :  { %v3689_v32 = vmul.f32 %v3135_v63, %v1532_v25  ;;  %v1612_v63 = vsel %vm241_vm3, %v1607_v62, %v1610_v61 }
 0xd9d   :  { %v1566_v30 = vsel %vm1313_vm8, %v3689_v32, %v1564_v33 }
 0xd9e   :  { %1568 = vrot.lane.b32.xlu0 %v1566_v30, %s3239_s5 }
 0xdfd   :  { %v1584_v36 = vpop.permute.xlu1 %1583 }
 0xdfe   :  { %1586 = vst.msk [vmem:[#allocation8] sm:$0x3] %vm222_vm1, %v1584_v36 }
 0xe01   :  { %v1590_v38 = vpop.permute.xlu1 %1589 }
 0xe02   :  { %1592 = vst.msk [vmem:[#allocation9] sm:$0x3] %vm222_vm1, %v1590_v38 }
 0xe05   :  { %v1575_v39 = vpop.permute.xlu1 %1574  ;;  %v1621_v40 = vld [vmem:[#allocation8] sm:$0x3] }
 0xe06   :  { %1577 = vst.msk [vmem:[#allocation7] sm:$0x3] %vm222_vm1, %v1575_v39  ;;  %2855 = vmatmul.mubr.msk.f32.vlgmr.msra.gmra.mrb[14].mxu1 %vm50_vm0, %v1621_v40 }
 0xe07   :  { %3016 = vmatpush3.bf16.msra.mxu1 %v3385_v26  ;;  %2876 = vmatprep.mubr.msk.f32.mxu1 %vm3237_vm2, %v3238_v10 }
 0xe08   :  { %3017 = vmatprep.subr.bf16.mxu1 %v3236_v6 }
 0xe09   :  { %v1622_v41 = vld [vmem:[#allocation9] sm:$0x3] }
 0xe0a   :  { %1807 = vrot.lane.b32.xlu1 %v1622_v41, %s3239_s5 }
 0xe0b   :  { %3019 = vmatpush3.bf16.msra.mxu1 %v3398_v29 }
 0xe0c   :  { %3026 = vmatprep.subr.bf16.mxu1 %v3236_v6 }
 0xe0d   :  { %v1620_v43 = vld [vmem:[#allocation7] sm:$0x3] }
 0xe0e   :  { %1779 = vrot.lane.b32.xlu1 %v1620_v43, %s3239_s5 }
 0xe10   :  { %v1569_v45 = vpop.permute.xlu0 %1568 }
 0xe11   :  { %1571 = vst.msk [vmem:[#allocation6] sm:$0x3] %vm222_vm1, %v1569_v45 }
 0xe18   :  { %v1619_v46 = vld [vmem:[#allocation6] sm:$0x3] }
 0xe19   :  { %2844 = vmatmul.mubr.msk.f32.vlgmr.msra.gmra.mrb[10].mxu0 %vm50_vm0, %v1619_v46 }
 0xe1a   :  { %3010 = vmatpush3.bf16.msra.mxu0 %v3345_v13  ;;  %2865 = vmatprep.mubr.msk.f32.mxu0 %vm3237_vm2, %v3238_v10 }
 0xe1b   :  { %3011 = vmatprep.subr.bf16.mxu0 %v3236_v6 }
 0xe1e   :  { %3013 = vmatpush3.bf16.msra.mxu0 %v3360_v19 }
 0xe1f   :  { %3020 = vmatprep.subr.bf16.mxu0 %v3236_v6 }
 0xe7c   :  { %v1808_v23 = vpop.permute.xlu1 %1807 }
 0xe80   :  { %v1780_v38 = vpop.permute.xlu1 %1779 }
 0xed9   :  { %v1766_v54 = vpop.f32.mrb[14].mxu1 }
 0xeda   :  { %v1770_v55 = vadd.f32 %v1766_v54, %v1618_v52  ;;  %v2856_v57 = vpop.f32.mrb[15].mxu1 }
 0xedc   :  { %3140 = vtanh.f32 %v1770_v55  ;;  %v2590_v5 = vmul.f32 -1.442695, %v1770_v55 }
 0xee6   :  { %v3141_v60 = vpop.eup %3140 }
 0xee7   :  { %1812 = vrot.lane.b32.xlu0 %v3141_v60, %s3241_s4 }
 0xeec   :  { %v1692_v1 = vpop.f32.mrb[10].mxu0 }
 0xeed   :  { %v1696_v2 = vadd.f32 %v1692_v1, %v1612_v63  ;;  %v2845_v31 = vpop.f32.mrb[11].mxu0 }
 0xeef   :  { %3142 = vtanh.f32 %v1696_v2  ;;  %v2589_v11 = vmul.f32 -1.442695, %v1696_v2 }
 0xef0   :  { %3144 = vpow2.f32 %v2590_v5  ;;  %v1877_v5 = vld [vmem:[#allocation3 + $0x1] sm:$0x1] }
 0xef9   :  { %v3143_v3 = vpop.eup %3142 }
 0xefa   :  { %1784 = vrot.lane.b32.xlu0 %v3143_v3, %s3241_s4  ;;  %v3145_v7 = vpop.eup %3144 }
 0xefb   :  { %v1802_v9 = vadd.f32 1.0, %v3145_v7 }
 0xefd   :  { %3146 = vrcp.f32 %v1802_v9 }
 0xefe   :  { %3148 = vpow2.f32 %v2589_v11 }
 0xf07   :  { %v3147_v12 = vpop.eup %3146 }
 0xf08   :  { %v3149_v17 = vpop.eup %3148  ;;  %v1810_v25 = vmul.f32 %v3147_v12, %v1808_v23 }
 0xf09   :  { %v1774_v18 = vadd.f32 1.0, %v3149_v17  ;;  %v1871_v17 = vld [vmem:[#allocation2 + $0x6] sm:$0x1] }
 0xf0b   :  { %3150 = vrcp.f32 %v1774_v18 }
 0xf15   :  { %v3151_v20 = vpop.eup %3150 }
 0xf16   :  { %v1782_v39 = vmul.f32 %v3151_v20, %v1780_v38 }
 0xf59   :  { %v1813_v14 = vpop.permute.xlu0 %1812 }
 0xf5a   :  { %v1815_v16 = vmul.f32 %v3147_v12, %v1813_v14  ;;  %v1872_v14 = vld [vmem:[#allocation2 + $0xe] sm:$0x1] }
 0xf5c   :  { %1817 = vrot.lane.b32.xlu0 %v1815_v16, %s3239_s5 }
 0xf6c   :  { %v1785_v21 = vpop.permute.xlu0 %1784 }
 0xf6d   :  { %v1787_v22 = vmul.f32 %v3151_v20, %v1785_v21 }
 0xf6f   :  { %1789 = vrot.lane.b32.xlu0 %v1787_v22, %s3239_s5 }
 0xf73   :  { %1842 = vrot.lane.b32.xlu0 %v1621_v40, %s3242_s0 }
 0xf77   :  { %1827 = vrot.lane.b32.xlu0 %v1619_v46, %s3242_s0 }
 0xfce   :  { %v1818_v33 = vpop.permute.xlu0 %1817 }
 0xfcf   :  { %v1820_v30 = vadd.f32 %v1818_v33, %v1810_v25 }
 0xfd1   :  { %3152 = vtanh.f32 %v1820_v30  ;;  %v1851_v51 = vsel %vm1017_vm15, %v1820_v30, %v1808_v23 }
 0xfdb   :  { %v3153_v36 = vpop.eup %3152 }
 0xfdc   :  { %1823 = vrot.lane.b32.xlu1 %v3153_v36, %s3241_s4 }
 0xfe1   :  { %v1790_v41 = vpop.permute.xlu0 %1789 }
 0xfe2   :  { %v1792_v43 = vadd.f32 %v1790_v41, %v1782_v39 }
 0xfe4   :  { %3154 = vtanh.f32 %v1792_v43  ;;  %v1836_v52 = vsel %vm1037_vm14, %v1792_v43, %v1780_v38 }
 0xfe5   :  { %v1843_v46 = vpop.permute.xlu0 %1842 }
 0xfe9   :  { %v1828_v57 = vpop.permute.xlu0 %1827 }
 0xfee   :  { %v3155_v45 = vpop.eup %3154 }
 0xfef   :  { %1795 = vrot.lane.b32.xlu1 %v3155_v45, %s3241_s4 }
0x104e   :  { %v1824_v48 = vpop.permute.xlu1 %1823 }
0x104f   :  { %v3725_v40 = vmul.f32 %v3147_v12, %v1824_v48 }
0x1051   :  { %v1845_v50 = vsel %vm1017_vm15, %v3725_v40, %v1843_v46 }
0x1052   :  { %1847 = vrot.lane.b32.xlu1 %v1845_v50, %s3239_s5 }
0x1056   :  { %1853 = vrot.lane.b32.xlu1 %v1851_v51, %s3242_s0 }
0x105a   :  { %1838 = vrot.lane.b32.xlu1 %v1836_v52, %s3242_s0 }
0x1061   :  { %v1796_v54 = vpop.permute.xlu1 %1795 }
0x1062   :  { %v3737_v55 = vmul.f32 %v3151_v20, %v1796_v54 }
0x1064   :  { %v1830_v59 = vsel %vm1037_vm14, %v3737_v55, %v1828_v57 }
0x1065   :  { %1832 = vrot.lane.b32.xlu0 %v1830_v59, %s3239_s5 }
0x10c4   :  { %v1848_v60 = vpop.permute.xlu1 %1847 }
0x10c5   :  { %1850 = vst.msk [vmem:[#allocation8] sm:$0x3] %vm222_vm1, %v1848_v60 }
0x10c8   :  { %v1854_v61 = vpop.permute.xlu1 %1853 }
0x10c9   :  { %1856 = vst.msk [vmem:[#allocation9] sm:$0x3] %vm222_vm1, %v1854_v61 }
0x10cc   :  { %v1839_v62 = vpop.permute.xlu1 %1838  ;;  %v1885_v63 = vld [vmem:[#allocation8] sm:$0x3] }
0x10cd   :  { %1841 = vst.msk [vmem:[#allocation7] sm:$0x3] %vm222_vm1, %v1839_v62  ;;  %2877 = vmatmul.mubr.msk.f32.vlgmr.msra.gmra.mrb[16].mxu1 %vm50_vm0, %v1885_v63 }
0x10ce   :  { %3028 = vmatpush3.bf16.msra.mxu1 %v3385_v26  ;;  %2898 = vmatprep.mubr.msk.f32.mxu1 %vm3237_vm2, %v3238_v10  ;;  %v1878_v26 = vld [vmem:[#allocation3 + $0x9] sm:$0x1] }
0x10cf   :  { %3029 = vmatprep.subr.bf16.mxu1 %v3236_v6 }
0x10d0   :  { %v1886_v1 = vld [vmem:[#allocation9] sm:$0x3] }
0x10d1   :  { %2071 = vrot.lane.b32.xlu1 %v1886_v1, %s3239_s5 }
0x10d2   :  { %3031 = vmatpush3.bf16.msra.mxu1 %v3398_v29  ;;  %v1880_v29 = vrot.slane %v1878_v26, 7 }
0x10d4   :  { %v1884_v2 = vld [vmem:[#allocation7] sm:$0x3]  ;;  %v1882_v7 = vsel %vm241_vm3, %v1877_v5, %v1880_v29 }
0x10d5   :  { %2043 = vrot.lane.b32.xlu1 %v1884_v2, %s3239_s5 }
0x10d7   :  { %v1833_v31 = vpop.permute.xlu0 %1832 }
0x10d8   :  { %1835 = vst.msk [vmem:[#allocation6] sm:$0x3] %vm222_vm1, %v1833_v31 }
0x10df   :  { %v1883_v3 = vld [vmem:[#allocation6] sm:$0x3] }
0x10e0   :  { %2866 = vmatmul.mubr.msk.f32.vlgmr.msra.gmra.mrb[12].mxu0 %vm50_vm0, %v1883_v3 }
0x10e1   :  { %3022 = vmatpush3.bf16.msra.mxu0 %v3345_v13  ;;  %2887 = vmatprep.mubr.msk.f32.mxu0 %vm3237_vm2, %v3238_v10  ;;  %v1874_v13 = vrot.slane %v1872_v14, 7  ;;  %vm505_vm2 = vcmask 253952  }
0x10e2   :  { %3023 = vmatprep.subr.bf16.mxu0 %v3236_v6 }
0x10e3   :  { %v1876_v10 = vsel %vm241_vm3, %v1871_v17, %v1874_v13 }
0x10e5   :  { %3025 = vmatpush3.bf16.msra.mxu0 %v3360_v19 }
0x1143   :  { %v2072_v48 = vpop.permute.xlu1 %2071 }
0x1147   :  { %v2044_v54 = vpop.permute.xlu1 %2043 }
0x11a0   :  { %v2030_v9 = vpop.f32.mrb[16].mxu1 }
0x11a1   :  { %v2034_v11 = vadd.f32 %v2030_v9, %v1882_v7  ;;  %v2878_v12 = vpop.f32.mrb[17].mxu1 }
0x11a3   :  { %3156 = vtanh.f32 %v2034_v11  ;;  %v2594_v21 = vmul.f32 -1.442695, %v2034_v11 }
0x11ad   :  { %v3157_v16 = vpop.eup %3156 }
0x11ae   :  { %2076 = vrot.lane.b32.xlu0 %v3157_v16, %s3241_s4 }
0x11b3   :  { %v1956_v6 = vpop.f32.mrb[12].mxu0 }
0x11b4   :  { %v1960_v18 = vadd.f32 %v1956_v6, %v1876_v10  ;;  %v2867_v19 = vpop.f32.mrb[13].mxu0  ;;  %v2142_v6 = vld [vmem:[#allocation3 + $0x8] sm:$0x1] }
0x11b5   :  { %v2141_v19 = vld [vmem:[#allocation3] sm:$0x1] }
0x11b6   :  { %3158 = vtanh.f32 %v1960_v18  ;;  %v2593_v25 = vmul.f32 -1.442695, %v1960_v18  ;;  %v2144_v18 = vrot.slane %v2142_v6, 7 }
0x11b7   :  { %3160 = vpow2.f32 %v2594_v21 }
0x11c0   :  { %v3159_v20 = vpop.eup %3158 }
0x11c1   :  { %2048 = vrot.lane.b32.xlu0 %v3159_v20, %s3241_s4  ;;  %v3161_v22 = vpop.eup %3160  ;;  %v2146_v20 = vsel %vm241_vm3, %v2141_v19, %v2144_v18  ;;  %v1053_v18 = vsel %vm1017_vm15, %v3582_v56, 0.0 }
0x11c2   :  { %v2066_v23 = vadd.f32 1.0, %v3161_v22 }
0x11c4   :  { %3162 = vrcp.f32 %v2066_v23 }
0x11c5   :  { %3164 = vpow2.f32 %v2593_v25  ;;  %v2136_v25 = vld [vmem:[#allocation2 + $0xf] sm:$0x1] }
0x11ce   :  { %v3163_v33 = vpop.eup %3162 }
0x11cf   :  { %v3165_v38 = vpop.eup %3164  ;;  %v2074_v46 = vmul.f32 %v3163_v33, %v2072_v48 }
0x11d0   :  { %v2038_v39 = vadd.f32 1.0, %v3165_v38 }
0x11d2   :  { %3166 = vrcp.f32 %v2038_v39 }
0x11dc   :  { %v3167_v41 = vpop.eup %3166 }
0x11dd   :  { %v2046_v57 = vmul.f32 %v3167_v41, %v2044_v54 }
0x1220   :  { %v2077_v30 = vpop.permute.xlu0 %2076 }
0x1221   :  { %v2079_v36 = vmul.f32 %v3163_v33, %v2077_v30  ;;  %v2138_v30 = vrot.slane %v2136_v25, 7  ;;  %v1857_v25 = vsel %vm1037_vm14, %v3737_v55, 0.0 }
0x1223   :  { %2081 = vrot.lane.b32.xlu0 %v2079_v36, %s3239_s5  ;;  %v2135_v36 = vld [vmem:[#allocation2 + $0x7] sm:$0x1] }
0x1224   :  { %v2140_v38 = vsel %vm241_vm3, %v2135_v36, %v2138_v30  ;;  %vm512_vm3 = vcmask 254977   ;;  %v2429_v36 = vld [vmem:[%s4042_s8 + $0x30] sm:$0xff] }
0x1233   :  { %v2049_v43 = vpop.permute.xlu0 %2048 }
0x1234   :  { %v2051_v45 = vmul.f32 %v3167_v41, %v2049_v43 }
0x1236   :  { %2053 = vrot.lane.b32.xlu0 %v2051_v45, %s3239_s5 }
0x123a   :  { %2106 = vrot.lane.b32.xlu0 %v1885_v63, %s3242_s0 }
0x123e   :  { %2091 = vrot.lane.b32.xlu0 %v1883_v3, %s3242_s0 }
0x1295   :  { %v2082_v50 = vpop.permute.xlu0 %2081 }
0x1296   :  { %v2084_v51 = vadd.f32 %v2082_v50, %v2074_v46 }
0x1298   :  { %3168 = vtanh.f32 %v2084_v51  ;;  %v2115_v31 = vsel %vm741_vm11, %v2084_v51, %v2072_v48 }
0x12a2   :  { %v3169_v52 = vpop.eup %3168 }
0x12a3   :  { %2087 = vrot.lane.b32.xlu1 %v3169_v52, %s3241_s4 }
0x12a8   :  { %v2054_v59 = vpop.permute.xlu0 %2053 }
0x12a9   :  { %v2056_v60 = vadd.f32 %v2054_v59, %v2046_v57 }
0x12ab   :  { %3170 = vtanh.f32 %v2056_v60  ;;  %v2100_v3 = vsel %vm761_vm10, %v2056_v60, %v2044_v54 }
0x12ac   :  { %v2107_v1 = vpop.permute.xlu0 %2106 }
0x12b0   :  { %v2092_v5 = vpop.permute.xlu0 %2091 }
0x12b5   :  { %v3171_v61 = vpop.eup %3170 }
0x12b6   :  { %2059 = vrot.lane.b32.xlu1 %v3171_v61, %s3241_s4 }
0x1315   :  { %v2088_v62 = vpop.permute.xlu1 %2087 }
0x1316   :  { %v3771_v63 = vmul.f32 %v3163_v33, %v2088_v62 }
0x1318   :  { %v2109_v2 = vsel %vm741_vm11, %v3771_v63, %v2107_v1 }
0x1319   :  { %2111 = vrot.lane.b32.xlu1 %v2109_v2, %s3239_s5 }
0x131d   :  { %2117 = vrot.lane.b32.xlu1 %v2115_v31, %s3242_s0 }
0x1321   :  { %2102 = vrot.lane.b32.xlu1 %v2100_v3, %s3242_s0 }
0x1328   :  { %v2060_v26 = vpop.permute.xlu1 %2059 }
0x1329   :  { %v3783_v29 = vmul.f32 %v3167_v41, %v2060_v26 }
0x132b   :  { %v2094_v7 = vsel %vm761_vm10, %v3783_v29, %v2092_v5  ;;  %v2121_v56 = vsel %vm761_vm10, %v3783_v29, 0.0  ;;  %v2423_v29 = vld [vmem:[%s4042_s8] sm:$0xff] }
0x132c   :  { %2096 = vrot.lane.b32.xlu0 %v2094_v7, %s3239_s5 }
0x138b   :  { %v2112_v9 = vpop.permute.xlu1 %2111 }
0x138c   :  { %2114 = vst.msk [vmem:[#allocation8] sm:$0x3] %vm222_vm1, %v2112_v9  ;;  %v500_v9 = vsel %vm483_vm6, %v3447_v27, 0.0  ;;  %v1594_v27 = vsel %vm1293_vm9, %v3677_v15, 0.0  ;;  %v778_v15 = vsel %vm761_vm10, %v3509_v37, 0.0  ;;  %v1858_v37 = vsel %vm1017_vm15, %v3725_v40, 0.0 }
0x138d   :  { %v1329_v40 = vsel %vm1293_vm9, %v3640_v8, 0.0  ;;  %v3036_v8 = vpack.c.bf16 %v2426_v4, %v2425_v44  ;;  %vm2431_vm10 = vcmask 523264  }
0x138f   :  { %v2118_v11 = vpop.permute.xlu1 %2117 }
0x1390   :  { %2120 = vst.msk [vmem:[#allocation9] sm:$0x3] %vm222_vm1, %v2118_v11 }
0x1393   :  { %v2103_v12 = vpop.permute.xlu1 %2102  ;;  %v3791_v14 = vld [vmem:[#allocation8] sm:$0x3] }
0x1394   :  { %2105 = vst.msk [vmem:[#allocation7] sm:$0x3] %vm222_vm1, %v2103_v12  ;;  %2899 = vmatmul.mubr.msk.f32.vlgmr.msra.gmra.mrb[18].mxu1 %vm50_vm0, %v3791_v14 }
0x1397   :  { %v2150_v16 = vld [vmem:[#allocation9] sm:$0x3] }
0x1398   :  { %2335 = vrot.lane.b32.xlu1 %v2150_v16, %s3239_s5 }
0x139b   :  { %v2148_v13 = vld [vmem:[#allocation7] sm:$0x3] }
0x139c   :  { %2307 = vrot.lane.b32.xlu1 %v2148_v13, %s3239_s5  ;;  %v1054_v13 = vsel %vm1037_vm14, %v3567_v49, 0.0  ;;  %v499_v49 = vsel %vm463_vm7, %v3456_v35, 0.0  ;;  %v1593_v35 = vsel %vm1313_vm8, %v3689_v32, 0.0 }
0x139e   :  { %v2097_v17 = vpop.permute.xlu0 %2096 }
0x139f   :  { %2099 = vst.msk [vmem:[#allocation6] sm:$0x3] %vm222_vm1, %v2097_v17  ;;  %v2122_v17 = vsel %vm741_vm11, %v3771_v63, 0.0  ;;  %v1330_v63 = vsel %vm1313_vm8, %v3625_v58, 0.0 }
0x13a6   :  { %v3799_v10 = vld [vmem:[#allocation6] sm:$0x3] }
0x13a7   :  { %2888 = vmatmul.mubr.msk.f32.vlgmr.msra.gmra.mrb[14].mxu0 %vm50_vm0, %v3799_v10 }
0x140a   :  { %v3812_v2 = vpop.permute.xlu1 %2335 }
0x140e   :  { %v3819_v7 = vpop.permute.xlu1 %2307 }
0x1467   :  { %v2294_v21 = vpop.f32.mrb[18].mxu1 }
0x1468   :  { %v2298_v22 = vadd.f32 %v2294_v21, %v2146_v20  ;;  %v2900_v23 = vpop.f32.mrb[19].mxu1  ;;  %v3032_v21 = vpack.c.bf16 %v2424_v42, %v2423_v29 }
0x1469   :  { %v2428_v23 = vld [vmem:[%s4042_s8 + $0x28] sm:$0xff] }
0x146a   :  { %3172 = vtanh.f32 %v2298_v22  ;;  %v2598_v48 = vmul.f32 -1.442695, %v2298_v22  ;;  %v2427_v22 = vld [vmem:[%s4042_s8 + $0x20] sm:$0xff]  ;;  %3033 = vmatprep.subr.bf16.mxu0 %v3032_v21 }
0x146b   :  { %3035 = vmatpush3.bf16.msra.mxu0 %v3032_v21  ;;  %v3040_v30 = vpack.c.bf16 %v2428_v23, %v2427_v22 }
0x146c   :  { %3037 = vmatprep.subr.bf16.mxu0 %v3036_v8 }
0x146f   :  { %3039 = vmatpush3.bf16.msra.mxu0 %v3036_v8 }
0x1470   :  { %3041 = vmatprep.subr.bf16.mxu0 %v3040_v30 }
0x1473   :  { %3043 = vmatpush3.bf16.msra.mxu0 %v3040_v30 }
0x1474   :  { %v3173_v33 = vpop.eup %3172 }
0x1475   :  { %2340 = vrot.lane.b32.xlu0 %v3173_v33, %s3241_s4 }
0x147a   :  { %v2220_v39 = vpop.f32.mrb[14].mxu0 }
0x147b   :  { %v2224_v41 = vadd.f32 %v2220_v39, %v2140_v38  ;;  %v2889_v43 = vpop.f32.mrb[15].mxu0  ;;  %v2430_v38 = vld [vmem:[%s4042_s8 + $0x38] sm:$0xff]  ;;  %s3243_s8 = smov [#allocation10]  }
0x147c   :  { %s2532_s29 = sshll.u32 %s3243_s8, 4  ;;  %s2533_s29 = int_to_ptr.vmem [resolvable:$true] %s2532_s29 }
0x147d   :  { %3174 = vtanh.f32 %v2224_v41  ;;  %v2597_v51 = vmul.f32 -1.442695, %v2224_v41  ;;  %v3044_v41 = vpack.c.bf16 %v2430_v38, %v2429_v36  ;;  %s3188_s2 = scalar_lea.vmem %s2533_s29, 64  ;;  %p3193_p1 = scmp.lt.s32.totalorder %s2533_s29, %s2533_s29 }
0x147e   :  { %3176 = vpow2.f32 %v2598_v48  ;;  %p3189_p0 = scmp.ne.s32.totalorder %s2533_s29, %s3188_s2  ;;  %p3194_p2 = scmp.lt.s32.totalorder %s3188_s2, %s3188_s2 }
0x147f   :  { %3045 = vmatprep.subr.bf16.mxu0 %v3044_v41 }
0x1480   :  { %3047 = vmatpush3.bf16.msra.mxu0 %v3044_v41  ;;  %p3195_p3 = por %p3194_p2, %p3193_p1 }
0x1482   :  { %p3196_p4 = pnand %p3195_p3, %p3189_p0 }
0x1487   :  { %v3175_v45 = vpop.eup %3174 }
0x1488   :  { %2312 = vrot.lane.b32.xlu0 %v3175_v45, %s3241_s4  ;;  %v3177_v46 = vpop.eup %3176 }
0x1489   :  { %v2330_v50 = vadd.f32 1.0, %v3177_v46 }
0x148b   :  { %3178 = vrcp.f32 %v2330_v50 }
0x148c   :  { %3180 = vpow2.f32 %v2597_v51 }
0x1495   :  { %v3179_v52 = vpop.eup %3178 }
0x1496   :  { %v3181_v59 = vpop.eup %3180  ;;  %v2338_v31 = vmul.f32 %v3179_v52, %v3812_v2 }
0x1497   :  { %v2302_v60 = vadd.f32 1.0, %v3181_v59 }
0x1499   :  { %3182 = vrcp.f32 %v2302_v60 }
0x14a3   :  { %v3808_v61 = vpop.eup %3182 }
0x14a4   :  { %v2310_v11 = vmul.f32 %v3808_v61, %v3819_v7 }
0x14e7   :  { %v2341_v54 = vpop.permute.xlu0 %2340 }
0x14e8   :  { %v2343_v57 = vmul.f32 %v3179_v52, %v2341_v54 }
0x14ea   :  { %2345 = vrot.lane.b32.xlu0 %v2343_v57, %s3239_s5 }
0x14fa   :  { %v2313_v62 = vpop.permute.xlu0 %2312 }
0x14fb   :  { %v2315_v1 = vmul.f32 %v3808_v61, %v2313_v62 }
0x14fd   :  { %2317 = vrot.lane.b32.xlu0 %v2315_v1, %s3239_s5 }
0x155c   :  { %v2346_v3 = vpop.permute.xlu0 %2345 }
0x155d   :  { %v3815_v26 = vadd.f32 %v2346_v3, %v2338_v31 }
0x155f   :  { %3184 = vtanh.f32 %v3815_v26 }
0x1569   :  { %v3185_v5 = vpop.eup %3184 }
0x156a   :  { %2351 = vrot.lane.b32.xlu1 %v3185_v5, %s3241_s4 }
0x156e   :  { %508 = vrot.lane.b32.xlu1 %v500_v9, %s3239_s5 }
0x156f   :  { %v2318_v12 = vpop.permute.xlu0 %2317 }
0x1570   :  { %v3827_v16 = vadd.f32 %v2318_v12, %v2310_v11 }
0x1572   :  { %3186 = vtanh.f32 %v3827_v16  ;;  %1061 = vrot.lane.b32.xlu1 %v1054_v13, %s3239_s5  ;;  %v2364_v1 = vsel %vm483_vm6, %v3827_v16, %v3819_v7 }
0x1576   :  { %1601 = vrot.lane.b32.xlu1 %v1594_v27, %s3239_s5 }
0x157a   :  { %2129 = vrot.lane.b32.xlu1 %v2122_v17, %s3239_s5 }
0x157c   :  { %v3187_v6 = vpop.eup %3186 }
0x157d   :  { %2323 = vrot.lane.b32.xlu0 %v3187_v6, %s3241_s4 }
0x157e   :  { %502 = vrot.lane.b32.xlu1 %v499_v49, %s3239_s5 }
0x1581   :  { %785 = vrot.lane.b32.xlu0 %v778_v15, %s3239_s5 }
0x1582   :  { %1056 = vrot.lane.b32.xlu1 %v1053_v18, %s3239_s5 }
0x1585   :  { %1337 = vrot.lane.b32.xlu0 %v1330_v63, %s3239_s5 }
0x1586   :  { %1596 = vrot.lane.b32.xlu1 %v1593_v35, %s3239_s5 }
0x1589   :  { %1865 = vrot.lane.b32.xlu0 %v1858_v37, %s3239_s5 }
0x158a   :  { %2124 = vrot.lane.b32.xlu1 %v2121_v56, %s3239_s5 }
0x15dc   :  { %v2352_v58 = vpop.permute.xlu1 %2351 }
0x15dd   :  { %v3871_v19 = vmul.f32 %v3179_v52, %v2352_v58 }
0x15df   :  { %v2386_v0 = vsel %vm463_vm7, %v3871_v19, 0.0 }
0x15e0   :  { %2393 = vrot.lane.b32.xlu0 %v2386_v0, %s3239_s5  ;;  %v509_v53 = vpop.permute.xlu1 %508 }
0x15e1   :  { %511 = vst.msk [vmem:[#allocation5 + $0x7] sm:$0x1] %vm505_vm2, %v509_v53 }
0x15e2   :  { %514 = vst.msk [vmem:[#allocation5 + $0xe] sm:$0x2] %vm512_vm3, %v509_v53 }
0x15e4   :  { %780 = vrot.lane.b32.xlu0 %v777_v34, %s3239_s5  ;;  %v1062_v32 = vpop.permute.xlu1 %1061 }
0x15e5   :  { %1064 = vst.msk [vmem:[#allocation5 + $0x5] sm:$0x1] %vm505_vm2, %v1062_v32 }
0x15e6   :  { %1066 = vst.msk [vmem:[#allocation5 + $0xc] sm:$0x2] %vm512_vm3, %v1062_v32 }
0x15e8   :  { %1332 = vrot.lane.b32.xlu0 %v1329_v40, %s3239_s5  ;;  %v1602_v20 = vpop.permute.xlu1 %1601 }
0x15e9   :  { %1604 = vst.msk [vmem:[#allocation5 + $0x3] sm:$0x1] %vm505_vm2, %v1602_v20 }
0x15ea   :  { %1606 = vst.msk [vmem:[#allocation5 + $0xa] sm:$0x2] %vm512_vm3, %v1602_v20 }
0x15ec   :  { %1860 = vrot.lane.b32.xlu0 %v1857_v25, %s3239_s5  ;;  %v2130_v33 = vpop.permute.xlu1 %2129 }
0x15ed   :  { %2132 = vst.msk [vmem:[#allocation5 + $0x1] sm:$0x1] %vm505_vm2, %v2130_v33 }
0x15ee   :  { %2134 = vst.msk [vmem:[#allocation5 + $0x8] sm:$0x2] %vm512_vm3, %v2130_v33 }
0x15ef   :  { %v2324_v47 = vpop.permute.xlu0 %2323 }
0x15f0   :  { %v3922_v55 = vmul.f32 %v3808_v61, %v2324_v47  ;;  %v503_v39 = vpop.permute.xlu1 %502 }
0x15f1   :  { %506 = vst.msk [vmem:[#allocation4] sm:$0x1] %vm505_vm2, %v503_v39 }
0x15f2   :  { %513 = vst.msk [vmem:[#allocation4 + $0x7] sm:$0x2] %vm512_vm3, %v503_v39  ;;  %v2385_v43 = vsel %vm483_vm6, %v3922_v55, 0.0 }
0x15f3   :  { %v786_v45 = vpop.permute.xlu0 %785  ;;  %2388 = vrot.lane.b32.xlu0 %v2385_v43, %s3239_s5 }
0x15f4   :  { %788 = vst.msk [vmem:[#allocation5 + $0x6] sm:$0x1] %vm505_vm2, %v786_v45  ;;  %v1057_v48 = vpop.permute.xlu1 %1056 }
0x15f5   :  { %790 = vst.msk [vmem:[#allocation5 + $0xd] sm:$0x2] %vm512_vm3, %v786_v45  ;;  %1065 = vst.msk [vmem:[#allocation4 + $0x9] sm:$0x2] %vm512_vm3, %v1057_v48 }
0x15f6   :  { %1059 = vst.msk [vmem:[#allocation4 + $0x2] sm:$0x1] %vm505_vm2, %v1057_v48 }
0x15f7   :  { %v1338_v46 = vpop.permute.xlu0 %1337 }
0x15f8   :  { %1340 = vst.msk [vmem:[#allocation5 + $0x4] sm:$0x1] %vm505_vm2, %v1338_v46  ;;  %v1597_v50 = vpop.permute.xlu1 %1596 }
0x15f9   :  { %1342 = vst.msk [vmem:[#allocation5 + $0xb] sm:$0x2] %vm512_vm3, %v1338_v46  ;;  %1605 = vst.msk [vmem:[#allocation4 + $0xb] sm:$0x2] %vm512_vm3, %v1597_v50 }
0x15fa   :  { %1599 = vst.msk [vmem:[#allocation4 + $0x4] sm:$0x1] %vm505_vm2, %v1597_v50 }
0x15fb   :  { %v1866_v51 = vpop.permute.xlu0 %1865 }
0x15fc   :  { %1868 = vst.msk [vmem:[#allocation5 + $0x2] sm:$0x1] %vm505_vm2, %v1866_v51  ;;  %v2125_v52 = vpop.permute.xlu1 %2124 }
0x15fd   :  { %1870 = vst.msk [vmem:[#allocation5 + $0x9] sm:$0x2] %vm512_vm3, %v1866_v51  ;;  %2133 = vst.msk [vmem:[#allocation4 + $0xd] sm:$0x2] %vm512_vm3, %v2125_v52 }
0x15fe   :  { %2127 = vst.msk [vmem:[#allocation4 + $0x6] sm:$0x1] %vm505_vm2, %v2125_v52 }
0x1652   :  { %v2394_v54 = vpop.permute.xlu0 %2393 }
0x1653   :  { %2396 = vst.msk [vmem:[#allocation5] sm:$0x1] %vm505_vm2, %v2394_v54 }
0x1654   :  { %2398 = vst.msk [vmem:[#allocation5 + $0x7] sm:$0x2] %vm512_vm3, %v2394_v54 }
0x1656   :  { %v781_v57 = vpop.permute.xlu0 %780 }
0x1657   :  { %783 = vst.msk [vmem:[#allocation4 + $0x1] sm:$0x1] %vm505_vm2, %v781_v57 }
0x1658   :  { %789 = vst.msk [vmem:[#allocation4 + $0x8] sm:$0x2] %vm512_vm3, %v781_v57 }
0x165a   :  { %v1333_v59 = vpop.permute.xlu0 %1332  ;;  %v2411_v61 = vld [vmem:[#allocation5] sm:$0xff] }
0x165b   :  { %v2412_v60 = vld [vmem:[#allocation5 + $0x8] sm:$0xff]  ;;  %1335 = vst.msk [vmem:[#allocation4 + $0x3] sm:$0x1] %vm505_vm2, %v1333_v59  ;;  %2415 = vrot.lane.b32.xlu1 %v2411_v61, %s3239_s5 }
0x165c   :  { %1341 = vst.msk [vmem:[#allocation4 + $0xa] sm:$0x2] %vm512_vm3, %v1333_v59  ;;  %2417 = vrot.lane.b32.xlu0 %v2412_v60, %s3239_s5 }
0x165e   :  { %v1861_v62 = vpop.permute.xlu0 %1860 }
0x165f   :  { %1863 = vst.msk [vmem:[#allocation4 + $0x5] sm:$0x1] %vm505_vm2, %v1861_v62  ;;  %2355 = vrot.lane.b32.xlu1 %v3799_v10, %s3242_s0 }
0x1660   :  { %1869 = vst.msk [vmem:[#allocation4 + $0xc] sm:$0x2] %vm512_vm3, %v1861_v62  ;;  %2370 = vrot.lane.b32.xlu0 %v3791_v14, %s3242_s0  ;;  %v2379_v14 = vsel %vm463_vm7, %v3815_v26, %v3812_v2 }
0x1664   :  { %2366 = vrot.lane.b32.xlu0 %v2364_v1, %s3242_s0 }
0x1665   :  { %v2389_v31 = vpop.permute.xlu0 %2388 }
0x1666   :  { %2391 = vst.msk [vmem:[#allocation4 + $0x7] sm:$0x1] %vm505_vm2, %v2389_v31 }
0x1667   :  { %2397 = vst.msk [vmem:[#allocation4 + $0xe] sm:$0x2] %vm512_vm3, %v2389_v31 }
0x1668   :  { %2381 = vrot.lane.b32.xlu0 %v2379_v14, %s3242_s0 }
0x166d   :  { %v2409_v5 = vld [vmem:[#allocation4] sm:$0xff] }
0x166e   :  { %v2410_v3 = vld [vmem:[#allocation4 + $0x8] sm:$0xff] }
0x16cd   :  { %v2416_v9 = vpop.permute.xlu1 %2415 }
0x16ce   :  { %v2418_v10 = vpop.permute.xlu0 %2417  ;;  %v3972_v11 = vsel %vm50_vm0, %v2409_v5, %v2416_v9 }
0x16cf   :  { %v3969_v7 = vsel %vm50_vm0, %v2410_v3, %v2418_v10  ;;  %2917 = vmatprep.mubr.msk.f32.mxu0 %vm2431_vm10, %v3972_v11 }
0x16d0   :  { %2918 = vmatmul.mubr.msk.f32.vlgmr.msra.gmra.mrb[16].mxu0 %vm2431_vm10, %v3969_v7 }
0x16d1   :  { %v2356_v26 = vpop.permute.xlu1 %2355 }
0x16d2   :  { %v2371_v2 = vpop.permute.xlu0 %2370  ;;  %v2358_v12 = vsel %vm483_vm6, %v3922_v55, %v2356_v26 }
0x16d3   :  { %2360 = vrot.lane.b32.xlu1 %v2358_v12, %s3239_s5  ;;  %v2373_v13 = vsel %vm463_vm7, %v3871_v19, %v2371_v2 }
0x16d6   :  { %v2367_v16 = vpop.permute.xlu0 %2366 }
0x16d7   :  { %2369 = vst.msk [vmem:[#allocation7] sm:$0x3] %vm222_vm1, %v2367_v16  ;;  %2375 = vrot.lane.b32.xlu1 %v2373_v13, %s3239_s5 }
0x16da   :  { %v2382_v27 = vpop.permute.xlu0 %2381 }
0x16db   :  { %2384 = vst.msk [vmem:[#allocation9] sm:$0x3] %vm222_vm1, %v2382_v27 }
0x16de   :  { %v2404_v17 = vld [vmem:[#allocation7] sm:$0x3] }
0x16df   :  { %2405 = vst.msk [vmem:[#allocation12] sm:$0x3] %vm222_vm1, %v2404_v17 }
0x16e2   :  { %v2406_v6 = vld [vmem:[#allocation9] sm:$0x3] }
0x16e3   :  { %2408 = vst.msk [vmem:[#allocation12 + $0x2] sm:$0x3] %vm222_vm1, %v2406_v6 }
0x1745   :  { %v2361_v24 = vpop.permute.xlu1 %2360 }
0x1746   :  { %2363 = vst.msk [vmem:[#allocation6] sm:$0x3] %vm222_vm1, %v2361_v24 }
0x1749   :  { %v2376_v49 = vpop.permute.xlu1 %2375 }
0x174a   :  { %2378 = vst.msk [vmem:[#allocation8] sm:$0x3] %vm222_vm1, %v2376_v49 }
0x174d   :  { %v2399_v28 = vld [vmem:[#allocation6] sm:$0x3] }
0x174e   :  { %2400 = vst.msk [vmem:[#allocation10] sm:$0x3] %vm222_vm1, %v2399_v28 }
0x1751   :  { %v2401_v15 = vld [vmem:[#allocation8] sm:$0x3] }
0x1752   :  { %2403 = vst.msk [vmem:[#allocation10 + $0x2] sm:$0x3] %vm222_vm1, %v2401_v15 }
0x1753   :  { %3199 = shalt.err (!%p3196_p4)
}
0x1754   :  { %s3200_s7 = scalar_lea.hbm %s4044_s10, 64 }
0x1755   :  { %p3201_p5 = scmp.ne.s32.totalorder %s4044_s10, %s3200_s7  ;;  %p3204_p6 = scmp.lt.u32.totalorder %s3200_s7, %s4044_s10 }
0x1757   :  { %p3206_p7 = pnand %p3204_p6, %p3201_p5 }
0x1759   :  { %3209 = shalt.err (!%p3206_p7)
}
0x175a   :  { %s3245_s17 = smov 2   ;;  %s3210_s20 = scalar_lea.vmem %s2545_s6, 64 }
0x175b   :  { %2538 = dma.vmem_to_hbm [thread:$0]  %s2533_s29, 64, %s4044_s10, [#allocation11], %s3239_s5, %s3239_s5, %s3245_s17  }
0x175c   :  { %p3211_p8 = scmp.ne.s32.totalorder %s2545_s6, %s3210_s20  ;;  %p3215_p9 = scmp.lt.s32.totalorder %s2545_s6, %s2545_s6 }
0x175d   :  { %p3216_p10 = scmp.lt.s32.totalorder %s3210_s20, %s3210_s20 }
0x175f   :  { %p3217_p11 = por %p3216_p10, %p3215_p9 }
0x1761   :  { %p3218_p12 = pnand %p3217_p11, %p3211_p8 }
0x1763   :  { %3221 = shalt.err (!%p3218_p12)
}
0x1764   :  { %s3222_s23 = scalar_lea.hbm %s4045_s11, 64 }
0x1765   :  { %p3223_p13 = scmp.ne.s32.totalorder %s4045_s11, %s3222_s23  ;;  %p3226_p0 = scmp.lt.u32.totalorder %s3222_s23, %s4045_s11 }
0x1767   :  { %p3228_p1 = pnand %p3226_p0, %p3223_p13 }
0x1769   :  { %3231 = shalt.err (!%p3228_p1)
}
0x176a   :  { %2550 = dma.vmem_to_hbm [thread:$0]  %s2545_s6, 64, %s4045_s11, [#allocation13], %s3239_s5, %s3239_s5, %s3245_s17  }
0x17a3   :  { %v2919_v18 = vpop.f32.mrb[16].mxu0 }
0x17a4   :  { %2517 = vrot.lane.b32.xlu0 %v2919_v18, %s3241_s4  ;;  %v2504_v63 = vpop.f32.mrb[17].mxu0 }
0x17a5   :  { %2515 = vrot.lane.b32.xlu1 %v2504_v63, %s3241_s4 }
0x1816   :  { %v2518_v35 = vpop.permute.xlu0 %2517 }
0x1817   :  { %v2522_v37 = vsel %vm2431_vm10, %v3969_v7, %v2518_v35  ;;  %v2516_v56 = vpop.permute.xlu1 %2515 }
0x1818   :  { %2524 = vst [vmem:[%s4043_s9 + $0x8] sm:$0xff] %v2522_v37  ;;  %v2521_v58 = vsel %vm2431_vm10, %v3972_v11, %v2516_v56 }
0x1819   :  { %2523 = vst [vmem:[%s4043_s9] sm:$0xff] %v2521_v58 }
0x181a   :  { %3232 = dma.done.wait [#allocation11], 64  }
0x181b   :  { %3233 = vsyncadd [#allocation11], 4294967232 }
0x181c   :  { %3234 = dma.done.wait [#allocation13], 64  }
0x181d   :  { %3235 = vsyncadd [#allocation13], 4294967232 }
0x181e   :  { %2559 = vsyncpa [#allocation11], 1 }
0x181f   :  { %2560 = vsyncpa [#allocation13], 1 }

</bundles_post_ra>
